<compile_context>
chip_gen: v7x
topology: tpu7x:2x2x1
jax: 0.10.0
libtpu: 0.0.40
codegen_flags: <defaults>
</compile_context>

<pallas_src>
import jax
import jax.numpy as jnp
from jax.experimental import pallas as pl
from jax.experimental.pallas import tpu as pltpu


_VMEM_LIMIT = 32 * 1024 * 1024   # safe on v5e/v6e (128 MiB) and v7x (64 MiB)


def _pick_tile_m(m):
    """Row-tile size: big enough to amortize per-step overhead, small enough
    to give >1 grid step (megacore) on the larger layers."""
    if m >= 1024:
        return 512
    if m >= 512:
        return 256
    for t in (256, 128, 64, 32, 16, 8):
        if m >= t:
            return t
    return 8


# -----------------------------------------------------------------------------
# Pallas kernels
# -----------------------------------------------------------------------------
def _make_conv_kernel(post, has_residual):
    """bf16 matmul -> +bias (+residual) -> {none|relu|sigmoid|clamp01} in f32."""
    def kernel(*refs):
        if has_residual:
            x_ref, w_ref, b_ref, r_ref, o_ref = refs
        else:
            x_ref, w_ref, b_ref, o_ref = refs
            r_ref = None
        acc = jnp.dot(x_ref[...], w_ref[...],
                      preferred_element_type=jnp.float32)
        acc = acc + b_ref[...]
        if r_ref is not None:
            acc = acc + r_ref[...]
        if post == "relu":
            acc = jnp.maximum(acc, 0.0)
        elif post == "sigmoid":
            acc = jax.nn.sigmoid(acc)
        elif post == "clamp01":
            acc = jnp.clip(acc, 0.0, 1.0)
        o_ref[...] = acc.astype(o_ref.dtype)
    return kernel


def _resblock_kernel(p_ref, w1_ref, b1_ref, w2_ref, b2_ref, r_ref, o_ref):
    """Fused ResBlock:  out = x + Conv1x1( ReLU( Conv3x3( ReLU(x) ) ) )."""
    p = jnp.maximum(p_ref[...], 0)                                   # ReLU(x) (bf16)
    h = jnp.dot(p, w1_ref[...], preferred_element_type=jnp.float32) + b1_ref[...]
    h = jnp.maximum(h, 0.0).astype(jnp.bfloat16)                     # ReLU
    out = jnp.dot(h, w2_ref[...], preferred_element_type=jnp.float32) + b2_ref[...]
    o_ref[...] = (out + r_ref[...]).astype(o_ref.dtype)


# -----------------------------------------------------------------------------
# pallas_call wrappers (tiling over M, resident weights)
# -----------------------------------------------------------------------------
def _fused_conv_call(patches, w2d, bias, *, post="none", residual2d=None):
    m, k = patches.shape
    nout = w2d.shape[1]
    tm = _pick_tile_m(m)
    mp = ((m + tm - 1) // tm) * tm

    p_pad = jnp.pad(patches, ((0, mp - m), (0, 0))).astype(jnp.bfloat16)
    inputs = [p_pad, w2d.astype(jnp.bfloat16),
              bias.reshape(1, nout).astype(jnp.float32)]
    in_specs = [
        pl.BlockSpec((tm, k), lambda i: (i, 0)),     # patch rows: tiled over M
        pl.BlockSpec((k, nout), lambda i: (0, 0)),   # weight: resident
        pl.BlockSpec((1, nout), lambda i: (0, 0)),   # bias:   resident
    ]
    has_residual = residual2d is not None
    io_aliases = {}
    if has_residual:
        r_pad = jnp.pad(residual2d.astype(jnp.float32), ((0, mp - m), (0, 0)))
        inputs.append(r_pad)
        in_specs.append(pl.BlockSpec((tm, nout), lambda i: (i, 0)))
        io_aliases = {3: 0}                          # reuse residual buffer as output

    bytes_accessed = (p_pad.size * 2 + k * nout * 2 + nout * 4
                      + mp * nout * 4 * (2 if has_residual else 1))
    cost = pl.CostEstimate(flops=2 * mp * k * nout,
                           transcendentals=mp * nout if post == "sigmoid" else 0,
                           bytes_accessed=bytes_accessed)

    out = pl.pallas_call(
        _make_conv_kernel(post, has_residual),
        grid=(mp // tm,),
        in_specs=in_specs,
        out_specs=pl.BlockSpec((tm, nout), lambda i: (i, 0)),
        out_shape=jax.ShapeDtypeStruct((mp, nout), jnp.float32),
        compiler_params=pltpu.CompilerParams(
            dimension_semantics=("parallel",),
            vmem_limit_bytes=_VMEM_LIMIT),
        cost_estimate=cost,
        input_output_aliases=io_aliases,
    )(*inputs)
    return out[:m]


def _fused_resblock_call(patches, w1, b1, w2, b2, x2d):
    m, k = patches.shape
    c = w1.shape[1]
    tm = _pick_tile_m(m)
    mp = ((m + tm - 1) // tm) * tm

    p_pad = jnp.pad(patches, ((0, mp - m), (0, 0))).astype(jnp.bfloat16)
    r_pad = jnp.pad(x2d.astype(jnp.float32), ((0, mp - m), (0, 0)))
    inputs = [p_pad,
              w1.astype(jnp.bfloat16), b1.reshape(1, c).astype(jnp.float32),
              w2.astype(jnp.bfloat16), b2.reshape(1, c).astype(jnp.float32),
              r_pad]
    in_specs = [
        pl.BlockSpec((tm, k), lambda i: (i, 0)),
        pl.BlockSpec((k, c), lambda i: (0, 0)),
        pl.BlockSpec((1, c), lambda i: (0, 0)),
        pl.BlockSpec((c, c), lambda i: (0, 0)),
        pl.BlockSpec((1, c), lambda i: (0, 0)),
        pl.BlockSpec((tm, c), lambda i: (i, 0)),
    ]
    cost = pl.CostEstimate(
        flops=2 * mp * c * (k + c), transcendentals=0,
        bytes_accessed=p_pad.size * 2 + (k + c) * c * 2 + 2 * c * 4
        + 2 * mp * c * 4)

    out = pl.pallas_call(
        _resblock_kernel,
        grid=(mp // tm,),
        in_specs=in_specs,
        out_specs=pl.BlockSpec((tm, c), lambda i: (i, 0)),
        out_shape=jax.ShapeDtypeStruct((mp, c), jnp.float32),
        compiler_params=pltpu.CompilerParams(
            dimension_semantics=("parallel",),
            vmem_limit_bytes=_VMEM_LIMIT),
        cost_estimate=cost,
        input_output_aliases={5: 0},
    )(*inputs)
    return out[:m]


# -----------------------------------------------------------------------------
# JAX glue: padding / im2col / polyphase weights (XLA-side, cheap at these sizes)
# -----------------------------------------------------------------------------
def _im2col(xpad, kh, kw):
    n, hp, wp, c = xpad.shape
    ho, wo = hp - kh + 1, wp - kw + 1
    cols = [xpad[:, i:i + ho, j:j + wo, :] for i in range(kh) for j in range(kw)]
    return jnp.concatenate(cols, axis=-1).reshape(n * ho * wo, kh * kw * c)


def conv2d_nhwc(x, w, b, *, pad=(0, 0), post="none", residual=None):
    """Stride-1 conv.  x: (N,H,W,Cin), w: (KH,KW,Cin,Cout)."""
    kh, kw, cin, cout = w.shape
    xpad = jnp.pad(x, ((0, 0), (pad[0], pad[0]), (pad[1], pad[1]), (0, 0)))
    n, hp, wp, _ = xpad.shape
    ho, wo = hp - kh + 1, wp - kw + 1
    patches = _im2col(xpad, kh, kw)
    r2d = residual.reshape(n * ho * wo, cout) if residual is not None else None
    out2d = _fused_conv_call(patches, w.reshape(kh * kw * cin, cout), b,
                             post=post, residual2d=r2d)
    return out2d.reshape(n, ho, wo, cout)


def resblock(x, rb):
    n, h, w_, c = x.shape
    xpad = jnp.pad(x, ((0, 0), (1, 1), (1, 1), (0, 0)))
    patches = _im2col(xpad, 3, 3)                       # (M, 9C)
    out2d = _fused_resblock_call(
        patches, rb["w1"].reshape(9 * c, c), rb["b1"],
        rb["w2"].reshape(c, c), rb["b2"], x.reshape(n * h * w_, c))
    return out2d.reshape(n, h, w_, c)


# Polyphase mapping for ConvTranspose2d(k=4, s=2, p=1), per axis:
#   even output rows: window offsets (0,1) in the pad-1 input, kernel idx (3,1)
#   odd  output rows: window offsets (1,2),                    kernel idx (2,0)
_PHASE_TAPS = {0: ((0, 3), (1, 1)), 1: ((1, 2), (2, 0))}


def convt4x4_s2_polyphase(x, wt, b, *, bn=None, post="none"):
    """ConvTranspose2d(Cin, Cout, 4, stride=2, padding=1) via polyphase.
    wt: PyTorch layout (Cin, Cout, 4, 4).  Output spatial = 2x input."""
    cin, cout = wt.shape[0], wt.shape[1]
    if bn is not None:                                   # fold inference BN
        gamma, beta, mean, var = bn
        scale = gamma / jnp.sqrt(var + 1e-5)
        wt = wt * scale.reshape(1, cout, 1, 1)
        b = (b - mean) * scale + beta
    w33 = jnp.zeros((3, 3, cin, 4 * cout), jnp.float32)
    for a in (0, 1):
        for pb in (0, 1):
            ph = 2 * a + pb
            for rh, kh in _PHASE_TAPS[a]:
                for rw, kw in _PHASE_TAPS[pb]:
                    w33 = w33.at[rh, rw, :, ph * cout:(ph + 1) * cout].set(
                        wt[:, :, kh, kw])
    b4 = jnp.tile(b, 4)
    n, h, w_, _ = x.shape
    y = conv2d_nhwc(x, w33, b4, pad=(1, 1), post=post)   # (N,H,W,4*Cout)
    y = y.reshape(n, h, w_, 2, 2, cout)
    y = jnp.transpose(y, (0, 1, 3, 2, 4, 5)).reshape(n, 2 * h, 2 * w_, cout)
    return y


def fold_bn(w, b, bn, eps=1e-5):
    """Fold inference BN into a conv weight laid out (KH,KW,Cin,Cout)."""
    gamma, beta, mean, var = bn
    scale = gamma / jnp.sqrt(var + eps)
    return w * scale, (b - mean) * scale + beta


# -----------------------------------------------------------------------------
# Parameter init (deterministic, synthetic — matches the PyTorch module shapes)
# -----------------------------------------------------------------------------
def _conv_w(key, cout, cin, kh, kw, scale=0.05):
    w = scale * jax.random.normal(key, (cout, cin, kh, kw), jnp.float32)
    return jnp.transpose(w, (2, 3, 1, 0))                # -> (KH,KW,Cin,Cout)


def _convt_w_equivconv(key, cin, cout, kh, kw, scale=0.05):
    # stride-1 ConvTranspose2d -> equivalent conv weight (flipped), (KH,KW,Cin,Cout)
    wt = scale * jax.random.normal(key, (cin, cout, kh, kw), jnp.float32)
    return jnp.transpose(jnp.flip(wt, (2, 3)), (2, 3, 0, 1))


def _convt_w_raw(key, cin, cout, kh, kw, scale=0.05):
    return scale * jax.random.normal(key, (cin, cout, kh, kw), jnp.float32)


def _bias(key, c, scale=0.01):
    return scale * jax.random.normal(key, (c,), jnp.float32)


def _bn(key, c):
    k1, k2, k3, k4 = jax.random.split(key, 4)
    gamma = 1.0 + 0.1 * jax.random.normal(k1, (c,), jnp.float32)
    beta = 0.1 * jax.random.normal(k2, (c,), jnp.float32)
    mean = 0.1 * jax.random.normal(k3, (c,), jnp.float32)
    var = 1.0 + 0.1 * jax.random.uniform(k4, (c,), jnp.float32)
    return (gamma, beta, mean, var)


def init_params(key, dim_z, num_rb):
    keys = iter(jax.random.split(key, 64))
    nk = lambda: next(keys)
    res = []
    for _ in range(num_rb - 1):
        res.append(dict(
            w1=_conv_w(nk(), dim_z, dim_z, 3, 3), b1=_bias(nk(), dim_z),
            w2=_conv_w(nk(), dim_z, dim_z, 1, 1), b2=_bias(nk(), dim_z)))
    p = dict(res=res)
    p["ct1_w"] = _convt_w_equivconv(nk(), dim_z, dim_z, 3, 3)   # s=1,p=1
    p["ct1_b"] = _bias(nk(), dim_z)
    p["bn1"] = _bn(nk(), dim_z)
    p["ct2_w"] = _convt_w_raw(nk(), dim_z, dim_z // 2, 4, 4)    # s=2,p=1
    p["ct2_b"] = _bias(nk(), dim_z // 2)
    p["bn2"] = _bn(nk(), dim_z // 2)
    p["ct3_w"] = _convt_w_raw(nk(), dim_z // 2, 3, 4, 4)        # s=2,p=1
    p["ct3_b"] = _bias(nk(), 3)
    # MicroDopplerEnhancer (assumed): freq 5x1, time 1x5, fuse 3x3
    p["enh_wf"] = _conv_w(nk(), 16, 3, 5, 1)
    p["enh_bf"] = _bias(nk(), 16)
    p["enh_wt"] = _conv_w(nk(), 16, 3, 1, 5)
    p["enh_bt"] = _bias(nk(), 16)
    p["enh_wfuse"] = _conv_w(nk(), 3, 32, 3, 3)
    p["enh_bfuse"] = _bias(nk(), 3)
    return p


# -----------------------------------------------------------------------------
# Forward pass of DecoderVq_enhanced_resnet
# -----------------------------------------------------------------------------
def decoder_forward(z_nchw, params):
    x = jnp.transpose(z_nchw, (0, 2, 3, 1)).astype(jnp.float32)   # NCHW -> NHWC

    # self.res : (num_rb - 1) x ResBlock(dim_z), each one fused pallas_call.
    for rb in params["res"]:
        x = resblock(x, rb)

    # convt[0]: ConvTranspose2d(dim_z, dim_z, 3, s=1, p=1) + BN + ReLU
    w, b = fold_bn(params["ct1_w"], params["ct1_b"], params["bn1"])
    x = conv2d_nhwc(x, w, b, pad=(1, 1), post="relu")

    # convt[1]: ConvTranspose2d(dim_z, dim_z//2, 4, s=2, p=1) + BN + ReLU
    x = convt4x4_s2_polyphase(x, params["ct2_w"], params["ct2_b"],
                              bn=params["bn2"], post="relu")

    # convt[2]: ConvTranspose2d(dim_z//2, 3, 4, s=2, p=1) + Sigmoid
    base = convt4x4_s2_polyphase(x, params["ct3_w"], params["ct3_b"],
                                 bn=None, post="sigmoid")

    # MicroDopplerEnhancer: fused dual-branch (freq 5x1 | time 1x5) in one call.
    w55 = jnp.zeros((5, 5, 3, 32), jnp.float32)
    w55 = w55.at[:, 2, :, :16].set(params["enh_wf"][:, 0])   # 5x1 branch (center col)
    w55 = w55.at[2, :, :, 16:].set(params["enh_wt"][0])      # 1x5 branch (center row)
    b_cat = jnp.concatenate([params["enh_bf"], params["enh_bt"]])
    d = conv2d_nhwc(base, w55, b_cat, pad=(2, 2), post="relu")
    out = conv2d_nhwc(d, params["enh_wfuse"], params["enh_bfuse"], pad=(1, 1),
                      residual=base, post="clamp01")

    return jnp.transpose(out, (0, 3, 1, 2))                       # NHWC -> NCHW


if __name__ == "__main__":
    dim_z, num_rb = 32, 2          # cfgs.num_rb = 2 -> one ResBlock
    B, H, W = 2, 8, 8

    key = jax.random.PRNGKey(0)
    k_params, k_z = jax.random.split(key)
    params = init_params(k_params, dim_z, num_rb)
    z = jax.random.normal(k_z, (B, dim_z, H, W), jnp.float32)

    fwd = jax.jit(decoder_forward)
    out = jax.block_until_ready(fwd(z, params))

    assert out.shape == (B, 3, 4 * H, 4 * W), out.shape
    assert bool(jnp.all(jnp.isfinite(out)))
    assert bool(jnp.all((out >= 0.0) & (out <= 1.0)))
    print("KERNEL_OK")
</pallas_src>

<mosaic_0001>
module attributes {stable_mosaic.version = 11 : i64} {
  func.func @_resblock_kernel(%arg0: i32, %arg1: memref<128x288xbf16, #tpu.memory_space<vmem>>, %arg2: memref<288x32xbf16, #tpu.memory_space<vmem>>, %arg3: memref<1x32xf32, #tpu.memory_space<vmem>>, %arg4: memref<32x32xbf16, #tpu.memory_space<vmem>>, %arg5: memref<1x32xf32, #tpu.memory_space<vmem>>, %arg6: memref<128x32xf32, #tpu.memory_space<vmem>>, %arg7: memref<128x32xf32, #tpu.memory_space<vmem>>) attributes {dimension_semantics = [#tpu.dimension_semantics<parallel>], iteration_bounds = array<i64: 1>, scalar_prefetch = 0 : i64, scratch_operands = 0 : i64, tpu.core_type = #tpu.core_type<tc>, window_params = [{transform_indices = @transform_0, window_bounds = array<i64: 128, 288>}, {pipeline_mode = #tpu.pipeline_mode<synchronous>, transform_indices = @transform_1, window_bounds = array<i64: 288, 32>}, {pipeline_mode = #tpu.pipeline_mode<synchronous>, transform_indices = @transform_2, window_bounds = array<i64: 1, 32>}, {pipeline_mode = #tpu.pipeline_mode<synchronous>, transform_indices = @transform_3, window_bounds = array<i64: 32, 32>}, {pipeline_mode = #tpu.pipeline_mode<synchronous>, transform_indices = @transform_4, window_bounds = array<i64: 1, 32>}, {transform_indices = @transform_5, window_bounds = array<i64: 128, 32>}, {transform_indices = @transform_6, window_bounds = array<i64: 128, 32>}]} {
    %c0 = arith.constant 0 : index
    %c0_0 = arith.constant 0 : index
    %0 = vector.load %arg1[%c0, %c0_0] : memref<128x288xbf16, #tpu.memory_space<vmem>>, vector<128x288xbf16>
    %cst = arith.constant 0.000000e+00 : bf16
    %1 = vector.broadcast %cst : bf16 to vector<128x288xbf16>
    %2 = arith.maximumf %0, %1 : vector<128x288xbf16>
    %c0_1 = arith.constant 0 : index
    %c0_2 = arith.constant 0 : index
    %3 = vector.load %arg2[%c0_1, %c0_2] : memref<288x32xbf16, #tpu.memory_space<vmem>>, vector<288x32xbf16>
    %cst_3 = arith.constant dense<0.000000e+00> : vector<128x32xf32>
    %4 = tpu.matmul %2, %3, %cst_3 {dimension_numbers = #tpu.dot_dimension_numbers<[1], [0], [0], [1], [0, 0, 1, 1], [], []>} : vector<128x288xbf16>, vector<288x32xbf16>, vector<128x32xf32> -> vector<128x32xf32>
    %c0_4 = arith.constant 0 : index
    %c0_5 = arith.constant 0 : index
    %5 = vector.load %arg3[%c0_4, %c0_5] : memref<1x32xf32, #tpu.memory_space<vmem>>, vector<1x32xf32>
    %6 = vector.broadcast %5 : vector<1x32xf32> to vector<128x32xf32>
    %7 = arith.addf %4, %6 : vector<128x32xf32>
    %cst_6 = arith.constant 0.000000e+00 : f32
    %8 = vector.broadcast %cst_6 : f32 to vector<128x32xf32>
    %9 = arith.maximumf %7, %8 : vector<128x32xf32>
    %10 = arith.truncf %9 : vector<128x32xf32> to vector<128x32xbf16>
    %c0_7 = arith.constant 0 : index
    %c0_8 = arith.constant 0 : index
    %11 = vector.load %arg4[%c0_7, %c0_8] : memref<32x32xbf16, #tpu.memory_space<vmem>>, vector<32x32xbf16>
    %cst_9 = arith.constant dense<0.000000e+00> : vector<128x32xf32>
    %12 = tpu.matmul %10, %11, %cst_9 {dimension_numbers = #tpu.dot_dimension_numbers<[1], [0], [0], [1], [0, 0, 1, 1], [], []>} : vector<128x32xbf16>, vector<32x32xbf16>, vector<128x32xf32> -> vector<128x32xf32>
    %c0_10 = arith.constant 0 : index
    %c0_11 = arith.constant 0 : index
    %13 = vector.load %arg5[%c0_10, %c0_11] : memref<1x32xf32, #tpu.memory_space<vmem>>, vector<1x32xf32>
    %14 = vector.broadcast %13 : vector<1x32xf32> to vector<128x32xf32>
    %15 = arith.addf %12, %14 : vector<128x32xf32>
    %c0_12 = arith.constant 0 : index
    %c0_13 = arith.constant 0 : index
    %16 = vector.load %arg6[%c0_12, %c0_13] : memref<128x32xf32, #tpu.memory_space<vmem>>, vector<128x32xf32>
    %17 = arith.addf %15, %16 : vector<128x32xf32>
    %c0_14 = arith.constant 0 : index
    %c0_15 = arith.constant 0 : index
    %18 = vector.load %arg7[%c0_14, %c0_15] : memref<128x32xf32, #tpu.memory_space<vmem>>, vector<128x32xf32>
    tpu.vector_store %arg7[%c0_14, %c0_15], %17 {strides = array<i32>} : memref<128x32xf32, #tpu.memory_space<vmem>>, vector<128x32xf32>,
    return
  }
  func.func @transform_0(%arg0: i32) -> (i32, i32) {
    %c0_i32 = arith.constant 0 : i32
    %c0_i32_0 = arith.constant 0 : i32
    return %arg0, %c0_i32 : i32, i32
  }
  func.func @transform_1(%arg0: i32) -> (i32, i32) {
    %c0_i32 = arith.constant 0 : i32
    %c0_i32_0 = arith.constant 0 : i32
    %c0_i32_1 = arith.constant 0 : i32
    return %c0_i32, %c0_i32_0 : i32, i32
  }
  func.func @transform_2(%arg0: i32) -> (i32, i32) {
    %c0_i32 = arith.constant 0 : i32
    %c0_i32_0 = arith.constant 0 : i32
    %c0_i32_1 = arith.constant 0 : i32
    return %c0_i32, %c0_i32_0 : i32, i32
  }
  func.func @transform_3(%arg0: i32) -> (i32, i32) {
    %c0_i32 = arith.constant 0 : i32
    %c0_i32_0 = arith.constant 0 : i32
    %c0_i32_1 = arith.constant 0 : i32
    return %c0_i32, %c0_i32_0 : i32, i32
  }
  func.func @transform_4(%arg0: i32) -> (i32, i32) {
    %c0_i32 = arith.constant 0 : i32
    %c0_i32_0 = arith.constant 0 : i32
    %c0_i32_1 = arith.constant 0 : i32
    return %c0_i32, %c0_i32_0 : i32, i32
  }
  func.func @transform_5(%arg0: i32) -> (i32, i32) {
    %c0_i32 = arith.constant 0 : i32
    %c0_i32_0 = arith.constant 0 : i32
    return %arg0, %c0_i32 : i32, i32
  }
  func.func @transform_6(%arg0: i32) -> (i32, i32) {
    %c0_i32 = arith.constant 0 : i32
    %c0_i32_0 = arith.constant 0 : i32
    return %arg0, %c0_i32 : i32, i32
  }
}

module attributes {stable_mosaic.version = 11 : i64} {
  func.func @kernel(%arg0: i32, %arg1: memref<128x288xbf16, #tpu.memory_space<vmem>>, %arg2: memref<288x32xbf16, #tpu.memory_space<vmem>>, %arg3: memref<1x32xf32, #tpu.memory_space<vmem>>, %arg4: memref<128x32xf32, #tpu.memory_space<vmem>>) attributes {dimension_semantics = [#tpu.dimension_semantics<parallel>], iteration_bounds = array<i64: 1>, scalar_prefetch = 0 : i64, scratch_operands = 0 : i64, tpu.core_type = #tpu.core_type<tc>, window_params = [{transform_indices = @transform_0, window_bounds = array<i64: 128, 288>}, {pipeline_mode = #tpu.pipeline_mode<synchronous>, transform_indices = @transform_1, window_bounds = array<i64: 288, 32>}, {pipeline_mode = #tpu.pipeline_mode<synchronous>, transform_indices = @transform_2, window_bounds = array<i64: 1, 32>}, {transform_indices = @transform_3, window_bounds = array<i64: 128, 32>}]} {
    %c0 = arith.constant 0 : index
    %c0_0 = arith.constant 0 : index
    %0 = vector.load %arg1[%c0, %c0_0] : memref<128x288xbf16, #tpu.memory_space<vmem>>, vector<128x288xbf16>
    %c0_1 = arith.constant 0 : index
    %c0_2 = arith.constant 0 : index
    %1 = vector.load %arg2[%c0_1, %c0_2] : memref<288x32xbf16, #tpu.memory_space<vmem>>, vector<288x32xbf16>
    %cst = arith.constant dense<0.000000e+00> : vector<128x32xf32>
    %2 = tpu.matmul %0, %1, %cst {dimension_numbers = #tpu.dot_dimension_numbers<[1], [0], [0], [1], [0, 0, 1, 1], [], []>} : vector<128x288xbf16>, vector<288x32xbf16>, vector<128x32xf32> -> vector<128x32xf32>
    %c0_3 = arith.constant 0 : index
    %c0_4 = arith.constant 0 : index
    %3 = vector.load %arg3[%c0_3, %c0_4] : memref<1x32xf32, #tpu.memory_space<vmem>>, vector<1x32xf32>
    %4 = vector.broadcast %3 : vector<1x32xf32> to vector<128x32xf32>
    %5 = arith.addf %2, %4 : vector<128x32xf32>
    %cst_5 = arith.constant 0.000000e+00 : f32
    %6 = vector.broadcast %cst_5 : f32 to vector<128x32xf32>
    %7 = arith.maximumf %5, %6 : vector<128x32xf32>
    %c0_6 = arith.constant 0 : index
    %c0_7 = arith.constant 0 : index
    %8 = vector.load %arg4[%c0_6, %c0_7] : memref<128x32xf32, #tpu.memory_space<vmem>>, vector<128x32xf32>
    tpu.vector_store %arg4[%c0_6, %c0_7], %7 {strides = array<i32>} : memref<128x32xf32, #tpu.memory_space<vmem>>, vector<128x32xf32>,
    return
  }
  func.func @transform_0(%arg0: i32) -> (i32, i32) {
    %c0_i32 = arith.constant 0 : i32
    %c0_i32_0 = arith.constant 0 : i32
    return %arg0, %c0_i32 : i32, i32
  }
  func.func @transform_1(%arg0: i32) -> (i32, i32) {
    %c0_i32 = arith.constant 0 : i32
    %c0_i32_0 = arith.constant 0 : i32
    %c0_i32_1 = arith.constant 0 : i32
    return %c0_i32, %c0_i32_0 : i32, i32
  }
  func.func @transform_2(%arg0: i32) -> (i32, i32) {
    %c0_i32 = arith.constant 0 : i32
    %c0_i32_0 = arith.constant 0 : i32
    %c0_i32_1 = arith.constant 0 : i32
    return %c0_i32, %c0_i32_0 : i32, i32
  }
  func.func @transform_3(%arg0: i32) -> (i32, i32) {
    %c0_i32 = arith.constant 0 : i32
    %c0_i32_0 = arith.constant 0 : i32
    return %arg0, %c0_i32 : i32, i32
  }
}

module attributes {stable_mosaic.version = 11 : i64} {
  func.func @kernel(%arg0: i32, %arg1: memref<128x288xbf16, #tpu.memory_space<vmem>>, %arg2: memref<288x64xbf16, #tpu.memory_space<vmem>>, %arg3: memref<1x64xf32, #tpu.memory_space<vmem>>, %arg4: memref<128x64xf32, #tpu.memory_space<vmem>>) attributes {dimension_semantics = [#tpu.dimension_semantics<parallel>], iteration_bounds = array<i64: 1>, scalar_prefetch = 0 : i64, scratch_operands = 0 : i64, tpu.core_type = #tpu.core_type<tc>, window_params = [{transform_indices = @transform_0, window_bounds = array<i64: 128, 288>}, {pipeline_mode = #tpu.pipeline_mode<synchronous>, transform_indices = @transform_1, window_bounds = array<i64: 288, 64>}, {pipeline_mode = #tpu.pipeline_mode<synchronous>, transform_indices = @transform_2, window_bounds = array<i64: 1, 64>}, {transform_indices = @transform_3, window_bounds = array<i64: 128, 64>}]} {
    %c0 = arith.constant 0 : index
    %c0_0 = arith.constant 0 : index
    %0 = vector.load %arg1[%c0, %c0_0] : memref<128x288xbf16, #tpu.memory_space<vmem>>, vector<128x288xbf16>
    %c0_1 = arith.constant 0 : index
    %c0_2 = arith.constant 0 : index
    %1 = vector.load %arg2[%c0_1, %c0_2] : memref<288x64xbf16, #tpu.memory_space<vmem>>, vector<288x64xbf16>
    %cst = arith.constant dense<0.000000e+00> : vector<128x64xf32>
    %2 = tpu.matmul %0, %1, %cst {dimension_numbers = #tpu.dot_dimension_numbers<[1], [0], [0], [1], [0, 0, 1, 1], [], []>} : vector<128x288xbf16>, vector<288x64xbf16>, vector<128x64xf32> -> vector<128x64xf32>
    %c0_3 = arith.constant 0 : index
    %c0_4 = arith.constant 0 : index
    %3 = vector.load %arg3[%c0_3, %c0_4] : memref<1x64xf32, #tpu.memory_space<vmem>>, vector<1x64xf32>
    %4 = vector.broadcast %3 : vector<1x64xf32> to vector<128x64xf32>
    %5 = arith.addf %2, %4 : vector<128x64xf32>
    %cst_5 = arith.constant 0.000000e+00 : f32
    %6 = vector.broadcast %cst_5 : f32 to vector<128x64xf32>
    %7 = arith.maximumf %5, %6 : vector<128x64xf32>
    %c0_6 = arith.constant 0 : index
    %c0_7 = arith.constant 0 : index
    %8 = vector.load %arg4[%c0_6, %c0_7] : memref<128x64xf32, #tpu.memory_space<vmem>>, vector<128x64xf32>
    tpu.vector_store %arg4[%c0_6, %c0_7], %7 {strides = array<i32>} : memref<128x64xf32, #tpu.memory_space<vmem>>, vector<128x64xf32>,
    return
  }
  func.func @transform_0(%arg0: i32) -> (i32, i32) {
    %c0_i32 = arith.constant 0 : i32
    %c0_i32_0 = arith.constant 0 : i32
    return %arg0, %c0_i32 : i32, i32
  }
  func.func @transform_1(%arg0: i32) -> (i32, i32) {
    %c0_i32 = arith.constant 0 : i32
    %c0_i32_0 = arith.constant 0 : i32
    %c0_i32_1 = arith.constant 0 : i32
    return %c0_i32, %c0_i32_0 : i32, i32
  }
  func.func @transform_2(%arg0: i32) -> (i32, i32) {
    %c0_i32 = arith.constant 0 : i32
    %c0_i32_0 = arith.constant 0 : i32
    %c0_i32_1 = arith.constant 0 : i32
    return %c0_i32, %c0_i32_0 : i32, i32
  }
  func.func @transform_3(%arg0: i32) -> (i32, i32) {
    %c0_i32 = arith.constant 0 : i32
    %c0_i32_0 = arith.constant 0 : i32
    return %arg0, %c0_i32 : i32, i32
  }
}

module attributes {stable_mosaic.version = 11 : i64} {
  func.func @kernel(%arg0: i32, %arg1: memref<256x144xbf16, #tpu.memory_space<vmem>>, %arg2: memref<144x12xbf16, #tpu.memory_space<vmem>>, %arg3: memref<1x12xf32, #tpu.memory_space<vmem>>, %arg4: memref<256x12xf32, #tpu.memory_space<vmem>>) attributes {dimension_semantics = [#tpu.dimension_semantics<parallel>], iteration_bounds = array<i64: 2>, scalar_prefetch = 0 : i64, scratch_operands = 0 : i64, tpu.core_type = #tpu.core_type<tc>, window_params = [{transform_indices = @transform_0, window_bounds = array<i64: 256, 144>}, {pipeline_mode = #tpu.pipeline_mode<synchronous>, transform_indices = @transform_1, window_bounds = array<i64: 144, 12>}, {pipeline_mode = #tpu.pipeline_mode<synchronous>, transform_indices = @transform_2, window_bounds = array<i64: 1, 12>}, {transform_indices = @transform_3, window_bounds = array<i64: 256, 12>}]} {
    %c0 = arith.constant 0 : index
    %c0_0 = arith.constant 0 : index
    %0 = vector.load %arg1[%c0, %c0_0] : memref<256x144xbf16, #tpu.memory_space<vmem>>, vector<256x144xbf16>
    %c0_1 = arith.constant 0 : index
    %c0_2 = arith.constant 0 : index
    %1 = vector.load %arg2[%c0_1, %c0_2] : memref<144x12xbf16, #tpu.memory_space<vmem>>, vector<144x12xbf16>
    %cst = arith.constant dense<0.000000e+00> : vector<256x12xf32>
    %2 = tpu.matmul %0, %1, %cst {dimension_numbers = #tpu.dot_dimension_numbers<[1], [0], [0], [1], [0, 0, 1, 1], [], []>} : vector<256x144xbf16>, vector<144x12xbf16>, vector<256x12xf32> -> vector<256x12xf32>
    %c0_3 = arith.constant 0 : index
    %c0_4 = arith.constant 0 : index
    %3 = vector.load %arg3[%c0_3, %c0_4] : memref<1x12xf32, #tpu.memory_space<vmem>>, vector<1x12xf32>
    %4 = vector.broadcast %3 : vector<1x12xf32> to vector<256x12xf32>
    %5 = arith.addf %2, %4 : vector<256x12xf32>
    %6 = arith.negf %5 : vector<256x12xf32>
    %7 = math.exp %6 : vector<256x12xf32>
    %cst_5 = arith.constant 1.000000e+00 : f32
    %8 = vector.broadcast %cst_5 : f32 to vector<256x12xf32>
    %9 = arith.addf %8, %7 : vector<256x12xf32>
    %10 = arith.divf %8, %9 : vector<256x12xf32>
    %c0_6 = arith.constant 0 : index
    %c0_7 = arith.constant 0 : index
    %11 = vector.load %arg4[%c0_6, %c0_7] : memref<256x12xf32, #tpu.memory_space<vmem>>, vector<256x12xf32>
    tpu.vector_store %arg4[%c0_6, %c0_7], %10 {strides = array<i32>} : memref<256x12xf32, #tpu.memory_space<vmem>>, vector<256x12xf32>,
    return
  }
  func.func @transform_0(%arg0: i32) -> (i32, i32) {
    %c0_i32 = arith.constant 0 : i32
    %c0_i32_0 = arith.constant 0 : i32
    return %arg0, %c0_i32 : i32, i32
  }
  func.func @transform_1(%arg0: i32) -> (i32, i32) {
    %c0_i32 = arith.constant 0 : i32
    %c0_i32_0 = arith.constant 0 : i32
    %c0_i32_1 = arith.constant 0 : i32
    return %c0_i32, %c0_i32_0 : i32, i32
  }
  func.func @transform_2(%arg0: i32) -> (i32, i32) {
    %c0_i32 = arith.constant 0 : i32
    %c0_i32_0 = arith.constant 0 : i32
    %c0_i32_1 = arith.constant 0 : i32
    return %c0_i32, %c0_i32_0 : i32, i32
  }
  func.func @transform_3(%arg0: i32) -> (i32, i32) {
    %c0_i32 = arith.constant 0 : i32
    %c0_i32_0 = arith.constant 0 : i32
    return %arg0, %c0_i32 : i32, i32
  }
}

module attributes {stable_mosaic.version = 11 : i64} {
  func.func @kernel(%arg0: i32, %arg1: memref<512x75xbf16, #tpu.memory_space<vmem>>, %arg2: memref<75x32xbf16, #tpu.memory_space<vmem>>, %arg3: memref<1x32xf32, #tpu.memory_space<vmem>>, %arg4: memref<512x32xf32, #tpu.memory_space<vmem>>) attributes {dimension_semantics = [#tpu.dimension_semantics<parallel>], iteration_bounds = array<i64: 4>, scalar_prefetch = 0 : i64, scratch_operands = 0 : i64, tpu.core_type = #tpu.core_type<tc>, window_params = [{transform_indices = @transform_0, window_bounds = array<i64: 512, 75>}, {pipeline_mode = #tpu.pipeline_mode<synchronous>, transform_indices = @transform_1, window_bounds = array<i64: 75, 32>}, {pipeline_mode = #tpu.pipeline_mode<synchronous>, transform_indices = @transform_2, window_bounds = array<i64: 1, 32>}, {transform_indices = @transform_3, window_bounds = array<i64: 512, 32>}]} {
    %c0 = arith.constant 0 : index
    %c0_0 = arith.constant 0 : index
    %0 = vector.load %arg1[%c0, %c0_0] : memref<512x75xbf16, #tpu.memory_space<vmem>>, vector<512x75xbf16>
    %c0_1 = arith.constant 0 : index
    %c0_2 = arith.constant 0 : index
    %1 = vector.load %arg2[%c0_1, %c0_2] : memref<75x32xbf16, #tpu.memory_space<vmem>>, vector<75x32xbf16>
    %cst = arith.constant dense<0.000000e+00> : vector<512x32xf32>
    %2 = tpu.matmul %0, %1, %cst {dimension_numbers = #tpu.dot_dimension_numbers<[1], [0], [0], [1], [0, 0, 1, 1], [], []>} : vector<512x75xbf16>, vector<75x32xbf16>, vector<512x32xf32> -> vector<512x32xf32>
    %c0_3 = arith.constant 0 : index
    %c0_4 = arith.constant 0 : index
    %3 = vector.load %arg3[%c0_3, %c0_4] : memref<1x32xf32, #tpu.memory_space<vmem>>, vector<1x32xf32>
    %4 = vector.broadcast %3 : vector<1x32xf32> to vector<512x32xf32>
    %5 = arith.addf %2, %4 : vector<512x32xf32>
    %cst_5 = arith.constant 0.000000e+00 : f32
    %6 = vector.broadcast %cst_5 : f32 to vector<512x32xf32>
    %7 = arith.maximumf %5, %6 : vector<512x32xf32>
    %c0_6 = arith.constant 0 : index
    %c0_7 = arith.constant 0 : index
    %8 = vector.load %arg4[%c0_6, %c0_7] : memref<512x32xf32, #tpu.memory_space<vmem>>, vector<512x32xf32>
    tpu.vector_store %arg4[%c0_6, %c0_7], %7 {strides = array<i32>} : memref<512x32xf32, #tpu.memory_space<vmem>>, vector<512x32xf32>,
    return
  }
  func.func @transform_0(%arg0: i32) -> (i32, i32) {
    %c0_i32 = arith.constant 0 : i32
    %c0_i32_0 = arith.constant 0 : i32
    return %arg0, %c0_i32 : i32, i32
  }
  func.func @transform_1(%arg0: i32) -> (i32, i32) {
    %c0_i32 = arith.constant 0 : i32
    %c0_i32_0 = arith.constant 0 : i32
    %c0_i32_1 = arith.constant 0 : i32
    return %c0_i32, %c0_i32_0 : i32, i32
  }
  func.func @transform_2(%arg0: i32) -> (i32, i32) {
    %c0_i32 = arith.constant 0 : i32
    %c0_i32_0 = arith.constant 0 : i32
    %c0_i32_1 = arith.constant 0 : i32
    return %c0_i32, %c0_i32_0 : i32, i32
  }
  func.func @transform_3(%arg0: i32) -> (i32, i32) {
    %c0_i32 = arith.constant 0 : i32
    %c0_i32_0 = arith.constant 0 : i32
    return %arg0, %c0_i32 : i32, i32
  }
}

module attributes {stable_mosaic.version = 11 : i64} {
  func.func @kernel(%arg0: i32, %arg1: memref<512x288xbf16, #tpu.memory_space<vmem>>, %arg2: memref<288x3xbf16, #tpu.memory_space<vmem>>, %arg3: memref<1x3xf32, #tpu.memory_space<vmem>>, %arg4: memref<512x3xf32, #tpu.memory_space<vmem>>, %arg5: memref<512x3xf32, #tpu.memory_space<vmem>>) attributes {dimension_semantics = [#tpu.dimension_semantics<parallel>], iteration_bounds = array<i64: 4>, scalar_prefetch = 0 : i64, scratch_operands = 0 : i64, tpu.core_type = #tpu.core_type<tc>, window_params = [{transform_indices = @transform_0, window_bounds = array<i64: 512, 288>}, {pipeline_mode = #tpu.pipeline_mode<synchronous>, transform_indices = @transform_1, window_bounds = array<i64: 288, 3>}, {pipeline_mode = #tpu.pipeline_mode<synchronous>, transform_indices = @transform_2, window_bounds = array<i64: 1, 3>}, {transform_indices = @transform_3, window_bounds = array<i64: 512, 3>}, {transform_indices = @transform_4, window_bounds = array<i64: 512, 3>}]} {
    %c0 = arith.constant 0 : index
    %c0_0 = arith.constant 0 : index
    %0 = vector.load %arg1[%c0, %c0_0] : memref<512x288xbf16, #tpu.memory_space<vmem>>, vector<512x288xbf16>
    %c0_1 = arith.constant 0 : index
    %c0_2 = arith.constant 0 : index
    %1 = vector.load %arg2[%c0_1, %c0_2] : memref<288x3xbf16, #tpu.memory_space<vmem>>, vector<288x3xbf16>
    %cst = arith.constant dense<0.000000e+00> : vector<512x3xf32>
    %2 = tpu.matmul %0, %1, %cst {dimension_numbers = #tpu.dot_dimension_numbers<[1], [0], [0], [1], [0, 0, 1, 1], [], []>} : vector<512x288xbf16>, vector<288x3xbf16>, vector<512x3xf32> -> vector<512x3xf32>
    %c0_3 = arith.constant 0 : index
    %c0_4 = arith.constant 0 : index
    %3 = vector.load %arg3[%c0_3, %c0_4] : memref<1x3xf32, #tpu.memory_space<vmem>>, vector<1x3xf32>
    %4 = vector.broadcast %3 : vector<1x3xf32> to vector<512x3xf32>
    %5 = arith.addf %2, %4 : vector<512x3xf32>
    %c0_5 = arith.constant 0 : index
    %c0_6 = arith.constant 0 : index
    %6 = vector.load %arg4[%c0_5, %c0_6] : memref<512x3xf32, #tpu.memory_space<vmem>>, vector<512x3xf32>
    %7 = arith.addf %5, %6 : vector<512x3xf32>
    %cst_7 = arith.constant 0.000000e+00 : f32
    %cst_8 = arith.constant 1.000000e+00 : f32
    %8 = vector.broadcast %cst_7 : f32 to vector<512x3xf32>
    %9 = arith.maximumf %8, %7 : vector<512x3xf32>
    %10 = vector.broadcast %cst_8 : f32 to vector<512x3xf32>
    %11 = arith.minimumf %10, %9 : vector<512x3xf32>
    %c0_9 = arith.constant 0 : index
    %c0_10 = arith.constant 0 : index
    %12 = vector.load %arg5[%c0_9, %c0_10] : memref<512x3xf32, #tpu.memory_space<vmem>>, vector<512x3xf32>
    tpu.vector_store %arg5[%c0_9, %c0_10], %11 {strides = array<i32>} : memref<512x3xf32, #tpu.memory_space<vmem>>, vector<512x3xf32>,
    return
  }
  func.func @transform_0(%arg0: i32) -> (i32, i32) {
    %c0_i32 = arith.constant 0 : i32
    %c0_i32_0 = arith.constant 0 : i32
    return %arg0, %c0_i32 : i32, i32
  }
  func.func @transform_1(%arg0: i32) -> (i32, i32) {
    %c0_i32 = arith.constant 0 : i32
    %c0_i32_0 = arith.constant 0 : i32
    %c0_i32_1 = arith.constant 0 : i32
    return %c0_i32, %c0_i32_0 : i32, i32
  }
  func.func @transform_2(%arg0: i32) -> (i32, i32) {
    %c0_i32 = arith.constant 0 : i32
    %c0_i32_0 = arith.constant 0 : i32
    %c0_i32_1 = arith.constant 0 : i32
    return %c0_i32, %c0_i32_0 : i32, i32
  }
  func.func @transform_3(%arg0: i32) -> (i32, i32) {
    %c0_i32 = arith.constant 0 : i32
    %c0_i32_0 = arith.constant 0 : i32
    return %arg0, %c0_i32 : i32, i32
  }
  func.func @transform_4(%arg0: i32) -> (i32, i32) {
    %c0_i32 = arith.constant 0 : i32
    %c0_i32_0 = arith.constant 0 : i32
    return %arg0, %c0_i32 : i32, i32
  }
}

</mosaic_0001>

<bundles_post_ra>
// kernel: decoder_forward.6
= control target key start
LH: loop header
LB: loop body
LE: loop exit
PB: predicated region body
PF: predicated region fallthrough
CT: control target
= control target key end

     0   :  { %11 = vsyncpa [#allocation3], 0  ;;  %s1043_s21 = smov [#allocation2]   ;;  %s1465_s0 = inlined_call_operand.vmem [shape: bf16[128,288], index: 0, kind: input, shape index: {}]   ;;  %s1466_s1 = inlined_call_operand.vmem [shape: bf16[288,32], index: 1, kind: input, shape index: {}]   ;;  %s1467_s2 = inlined_call_operand.vmem [shape: f32[1,32], index: 2, kind: input, shape index: {}]   ;;  %s1468_s3 = inlined_call_operand.vmem [shape: bf16[32,32], index: 3, kind: input, shape index: {}]   ;;  %s1469_s4 = inlined_call_operand.hbm [shape: f32[1,32], index: 4, kind: input, shape index: {}]   ;;  %s1470_s5 = inlined_call_operand.vmem [shape: f32[128,32], index: 5, kind: input, shape index: {}, may-alias: {5,6}]   ;;  %s1471_s6 = inlined_call_operand.vmem [shape: f32[128,32], index: 6, kind: output, shape index: {}, may-alias: {5,6}]  }
   0x1   :  { %s26_s22 = sshll.u32 %s1043_s21, 4  ;;  %s1019_s25 = scalar_lea.hbm %s1469_s4, 16  ;;  %s27_s22 = int_to_ptr.vmem [resolvable:$true] %s26_s22 }
   0x2   :  { %p1020_p0 = scmp.ne.s32.totalorder %s1469_s4, %s1019_s25  ;;  %p1023_p1 = scmp.lt.u32.totalorder %s1019_s25, %s1469_s4 }
   0x4   :  { %p1025_p2 = pnand %p1023_p1, %p1020_p0 }
   0x6   :  { %1028 = shalt.err (!%p1025_p2)
}
   0x7   :  { %s1029_s30 = scalar_lea.vmem %s27_s22, 16  ;;  %s1033_s7 = scalar_lea.vmem %s27_s22, 32 }
   0x8   :  { %p1030_p3 = scmp.ne.s32.totalorder %s27_s22, %s1029_s30  ;;  %p1034_p4 = scmp.lt.s32.totalorder %s27_s22, %s27_s22 }
   0x9   :  { %p1035_p5 = scmp.lt.s32.totalorder %s1033_s7, %s1029_s30 }
   0xb   :  { %p1036_p6 = por %p1035_p5, %p1034_p4 }
   0xd   :  { %p1037_p7 = pnand %p1036_p6, %p1030_p3 }
   0xf   :  { %1040 = shalt.err (!%p1037_p7)
}
  0x10   :  { %29 = dma.hbm_to_vmem [thread:$0]  %s1469_s4, 16, %s27_s22, [#allocation3]  }
  0x11   :  { %1041 = dma.done.wait [#allocation3], 16  }
  0x12   :  { %1042 = vsyncadd [#allocation3], 4294967280  ;;  %v999_v0 = vld [vmem:[%s1466_s1 + $0x40] sm:$0xff]   ;;  %v1001_v2 = vld [vmem:[%s1466_s1 + $0x48] sm:$0xff]   ;;  %v1044_v15 = vmov 0   ;;  %vm371_vm0 = vcmask 261120  }
  0x13   :  { %v1000_v1 = vld [vmem:[%s1466_s1] sm:$0xff]   ;;  %873 = vmatprep.subr.bf16.mxu0 %v999_v0  ;;  %v1002_v3 = vld [vmem:[%s1466_s1 + $0x8] sm:$0xff]   ;;  %v1003_v4 = vld [vmem:[%s1466_s1 + $0x50] sm:$0xff]  }
  0x14   :  { %874 = vmatpush3.bf16.msra.mxu0 %v1000_v1  ;;  %v1004_v5 = vld [vmem:[%s1466_s1 + $0x10] sm:$0xff]   ;;  %v1005_v6 = vld [vmem:[%s1466_s1 + $0x58] sm:$0xff]   ;;  %v1007_v8 = vld [vmem:[%s1466_s1 + $0x60] sm:$0xff]  }
  0x15   :  { %875 = vmatprep.subr.bf16.mxu0 %v1001_v2  ;;  %v1006_v7 = vld [vmem:[%s1466_s1 + $0x18] sm:$0xff]   ;;  %v1008_v9 = vld [vmem:[%s1466_s1 + $0x20] sm:$0xff]   ;;  %v1009_v11 = vld [vmem:[%s1466_s1 + $0x68] sm:$0xff]  }
  0x16   :  { %v1014_v10 = vld [vmem:[%s1466_s1 + $0x80] sm:$0xff]   ;;  %v1010_v12 = vld [vmem:[%s1466_s1 + $0x28] sm:$0xff]   ;;  %v39_v20 = vld [vmem:[%s1465_s0 + $0x14] sm:$0xf] }
  0x17   :  { %957 = vmatprep.subr.bf16.mxu1 %v1014_v10  ;;  %v36_v13 = vld [vmem:[%s1465_s0] sm:$0xff]  ;;  %v38_v14 = vld [vmem:[%s1465_s0 + $0xc] sm:$0xff]  ;;  %v37_v19 = vld [vmem:[%s1465_s0 + $0x8] sm:$0xf]  ;;  %v71_v26 = vmax.bf16 %v1044_v15, %v39_v20 }
  0x18   :  { %876 = vmatpush3.bf16.msra.mxu0 %v1002_v3  ;;  %958 = vmatpush3.bf16.msra.mxu1 %v1014_v10  ;;  %v68_v16 = vmax.bf16 %v1044_v15, %v36_v13  ;;  %v70_v17 = vmax.bf16 %v1044_v15, %v38_v14  ;;  %v1016_v18 = vld [vmem:[%s1466_s1 + $0x88] sm:$0xff]   ;;  %v69_v21 = vmax.bf16 %v1044_v15, %v37_v19  ;;  %v41_v22 = vld [vmem:[%s1465_s0 + $0x20] sm:$0xf]  ;;  %v1011_v24 = vld [vmem:[%s1466_s1 + $0x70] sm:$0xff]  }
  0x19   :  { %877 = vmatprep.subr.bf16.mxu0 %v1003_v4  ;;  %v43_v23 = vld [vmem:[%s1465_s0 + $0x2c] sm:$0xf]  ;;  %959 = vmatprep.subr.bf16.mxu1 %v1016_v18  ;;  %v73_v27 = vmax.bf16 %v1044_v15, %v41_v22  ;;  %v45_v29 = vld [vmem:[%s1465_s0 + $0x38] sm:$0xf]  ;;  %v47_v30 = vld [vmem:[%s1465_s0 + $0x44] sm:$0xf] }
  0x1a   :  { %v813_v25 = vcombine.high %v68_v16, %v70_v17  ;;  %v75_v28 = vmax.bf16 %v1044_v15, %v43_v23  ;;  %v814_v31 = vcombine.low %v69_v21, %v71_v26  ;;  %v49_v32 = vld [vmem:[%s1465_s0 + $0x50] sm:$0xf]  ;;  %v51_v33 = vld [vmem:[%s1465_s0 + $0x5c] sm:$0xf]  ;;  %v77_v38 = vmax.bf16 %v1044_v15, %v45_v29  ;;  %v42_v39 = vld [vmem:[%s1465_s0 + $0x24] sm:$0xff] }
  0x1b   :  { %v1012_v34 = vld [vmem:[%s1466_s1 + $0x30] sm:$0xff]   ;;  %v1013_v35 = vld [vmem:[%s1466_s1 + $0x78] sm:$0xff]   ;;  %v79_v40 = vmax.bf16 %v1044_v15, %v47_v30  ;;  %v53_v41 = vld [vmem:[%s1465_s0 + $0x68] sm:$0xf]  ;;  %v81_v43 = vmax.bf16 %v1044_v15, %v49_v32  ;;  %v83_v44 = vmax.bf16 %v1044_v15, %v51_v33  ;;  %v74_v49 = vmax.bf16 %v1044_v15, %v42_v39 }
  0x1c   :  { %878 = vmatpush3.bf16.msra.mxu0 %v1004_v5  ;;  %428 = vmatprep.mubr.bf16.mxu0 %v813_v25  ;;  %v817_v36 = vcombine.low %v73_v27, %v75_v28  ;;  %v40_v37 = vld [vmem:[%s1465_s0 + $0x18] sm:$0xff]  ;;  %v55_v42 = vld [vmem:[%s1465_s0 + $0x74] sm:$0xf]  ;;  %v85_v46 = vmax.bf16 %v1044_v15, %v53_v41  ;;  %v812_v52 = vcombine.low %v68_v16, %v70_v17  ;;  %v57_v54 = vld [vmem:[%s1465_s0 + $0x80] sm:$0xf] }
  0x1d   :  { %879 = vmatprep.subr.bf16.mxu0 %v1005_v6  ;;  %960 = vmatpush3.bf16.msra.mxu1 %v1016_v18  ;;  %v820_v45 = vcombine.low %v77_v38, %v79_v40  ;;  %v1015_v47 = vld [vmem:[%s1466_s1 + $0x38] sm:$0xff]   ;;  %v72_v48 = vmax.bf16 %v1044_v15, %v40_v37  ;;  %v87_v50 = vmax.bf16 %v1044_v15, %v55_v42  ;;  %v59_v55 = vld [vmem:[%s1465_s0 + $0x8c] sm:$0xf]  ;;  %v63_v58 = vld [vmem:[%s1465_s0 + $0xa4] sm:$0xf] }
  0x1e   :  { %961 = vmatprep.mubr.msk.bf16.mxu1 %vm371_vm0, %v814_v31  ;;  %v823_v51 = vcombine.low %v81_v43, %v83_v44  ;;  %v61_v57 = vld [vmem:[%s1465_s0 + $0x98] sm:$0xf]  ;;  %v44_v59 = vld [vmem:[%s1465_s0 + $0x30] sm:$0xff]  ;;  %v46_v60 = vld [vmem:[%s1465_s0 + $0x3c] sm:$0xff]  ;;  %v89_v61 = vmax.bf16 %v1044_v15, %v57_v54  ;;  %v91_v62 = vmax.bf16 %v1044_v15, %v59_v55  ;;  %v95_v0 = vmax.bf16 %v1044_v15, %v63_v58 }
  0x1f   :  { %v826_v53 = vcombine.low %v85_v46, %v87_v50  ;;  %v816_v56 = vcombine.high %v72_v48, %v74_v49  ;;  %v93_v63 = vmax.bf16 %v1044_v15, %v61_v57  ;;  %v76_v1 = vmax.bf16 %v1044_v15, %v44_v59  ;;  %v65_v6 = vld [vmem:[%s1465_s0 + $0xb0] sm:$0xf]  ;;  %v50_v10 = vld [vmem:[%s1465_s0 + $0x54] sm:$0xff]  ;;  %v52_v19 = vld [vmem:[%s1465_s0 + $0x60] sm:$0xff] }
  0x20   :  { %880 = vmatpush3.bf16.msra.mxu0 %v1006_v7  ;;  %962 = vmatmul.mubr.msk.bf16.vlgmr.msra.gmra.mrb[0].mxu1 %vm371_vm0, %v817_v36  ;;  %v78_v2 = vmax.bf16 %v1044_v15, %v46_v60  ;;  %v829_v3 = vcombine.low %v89_v61, %v91_v62  ;;  %v815_v4 = vcombine.low %v72_v48, %v74_v49  ;;  %v67_v7 = vld [vmem:[%s1465_s0 + $0xbc] sm:$0xf]  ;;  %v54_v20 = vld [vmem:[%s1465_s0 + $0x6c] sm:$0xff]  ;;  %v58_v26 = vld [vmem:[%s1465_s0 + $0x84] sm:$0xff] }
  0x21   :  { %881 = vmatprep.subr.bf16.mxu0 %v1007_v8  ;;  %965 = vmatprep.mubr.msk.bf16.mxu1 %vm371_vm0, %v820_v45  ;;  %v832_v5 = vcombine.low %v93_v63, %v95_v0  ;;  %v82_v14 = vmax.bf16 %v1044_v15, %v50_v10  ;;  %v84_v21 = vmax.bf16 %v1044_v15, %v52_v19  ;;  %v56_v25 = vld [vmem:[%s1465_s0 + $0x78] sm:$0xff]  ;;  %v60_v31 = vld [vmem:[%s1465_s0 + $0x90] sm:$0xff]  ;;  %v64_v37 = vld [vmem:[%s1465_s0 + $0xa8] sm:$0xff] }
  0x22   :  { %v819_v8 = vcombine.high %v76_v1, %v78_v2  ;;  %v818_v17 = vcombine.low %v76_v1, %v78_v2  ;;  %v86_v22 = vmax.bf16 %v1044_v15, %v54_v20  ;;  %v88_v27 = vmax.bf16 %v1044_v15, %v56_v25  ;;  %v62_v32 = vld [vmem:[%s1465_s0 + $0x9c] sm:$0xff]  ;;  %v66_v38 = vld [vmem:[%s1465_s0 + $0xb4] sm:$0xff]  ;;  %v1018_v45 = vld [vmem:[%s1468_s3 + $0x8] sm:$0xff]  }
  0x23   :  { %v90_v28 = vmax.bf16 %v1044_v15, %v58_v26  ;;  %v92_v33 = vmax.bf16 %v1044_v15, %v60_v31  ;;  %v96_v39 = vmax.bf16 %v1044_v15, %v64_v37  ;;  %v98_v40 = vmax.bf16 %v1044_v15, %v66_v38  ;;  %v1017_v44 = vld [vmem:[%s1468_s3] sm:$0xff]  }
  0x24   :  { %882 = vmatpush3.bf16.msra.mxu0 %v1008_v9  ;;  %v48_v9 = vld [vmem:[%s1465_s0 + $0x48] sm:$0xff]  ;;  %v824_v29 = vcombine.low %v84_v21, %v86_v22  ;;  %977 = vmatprep.subr.bf16.mxu1 %v1017_v44 }
  0x25   :  { %883 = vmatprep.subr.bf16.mxu0 %v1009_v11  ;;  %v97_v11 = vmax.bf16 %v1044_v15, %v65_v6  ;;  %v80_v13 = vmax.bf16 %v1044_v15, %v48_v9  ;;  %v828_v30 = vcombine.high %v88_v27, %v90_v28  ;;  %v834_v42 = vcombine.high %v96_v39, %v98_v40 }
  0x26   :  { %v833_v43 = vcombine.low %v96_v39, %v98_v40  ;;  %978 = vmatpush3.bf16.msra.mxu1 %v1017_v44 }
  0x27   :  { %v822_v18 = vcombine.high %v80_v13, %v82_v14  ;;  %v821_v23 = vcombine.low %v80_v13, %v82_v14  ;;  %979 = vmatprep.subr.bf16.mxu1 %v1018_v45 }
  0x28   :  { %884 = vmatpush3.bf16.msra.mxu0 %v1010_v12  ;;  %966 = vmatmul.mubr.msk.bf16.gmra.mrb[4].mxu1 %vm371_vm0, %v823_v51  ;;  %v99_v12 = vmax.bf16 %v1044_v15, %v67_v7 }
  0x29   :  { %885 = vmatprep.subr.bf16.mxu0 %v1011_v24  ;;  %969 = vmatprep.mubr.msk.bf16.mxu1 %vm371_vm0, %v826_v53  ;;  %v825_v24 = vcombine.high %v84_v21, %v86_v22  ;;  %v1291_v53 = vld [vmem:[%s1467_s2] ss:$0 sm:$0xff] }
  0x2a   :  { %v835_v16 = vcombine.low %v97_v11, %v99_v12  ;;  %980 = vmatpush3.bf16.msra.mxu1 %v1018_v45 }
  0x2c   :  { %886 = vmatpush3.bf16.msra.mxu0 %v1012_v34  ;;  %v94_v34 = vmax.bf16 %v1044_v15, %v62_v32 }
  0x2d   :  { %887 = vmatprep.subr.bf16.mxu0 %v1013_v35  ;;  %v827_v35 = vcombine.low %v88_v27, %v90_v28 }
  0x2e   :  { %v831_v36 = vcombine.high %v92_v33, %v94_v34  ;;  %v830_v41 = vcombine.low %v92_v33, %v94_v34 }
  0x30   :  { %888 = vmatpush3.bf16.msra.mxu0 %v1015_v47  ;;  %970 = vmatmul.mubr.msk.bf16.gmra.mrb[8].mxu1 %vm371_vm0, %v829_v3 }
  0x31   :  { %973 = vmatprep.mubr.msk.bf16.mxu1 %vm371_vm0, %v832_v5 }
  0x33   :  { %429 = vmatmul.mubr.bf16.vlgmr.msra.gmra.mrb[0].mxu0 %v812_v52 }
  0x34   :  { %436 = vmatprep.mubr.bf16.mxu0 %v816_v56 }
  0x38   :  { %974 = vmatmul.mubr.msk.bf16.gmra.mrb[12].mxu1 %vm371_vm0, %v835_v16 }
  0x3b   :  { %437 = vmatmul.mubr.bf16.gmra.mrb[4].mxu0 %v815_v4 }
  0x3c   :  { %444 = vmatprep.mubr.bf16.mxu0 %v819_v8 }
  0x43   :  { %445 = vmatmul.mubr.bf16.gmra.mrb[8].mxu0 %v818_v17 }
  0x44   :  { %452 = vmatprep.mubr.bf16.mxu0 %v822_v18 }
  0x4b   :  { %453 = vmatmul.mubr.bf16.gmra.mrb[12].mxu0 %v821_v23 }
  0x4c   :  { %460 = vmatprep.mubr.bf16.mxu0 %v825_v24 }
  0x53   :  { %461 = vmatmul.mubr.bf16.gmra.mrb[16].mxu0 %v824_v29 }
  0x54   :  { %468 = vmatprep.mubr.bf16.mxu0 %v828_v30 }
  0x5b   :  { %469 = vmatmul.mubr.bf16.gmra.mrb[20].mxu0 %v827_v35 }
  0x5c   :  { %476 = vmatprep.mubr.bf16.mxu0 %v831_v36 }
  0x63   :  { %477 = vmatmul.mubr.bf16.gmra.mrb[24].mxu0 %v830_v41 }
  0x64   :  { %484 = vmatprep.mubr.bf16.mxu0 %v834_v42 }
  0x6b   :  { %485 = vmatmul.mubr.bf16.gmra.mrb[28].mxu0 %v833_v43 }
  0xf3   :  { %v963_v46 = vpop.f32.mrb[0].mxu1 }
  0xf4   :  { %v527_v15 = vpop.f32.mrb[1].mxu1 }
  0xf5   :  { %v964_v47 = vpop.f32.mrb[2].mxu1 }
  0xf6   :  { %v530_v48 = vpop.f32.mrb[3].mxu1 }
  0xfb   :  { %v967_v49 = vpop.f32.mrb[4].mxu1 }
  0xfc   :  { %v543_v51 = vpop.f32.mrb[5].mxu1 }
  0xfd   :  { %v968_v54 = vpop.f32.mrb[6].mxu1 }
  0xfe   :  { %v546_v57 = vpop.f32.mrb[7].mxu1 }
 0x103   :  { %v1295_v63 = vpop.f32.mrb[8].mxu1 }
 0x104   :  { %v559_v2 = vpop.f32.mrb[9].mxu1 }
 0x105   :  { %v1297_v4 = vpop.f32.mrb[10].mxu1 }
 0x106   :  { %v889_v50 = vpop.f32.mrb[0].mxu0  ;;  %v562_v9 = vpop.f32.mrb[11].mxu1 }
 0x107   :  { %v890_v52 = vpop.f32.mrb[1].mxu0 }
 0x108   :  { %v891_v55 = vadd.f32 %v890_v52, %v889_v50  ;;  %v892_v56 = vpop.f32.mrb[2].mxu0 }
 0x109   :  { %v893_v58 = vpop.f32.mrb[3].mxu0 }
 0x10a   :  { %v894_v59 = vadd.f32 %v893_v58, %v892_v56  ;;  %v431_v60 = vadd.f32 %v891_v55, %v1291_v53 }
 0x10b   :  { %v1302_v17 = vpop.f32.mrb[12].mxu1 }
 0x10c   :  { %v528_v61 = vadd.f32 %v527_v15, %v431_v60  ;;  %v434_v62 = vadd.f32 %v894_v59, %v1291_v53  ;;  %v1304_v20 = vpop.f32.mrb[13].mxu1 }
 0x10d   :  { %v1306_v22 = vpop.f32.mrb[14].mxu1 }
 0x10e   :  { %v531_v0 = vadd.f32 %v530_v48, %v434_v62  ;;  %v895_v1 = vpop.f32.mrb[4].mxu0  ;;  %v590_v5 = vmax.f32 %v528_v61, 0.0  ;;  %v1308_v27 = vpop.f32.mrb[15].mxu1 }
 0x10f   :  { %v896_v3 = vpop.f32.mrb[5].mxu0 }
 0x110   :  { %v591_v6 = vmax.f32 %v531_v0, 0.0  ;;  %v897_v7 = vadd.f32 %v896_v3, %v895_v1  ;;  %v898_v8 = vpop.f32.mrb[6].mxu0 }
 0x111   :  { %v899_v10 = vpop.f32.mrb[7].mxu0 }
 0x112   :  { %v606_v11 = vpack.c.bf16 %v591_v6, %v590_v5  ;;  %v439_v12 = vadd.f32 %v897_v7, %v1291_v53  ;;  %v900_v13 = vadd.f32 %v899_v10, %v898_v8 }
 0x114   :  { %v536_v14 = vadd.f32 %v963_v46, %v439_v12  ;;  %v442_v16 = vadd.f32 %v900_v13, %v1291_v53  ;;  %981 = vmatprep.mubr.msk.bf16.mxu1 %vm371_vm0, %v606_v11 }
 0x116   :  { %v539_v18 = vadd.f32 %v964_v47, %v442_v16  ;;  %v901_v19 = vpop.f32.mrb[8].mxu0  ;;  %v592_v23 = vmax.f32 %v536_v14, 0.0 }
 0x117   :  { %v902_v21 = vpop.f32.mrb[9].mxu0 }
 0x118   :  { %v593_v24 = vmax.f32 %v539_v18, 0.0  ;;  %v903_v25 = vadd.f32 %v902_v21, %v901_v19  ;;  %v904_v26 = vpop.f32.mrb[10].mxu0 }
 0x119   :  { %v905_v28 = vpop.f32.mrb[11].mxu0 }
 0x11a   :  { %v607_v29 = vpack.c.bf16 %v593_v24, %v592_v23  ;;  %v906_v30 = vadd.f32 %v905_v28, %v904_v26  ;;  %v447_v31 = vadd.f32 %v903_v25, %v1291_v53 }
 0x11c   :  { %v544_v32 = vadd.f32 %v543_v51, %v447_v31  ;;  %982 = vmatmul.mubr.msk.bf16.vlgmr.msra.gmra.mrb[16].mxu1 %vm371_vm0, %v607_v29  ;;  %v450_v33 = vadd.f32 %v906_v30, %v1291_v53 }
 0x11e   :  { %v547_v34 = vadd.f32 %v546_v57, %v450_v33  ;;  %v907_v35 = vpop.f32.mrb[12].mxu0  ;;  %v594_v37 = vmax.f32 %v544_v32, 0.0 }
 0x11f   :  { %v908_v36 = vpop.f32.mrb[13].mxu0 }
 0x120   :  { %v595_v38 = vmax.f32 %v547_v34, 0.0  ;;  %v909_v39 = vadd.f32 %v908_v36, %v907_v35  ;;  %v910_v40 = vpop.f32.mrb[14].mxu0 }
 0x121   :  { %v911_v41 = vpop.f32.mrb[15].mxu0 }
 0x122   :  { %v608_v42 = vpack.c.bf16 %v595_v38, %v594_v37  ;;  %v455_v43 = vadd.f32 %v909_v39, %v1291_v53  ;;  %v912_v44 = vadd.f32 %v911_v41, %v910_v40 }
 0x124   :  { %v552_v45 = vadd.f32 %v967_v49, %v455_v43  ;;  %v458_v46 = vadd.f32 %v912_v44, %v1291_v53  ;;  %985 = vmatprep.mubr.msk.bf16.mxu1 %vm371_vm0, %v608_v42  ;;  %v1335_v42 = vld [vmem:[#allocation2] ss:$0 sm:$0xff]  ;;  %v760_v44 = vld [vmem:[%s1470_s5 + $0x10] sm:$0xff] }
 0x126   :  { %v555_v15 = vadd.f32 %v968_v54, %v458_v46  ;;  %v913_v47 = vpop.f32.mrb[16].mxu0  ;;  %v596_v50 = vmax.f32 %v552_v45, 0.0 }
 0x127   :  { %v914_v48 = vpop.f32.mrb[17].mxu0 }
 0x128   :  { %v597_v51 = vmax.f32 %v555_v15, 0.0  ;;  %v915_v52 = vadd.f32 %v914_v48, %v913_v47  ;;  %v916_v55 = vpop.f32.mrb[18].mxu0  ;;  %v761_v15 = vld [vmem:[%s1470_s5 + $0x18] sm:$0xff] }
 0x129   :  { %v917_v56 = vpop.f32.mrb[19].mxu0 }
 0x12a   :  { %v609_v57 = vpack.c.bf16 %v597_v51, %v596_v50  ;;  %v918_v58 = vadd.f32 %v917_v56, %v916_v55  ;;  %v463_v59 = vadd.f32 %v915_v52, %v1291_v53  ;;  %v759_v51 = vld [vmem:[%s1470_s5 + $0x8] sm:$0xff] }
 0x12c   :  { %v560_v60 = vadd.f32 %v559_v2, %v463_v59  ;;  %986 = vmatmul.mubr.msk.bf16.gmra.mrb[20].mxu1 %vm371_vm0, %v609_v57  ;;  %v466_v49 = vadd.f32 %v918_v58, %v1291_v53 }
 0x12e   :  { %v563_v61 = vadd.f32 %v562_v9, %v466_v49  ;;  %v919_v62 = vpop.f32.mrb[20].mxu0  ;;  %v598_v54 = vmax.f32 %v560_v60, 0.0 }
 0x12f   :  { %v920_v0 = vpop.f32.mrb[21].mxu0 }
 0x130   :  { %v599_v1 = vmax.f32 %v563_v61, 0.0  ;;  %v921_v3 = vadd.f32 %v920_v0, %v919_v62  ;;  %v922_v5 = vpop.f32.mrb[22].mxu0 }
 0x131   :  { %v923_v6 = vpop.f32.mrb[23].mxu0 }
 0x132   :  { %v610_v7 = vpack.c.bf16 %v599_v1, %v598_v54  ;;  %v471_v8 = vadd.f32 %v921_v3, %v1291_v53  ;;  %v924_v10 = vadd.f32 %v923_v6, %v922_v5 }
 0x134   :  { %v568_v11 = vadd.f32 %v1295_v63, %v471_v8  ;;  %v474_v2 = vadd.f32 %v924_v10, %v1291_v53  ;;  %989 = vmatprep.mubr.msk.bf16.mxu1 %vm371_vm0, %v610_v7 }
 0x136   :  { %v571_v12 = vadd.f32 %v1297_v4, %v474_v2  ;;  %v925_v9 = vpop.f32.mrb[24].mxu0  ;;  %v600_v14 = vmax.f32 %v568_v11, 0.0 }
 0x137   :  { %v926_v13 = vpop.f32.mrb[25].mxu0 }
 0x138   :  { %v601_v16 = vmax.f32 %v571_v12, 0.0  ;;  %v927_v18 = vadd.f32 %v926_v13, %v925_v9  ;;  %v928_v19 = vpop.f32.mrb[26].mxu0 }
 0x139   :  { %v929_v21 = vpop.f32.mrb[27].mxu0 }
 0x13a   :  { %v611_v23 = vpack.c.bf16 %v601_v16, %v600_v14  ;;  %v930_v24 = vadd.f32 %v929_v21, %v928_v19  ;;  %v479_v25 = vadd.f32 %v927_v18, %v1291_v53 }
 0x13c   :  { %v576_v26 = vadd.f32 %v1304_v20, %v479_v25  ;;  %990 = vmatmul.mubr.msk.bf16.gmra.mrb[24].mxu1 %vm371_vm0, %v611_v23  ;;  %v482_v63 = vadd.f32 %v930_v24, %v1291_v53 }
 0x13e   :  { %v579_v28 = vadd.f32 %v1308_v27, %v482_v63  ;;  %v931_v4 = vpop.f32.mrb[28].mxu0  ;;  %v602_v30 = vmax.f32 %v576_v26, 0.0 }
 0x13f   :  { %v932_v29 = vpop.f32.mrb[29].mxu0 }
 0x140   :  { %v603_v31 = vmax.f32 %v579_v28, 0.0  ;;  %v933_v32 = vadd.f32 %v932_v29, %v931_v4  ;;  %v934_v33 = vpop.f32.mrb[30].mxu0 }
 0x141   :  { %v935_v34 = vpop.f32.mrb[31].mxu0 }
 0x142   :  { %v612_v35 = vpack.c.bf16 %v603_v31, %v602_v30  ;;  %v487_v36 = vadd.f32 %v933_v32, %v1291_v53  ;;  %v936_v37 = vadd.f32 %v935_v34, %v934_v33 }
 0x144   :  { %v584_v38 = vadd.f32 %v1302_v17, %v487_v36  ;;  %v490_v20 = vadd.f32 %v936_v37, %v1291_v53  ;;  %993 = vmatprep.mubr.msk.bf16.mxu1 %vm371_vm0, %v612_v35  ;;  %v758_v53 = vld [vmem:[%s1470_s5] sm:$0xff] }
 0x146   :  { %v587_v39 = vadd.f32 %v1306_v22, %v490_v20  ;;  %v604_v27 = vmax.f32 %v584_v38, 0.0 }
 0x148   :  { %v605_v40 = vmax.f32 %v587_v39, 0.0 }
 0x14a   :  { %v613_v41 = vpack.c.bf16 %v605_v40, %v604_v27 }
 0x14c   :  { %994 = vmatmul.mubr.msk.bf16.gmra.mrb[28].mxu1 %vm371_vm0, %v613_v41 }
 0x1ef   :  { %v983_v43 = vpop.f32.mrb[16].mxu1 }
 0x1f0   :  { %v704_v17 = vadd.f32 %v983_v43, %v1335_v42  ;;  %v695_v45 = vpop.f32.mrb[17].mxu1 }
 0x1f1   :  { %v696_v22 = vadd.f32 %v1335_v42, %v695_v45  ;;  %v984_v46 = vpop.f32.mrb[18].mxu1 }
 0x1f2   :  { %v776_v47 = vadd.f32 %v760_v44, %v704_v17  ;;  %v707_v48 = vadd.f32 %v984_v46, %v1335_v42  ;;  %v698_v50 = vpop.f32.mrb[19].mxu1 }
 0x1f3   :  { %v774_v52 = vadd.f32 %v758_v53, %v696_v22  ;;  %v699_v55 = vadd.f32 %v1335_v42, %v698_v50 }
 0x1f4   :  { %792 = vst.msk [vmem:[%s1471_s6 + $0x10] sm:$0xff] %vm371_vm0, %v776_v47  ;;  %v777_v56 = vadd.f32 %v761_v15, %v707_v48 }
 0x1f5   :  { %790 = vst.msk [vmem:[%s1471_s6] sm:$0xff] %vm371_vm0, %v774_v52  ;;  %v775_v57 = vadd.f32 %v759_v51, %v699_v55 }
 0x1f6   :  { %793 = vst.msk [vmem:[%s1471_s6 + $0x18] sm:$0xff] %vm371_vm0, %v777_v56 }
 0x1f7   :  { %791 = vst.msk [vmem:[%s1471_s6 + $0x8] sm:$0xff] %vm371_vm0, %v775_v57 }
 0x1fe   :  { %v764_v59 = vld [vmem:[%s1470_s5 + $0x30] sm:$0xff]  ;;  %v762_v61 = vld [vmem:[%s1470_s5 + $0x20] sm:$0xff]  ;;  %v765_v54 = vld [vmem:[%s1470_s5 + $0x38] sm:$0xff] }
 0x1ff   :  { %v987_v58 = vpop.f32.mrb[20].mxu1  ;;  %v763_v6 = vld [vmem:[%s1470_s5 + $0x28] sm:$0xff] }
 0x200   :  { %v720_v60 = vadd.f32 %v987_v58, %v1335_v42  ;;  %v711_v49 = vpop.f32.mrb[21].mxu1 }
 0x201   :  { %v712_v62 = vadd.f32 %v1335_v42, %v711_v49  ;;  %v988_v0 = vpop.f32.mrb[22].mxu1 }
 0x202   :  { %v780_v1 = vadd.f32 %v764_v59, %v720_v60  ;;  %v723_v3 = vadd.f32 %v988_v0, %v1335_v42  ;;  %v714_v5 = vpop.f32.mrb[23].mxu1 }
 0x203   :  { %v778_v7 = vadd.f32 %v762_v61, %v712_v62  ;;  %v715_v8 = vadd.f32 %v1335_v42, %v714_v5 }
 0x204   :  { %796 = vst.msk [vmem:[%s1471_s6 + $0x30] sm:$0xff] %vm371_vm0, %v780_v1  ;;  %v781_v10 = vadd.f32 %v765_v54, %v723_v3 }
 0x205   :  { %794 = vst.msk [vmem:[%s1471_s6 + $0x20] sm:$0xff] %vm371_vm0, %v778_v7  ;;  %v779_v11 = vadd.f32 %v763_v6, %v715_v8 }
 0x206   :  { %797 = vst.msk [vmem:[%s1471_s6 + $0x38] sm:$0xff] %vm371_vm0, %v781_v10 }
 0x207   :  { %795 = vst.msk [vmem:[%s1471_s6 + $0x28] sm:$0xff] %vm371_vm0, %v779_v11 }
 0x20e   :  { %v768_v12 = vld [vmem:[%s1470_s5 + $0x50] sm:$0xff]  ;;  %v766_v14 = vld [vmem:[%s1470_s5 + $0x40] sm:$0xff]  ;;  %v769_v19 = vld [vmem:[%s1470_s5 + $0x58] sm:$0xff] }
 0x20f   :  { %v991_v2 = vpop.f32.mrb[24].mxu1  ;;  %v767_v25 = vld [vmem:[%s1470_s5 + $0x48] sm:$0xff] }
 0x210   :  { %v736_v9 = vadd.f32 %v991_v2, %v1335_v42  ;;  %v727_v13 = vpop.f32.mrb[25].mxu1 }
 0x211   :  { %v728_v16 = vadd.f32 %v1335_v42, %v727_v13  ;;  %v992_v18 = vpop.f32.mrb[26].mxu1 }
 0x212   :  { %v784_v21 = vadd.f32 %v768_v12, %v736_v9  ;;  %v739_v23 = vadd.f32 %v992_v18, %v1335_v42  ;;  %v730_v24 = vpop.f32.mrb[27].mxu1 }
 0x213   :  { %v782_v26 = vadd.f32 %v766_v14, %v728_v16  ;;  %v731_v63 = vadd.f32 %v1335_v42, %v730_v24 }
 0x214   :  { %800 = vst.msk [vmem:[%s1471_s6 + $0x50] sm:$0xff] %vm371_vm0, %v784_v21  ;;  %v785_v28 = vadd.f32 %v769_v19, %v739_v23 }
 0x215   :  { %798 = vst.msk [vmem:[%s1471_s6 + $0x40] sm:$0xff] %vm371_vm0, %v782_v26  ;;  %v783_v4 = vadd.f32 %v767_v25, %v731_v63 }
 0x216   :  { %801 = vst.msk [vmem:[%s1471_s6 + $0x58] sm:$0xff] %vm371_vm0, %v785_v28 }
 0x217   :  { %799 = vst.msk [vmem:[%s1471_s6 + $0x48] sm:$0xff] %vm371_vm0, %v783_v4 }
 0x21e   :  { %v772_v30 = vld [vmem:[%s1470_s5 + $0x70] sm:$0xff]  ;;  %v770_v33 = vld [vmem:[%s1470_s5 + $0x60] sm:$0xff]  ;;  %v773_v36 = vld [vmem:[%s1470_s5 + $0x78] sm:$0xff] }
 0x21f   :  { %v995_v29 = vpop.f32.mrb[28].mxu1  ;;  %v771_v39 = vld [vmem:[%s1470_s5 + $0x68] sm:$0xff] }
 0x220   :  { %v752_v31 = vadd.f32 %v995_v29, %v1335_v42  ;;  %v743_v32 = vpop.f32.mrb[29].mxu1 }
 0x221   :  { %v744_v34 = vadd.f32 %v1335_v42, %v743_v32  ;;  %v996_v35 = vpop.f32.mrb[30].mxu1 }
 0x222   :  { %v788_v37 = vadd.f32 %v772_v30, %v752_v31  ;;  %v755_v38 = vadd.f32 %v996_v35, %v1335_v42  ;;  %v746_v20 = vpop.f32.mrb[31].mxu1 }
 0x223   :  { %v786_v27 = vadd.f32 %v770_v33, %v744_v34  ;;  %v747_v40 = vadd.f32 %v1335_v42, %v746_v20 }
 0x224   :  { %804 = vst.msk [vmem:[%s1471_s6 + $0x70] sm:$0xff] %vm371_vm0, %v788_v37  ;;  %v789_v41 = vadd.f32 %v773_v36, %v755_v38 }
 0x225   :  { %802 = vst.msk [vmem:[%s1471_s6 + $0x60] sm:$0xff] %vm371_vm0, %v786_v27  ;;  %v787_v43 = vadd.f32 %v771_v39, %v747_v40 }
 0x226   :  { %805 = vst.msk [vmem:[%s1471_s6 + $0x78] sm:$0xff] %vm371_vm0, %v789_v41 }
 0x227   :  { %803 = vst.msk [vmem:[%s1471_s6 + $0x68] sm:$0xff] %vm371_vm0, %v787_v43 }
 0x228   :  { %810 = vsyncpa [#allocation3], 1 }

// kernel: decoder_forward.7
= control target key start
LH: loop header
LB: loop body
LE: loop exit
PB: predicated region body
PF: predicated region fallthrough
CT: control target
= control target key end

     0   :  { %vm318_vm0 = vcmask 261120   ;;  %s1035_s1 = inlined_call_operand.vmem [shape: bf16[288,32], index: 1, kind: input, shape index: {}]   ;;  %s1036_s0 = inlined_call_operand.vmem [shape: bf16[128,288], index: 0, kind: input, shape index: {}]   ;;  %s1037_s2 = inlined_call_operand.vmem [shape: f32[1,32], index: 2, kind: input, shape index: {}]   ;;  %s1038_s3 = inlined_call_operand.vmem [shape: f32[128,32], index: 3, kind: output, shape index: {}]  }
   0x1   :  { %v734_v0 = vld [vmem:[%s1035_s1 + $0x40] sm:$0xff]   ;;  %v736_v2 = vld [vmem:[%s1035_s1 + $0x48] sm:$0xff]   ;;  %v738_v4 = vld [vmem:[%s1035_s1 + $0x50] sm:$0xff]  }
   0x2   :  { %v735_v1 = vld [vmem:[%s1035_s1] sm:$0xff]   ;;  %624 = vmatprep.subr.bf16.mxu0 %v734_v0  ;;  %718 = vmatprep.subr.bf16.mxu1 %v734_v0  ;;  %v737_v3 = vld [vmem:[%s1035_s1 + $0x8] sm:$0xff]   ;;  %v739_v5 = vld [vmem:[%s1035_s1 + $0x10] sm:$0xff]  }
   0x3   :  { %625 = vmatpush3.bf16.msra.mxu0 %v735_v1  ;;  %726 = vmatpush3.bf16.msra.mxu1 %v735_v1  ;;  %v740_v6 = vld [vmem:[%s1035_s1 + $0x58] sm:$0xff]   ;;  %v742_v8 = vld [vmem:[%s1035_s1 + $0x60] sm:$0xff]   ;;  %v744_v10 = vld [vmem:[%s1035_s1 + $0x68] sm:$0xff]  }
   0x4   :  { %626 = vmatprep.subr.bf16.mxu0 %v736_v2  ;;  %719 = vmatprep.subr.bf16.mxu1 %v736_v2  ;;  %v741_v7 = vld [vmem:[%s1035_s1 + $0x18] sm:$0xff]   ;;  %v743_v9 = vld [vmem:[%s1035_s1 + $0x20] sm:$0xff]   ;;  %v745_v13 = vld [vmem:[%s1035_s1 + $0x28] sm:$0xff]  }
   0x5   :  { %v752_v11 = vld [vmem:[%s1036_s0 + $0x4] ss:$12 sps:$4 sm:$0xff]   ;;  %v755_v12 = vld [vmem:[%s1036_s0 + $0x94] ss:$12 sps:$4 sm:$0xff]   ;;  %v748_v16 = vld [vmem:[%s1035_s1 + $0x78] sm:$0xff]  }
   0x6   :  { %v746_v14 = vld [vmem:[%s1035_s1 + $0x70] sm:$0xff]   ;;  %375 = vmatprep.mubr.bf16.mxu0 %v752_v11  ;;  %423 = vmatprep.mubr.bf16.mxu1 %v755_v12  ;;  %v749_v17 = vld [vmem:[%s1035_s1 + $0x38] sm:$0xff]   ;;  %v750_v18 = vld [vmem:[%s1036_s0] ss:$12 sps:$4 sm:$0xff]  }
   0x7   :  { %627 = vmatpush3.bf16.msra.mxu0 %v737_v3  ;;  %727 = vmatpush3.bf16.msra.mxu1 %v737_v3  ;;  %v747_v15 = vld [vmem:[%s1035_s1 + $0x30] sm:$0xff]   ;;  %v756_v19 = vld [vmem:[%s1035_s1 + $0x80] sm:$0xff]   ;;  %v757_v21 = vld [vmem:[%s1036_s0 + $0x1c] ss:$12 sps:$4 sm:$0xff]  }
   0x8   :  { %628 = vmatprep.subr.bf16.mxu0 %v738_v4  ;;  %720 = vmatprep.subr.bf16.mxu1 %v738_v4  ;;  %v753_v20 = vld [vmem:[%s1036_s0 + $0x90] ss:$12 sps:$4 sm:$0xff]   ;;  %v759_v22 = vld [vmem:[%s1036_s0 + $0xac] ss:$12 sps:$4 sm:$0xff]   ;;  %v762_v25 = vld [vmem:[%s1036_s0 + $0xa8] ss:$12 sps:$4 sm:$0xff]  }
   0x9   :  { %v763_v23 = vld [vmem:[%s1035_s1 + $0x88] sm:$0xff]   ;;  %v761_v24 = vld [vmem:[%s1036_s0 + $0x18] ss:$12 sps:$4 sm:$0xff]   ;;  %v764_v26 = vld [vmem:[%s1036_s0 + $0x34] ss:$12 sps:$4 sm:$0xff]  }
   0xa   :  { %v766_v27 = vld [vmem:[%s1036_s0 + $0x8] ss:$12 sps:$4 sm:$0xff]   ;;  %v767_v28 = vld [vmem:[%s1036_s0 + $0x30] ss:$12 sps:$4 sm:$0xff]   ;;  %v768_v29 = vld [vmem:[%s1036_s0 + $0x20] ss:$12 sps:$4 sm:$0xff]  }
   0xb   :  { %629 = vmatpush3.bf16.msra.mxu0 %v739_v5  ;;  %728 = vmatpush3.bf16.msra.mxu1 %v739_v5  ;;  %v769_v30 = vld [vmem:[%s1036_s0 + $0x4c] ss:$12 sps:$4 sm:$0xff]   ;;  %v772_v32 = vld [vmem:[%s1036_s0 + $0x48] ss:$12 sps:$4 sm:$0xff]   ;;  %v773_v33 = vld [vmem:[%s1036_s0 + $0x50] ss:$12 sps:$4 sm:$0xff]  }
   0xc   :  { %630 = vmatprep.subr.bf16.mxu0 %v740_v6  ;;  %721 = vmatprep.subr.bf16.mxu1 %v740_v6  ;;  %v771_v31 = vld [vmem:[%s1036_s0 + $0x38] ss:$12 sps:$4 sm:$0xff]   ;;  %v776_v35 = vld [vmem:[%s1036_s0 + $0x68] ss:$12 sps:$4 sm:$0xff]   ;;  %v777_v36 = vld [vmem:[%s1036_s0 + $0x60] ss:$12 sps:$4 sm:$0xff]  }
   0xd   :  { %v774_v34 = vld [vmem:[%s1036_s0 + $0x64] ss:$12 sps:$4 sm:$0xff]   ;;  %v778_v37 = vld [vmem:[%s1036_s0 + $0x80] ss:$12 sps:$4 sm:$0xff]   ;;  %v779_v38 = vld [vmem:[%s1036_s0 + $0x7c] ss:$12 sps:$4 sm:$0xff]  }
   0xe   :  { %v781_v39 = vld [vmem:[%s1036_s0 + $0x98] ss:$12 sps:$4 sm:$0xff]   ;;  %v783_v41 = vld [vmem:[%s1036_s0 + $0xb0] ss:$12 sps:$4 sm:$0xff]   ;;  %v949_v2 = vld [vmem:[%s1037_s2] ss:$0 sm:$0xff] }
   0xf   :  { %631 = vmatpush3.bf16.msra.mxu0 %v741_v7  ;;  %729 = vmatpush3.bf16.msra.mxu1 %v741_v7  ;;  %v782_v40 = vld [vmem:[%s1036_s0 + $0x78] ss:$12 sps:$4 sm:$0xff]  }
  0x10   :  { %632 = vmatprep.subr.bf16.mxu0 %v742_v8  ;;  %722 = vmatprep.subr.bf16.mxu1 %v742_v8 }
  0x13   :  { %633 = vmatpush3.bf16.msra.mxu0 %v743_v9  ;;  %730 = vmatpush3.bf16.msra.mxu1 %v743_v9 }
  0x14   :  { %634 = vmatprep.subr.bf16.mxu0 %v744_v10  ;;  %723 = vmatprep.subr.bf16.mxu1 %v744_v10 }
  0x17   :  { %635 = vmatpush3.bf16.msra.mxu0 %v745_v13  ;;  %731 = vmatpush3.bf16.msra.mxu1 %v745_v13 }
  0x18   :  { %636 = vmatprep.subr.bf16.mxu0 %v746_v14  ;;  %724 = vmatprep.subr.bf16.mxu1 %v746_v14 }
  0x1b   :  { %637 = vmatpush3.bf16.msra.mxu0 %v747_v15  ;;  %732 = vmatpush3.bf16.msra.mxu1 %v747_v15 }
  0x1c   :  { %638 = vmatprep.subr.bf16.mxu0 %v748_v16  ;;  %725 = vmatprep.subr.bf16.mxu1 %v748_v16 }
  0x1f   :  { %639 = vmatpush3.bf16.msra.mxu0 %v749_v17  ;;  %733 = vmatpush3.bf16.msra.mxu1 %v749_v17 }
  0x20   :  { %698 = vmatprep.subr.bf16.mxu1 %v756_v19 }
  0x22   :  { %376 = vmatmul.mubr.bf16.vlgmr.msra.gmra.mrb[0].mxu0 %v750_v18  ;;  %424 = vmatmul.mubr.bf16.vlgmr.msra.gmra.mrb[0].mxu1 %v753_v20 }
  0x23   :  { %699 = vmatpush3.bf16.msra.mxu1 %v756_v19  ;;  %383 = vmatprep.mubr.bf16.mxu0 %v757_v21 }
  0x24   :  { %431 = vmatprep.mubr.bf16.mxu1 %v759_v22  ;;  %700 = vmatprep.subr.bf16.mxu1 %v763_v23 }
  0x27   :  { %701 = vmatpush3.bf16.msra.mxu1 %v763_v23 }
  0x2a   :  { %384 = vmatmul.mubr.bf16.gmra.mrb[4].mxu0 %v761_v24  ;;  %432 = vmatmul.mubr.bf16.gmra.mrb[4].mxu1 %v762_v25 }
  0x2b   :  { %391 = vmatprep.mubr.bf16.mxu0 %v764_v26  ;;  %702 = vmatprep.mubr.msk.bf16.mxu1 %vm318_vm0, %v766_v27 }
  0x32   :  { %392 = vmatmul.mubr.bf16.gmra.mrb[8].mxu0 %v767_v28  ;;  %703 = vmatmul.mubr.msk.bf16.vlgmr.msra.gmra.mrb[8].mxu1 %vm318_vm0, %v768_v29 }
  0x33   :  { %399 = vmatprep.mubr.bf16.mxu0 %v769_v30  ;;  %706 = vmatprep.mubr.msk.bf16.mxu1 %vm318_vm0, %v771_v31 }
  0x3a   :  { %400 = vmatmul.mubr.bf16.gmra.mrb[12].mxu0 %v772_v32  ;;  %707 = vmatmul.mubr.msk.bf16.gmra.mrb[12].mxu1 %vm318_vm0, %v773_v33 }
  0x3b   :  { %407 = vmatprep.mubr.bf16.mxu0 %v774_v34  ;;  %710 = vmatprep.mubr.msk.bf16.mxu1 %vm318_vm0, %v776_v35 }
  0x42   :  { %408 = vmatmul.mubr.bf16.gmra.mrb[16].mxu0 %v777_v36  ;;  %711 = vmatmul.mubr.msk.bf16.gmra.mrb[16].mxu1 %vm318_vm0, %v778_v37 }
  0x43   :  { %415 = vmatprep.mubr.bf16.mxu0 %v779_v38  ;;  %714 = vmatprep.mubr.msk.bf16.mxu1 %vm318_vm0, %v781_v39 }
  0x4a   :  { %416 = vmatmul.mubr.bf16.gmra.mrb[20].mxu0 %v782_v40  ;;  %715 = vmatmul.mubr.msk.bf16.gmra.mrb[20].mxu1 %vm318_vm0, %v783_v41 }
  0xf5   :  { %v640_v42 = vpop.f32.mrb[0].mxu0  ;;  %v676_v43 = vpop.f32.mrb[0].mxu1 }
  0xf6   :  { %v641_v44 = vpop.f32.mrb[1].mxu0  ;;  %v677_v45 = vpop.f32.mrb[1].mxu1 }
  0xf7   :  { %v642_v46 = vadd.f32 %v641_v44, %v640_v42  ;;  %v643_v47 = vpop.f32.mrb[2].mxu0  ;;  %v938_v48 = vadd.f32 %v677_v45, %v676_v43  ;;  %v679_v49 = vpop.f32.mrb[2].mxu1 }
  0xf8   :  { %v644_v50 = vpop.f32.mrb[3].mxu0  ;;  %v680_v51 = vpop.f32.mrb[3].mxu1 }
  0xf9   :  { %v645_v52 = vadd.f32 %v644_v50, %v643_v47  ;;  %v940_v53 = vadd.f32 %v680_v51, %v679_v49  ;;  %v378_v6 = vadd.f32 %v642_v46, %v949_v2 }
  0xfb   :  { %v381_v15 = vadd.f32 %v645_v52, %v949_v2 }
  0xfd   :  { %v646_v54 = vpop.f32.mrb[4].mxu0  ;;  %v682_v55 = vpop.f32.mrb[4].mxu1 }
  0xfe   :  { %v647_v56 = vpop.f32.mrb[5].mxu0  ;;  %v683_v57 = vpop.f32.mrb[5].mxu1 }
  0xff   :  { %v648_v58 = vadd.f32 %v647_v56, %v646_v54  ;;  %v649_v59 = vpop.f32.mrb[6].mxu0  ;;  %v942_v60 = vadd.f32 %v683_v57, %v682_v55  ;;  %v685_v61 = vpop.f32.mrb[6].mxu1 }
 0x100   :  { %v650_v62 = vpop.f32.mrb[7].mxu0  ;;  %v686_v63 = vpop.f32.mrb[7].mxu1 }
 0x101   :  { %v651_v0 = vadd.f32 %v650_v62, %v649_v59  ;;  %v944_v1 = vadd.f32 %v686_v63, %v685_v61  ;;  %v386_v3 = vadd.f32 %v648_v58, %v949_v2  ;;  %v434_v63 = vadd.f32 %v942_v60, %v949_v2 }
 0x103   :  { %v389_v10 = vadd.f32 %v651_v0, %v949_v2 }
 0x105   :  { %v652_v4 = vpop.f32.mrb[8].mxu0  ;;  %v704_v5 = vpop.f32.mrb[8].mxu1 }
 0x106   :  { %v483_v7 = vadd.f32 %v704_v5, %v386_v3  ;;  %v653_v8 = vpop.f32.mrb[9].mxu0  ;;  %v474_v9 = vpop.f32.mrb[9].mxu1 }
 0x107   :  { %v654_v11 = vadd.f32 %v653_v8, %v652_v4  ;;  %v475_v12 = vadd.f32 %v474_v9, %v378_v6  ;;  %v655_v13 = vpop.f32.mrb[10].mxu0  ;;  %v705_v14 = vpop.f32.mrb[10].mxu1  ;;  %v426_v6 = vadd.f32 %v938_v48, %v949_v2 }
 0x108   :  { %v539_v16 = vmax.f32 %v483_v7, 0.0  ;;  %v486_v17 = vadd.f32 %v705_v14, %v389_v10  ;;  %v656_v18 = vpop.f32.mrb[11].mxu0  ;;  %v477_v19 = vpop.f32.mrb[11].mxu1  ;;  %v437_v10 = vadd.f32 %v944_v1, %v949_v2 }
 0x109   :  { %v537_v20 = vmax.f32 %v475_v12, 0.0  ;;  %v657_v21 = vadd.f32 %v656_v18, %v655_v13  ;;  %v478_v22 = vadd.f32 %v477_v19, %v381_v15  ;;  %v394_v27 = vadd.f32 %v654_v11, %v949_v2 }
 0x10a   :  { %555 = vst.msk [vmem:[%s1038_s3 + $0x10] sm:$0xff] %vm318_vm0, %v539_v16  ;;  %v540_v23 = vmax.f32 %v486_v17, 0.0  ;;  %v429_v15 = vadd.f32 %v940_v53, %v949_v2 }
 0x10b   :  { %553 = vst.msk [vmem:[%s1038_s3] sm:$0xff] %vm318_vm0, %v537_v20  ;;  %v538_v24 = vmax.f32 %v478_v22, 0.0  ;;  %v397_v34 = vadd.f32 %v657_v21, %v949_v2 }
 0x10c   :  { %556 = vst.msk [vmem:[%s1038_s3 + $0x18] sm:$0xff] %vm318_vm0, %v540_v23 }
 0x10d   :  { %554 = vst.msk [vmem:[%s1038_s3 + $0x8] sm:$0xff] %vm318_vm0, %v538_v24  ;;  %v658_v25 = vpop.f32.mrb[12].mxu0  ;;  %v708_v26 = vpop.f32.mrb[12].mxu1 }
 0x10e   :  { %v659_v28 = vpop.f32.mrb[13].mxu0  ;;  %v490_v29 = vpop.f32.mrb[13].mxu1 }
 0x10f   :  { %v660_v30 = vadd.f32 %v659_v28, %v658_v25  ;;  %v491_v31 = vadd.f32 %v490_v29, %v394_v27  ;;  %v661_v32 = vpop.f32.mrb[14].mxu0  ;;  %v709_v33 = vpop.f32.mrb[14].mxu1 }
 0x110   :  { %v662_v35 = vpop.f32.mrb[15].mxu0  ;;  %v493_v36 = vpop.f32.mrb[15].mxu1 }
 0x111   :  { %v402_v37 = vadd.f32 %v660_v30, %v949_v2  ;;  %v541_v38 = vmax.f32 %v491_v31, 0.0  ;;  %v663_v39 = vadd.f32 %v662_v35, %v661_v32  ;;  %v494_v40 = vadd.f32 %v493_v36, %v397_v34 }
 0x113   :  { %v499_v41 = vadd.f32 %v708_v26, %v402_v37  ;;  %557 = vst.msk [vmem:[%s1038_s3 + $0x20] sm:$0xff] %vm318_vm0, %v541_v38  ;;  %v405_v42 = vadd.f32 %v663_v39, %v949_v2  ;;  %v542_v43 = vmax.f32 %v494_v40, 0.0 }
 0x115   :  { %v543_v44 = vmax.f32 %v499_v41, 0.0  ;;  %v502_v45 = vadd.f32 %v709_v33, %v405_v42  ;;  %558 = vst.msk [vmem:[%s1038_s3 + $0x28] sm:$0xff] %vm318_vm0, %v542_v43  ;;  %v664_v46 = vpop.f32.mrb[16].mxu0  ;;  %v712_v47 = vpop.f32.mrb[16].mxu1 }
 0x116   :  { %v665_v49 = vpop.f32.mrb[17].mxu0  ;;  %v506_v50 = vpop.f32.mrb[17].mxu1 }
 0x117   :  { %559 = vst.msk [vmem:[%s1038_s3 + $0x30] sm:$0xff] %vm318_vm0, %v543_v44  ;;  %v544_v51 = vmax.f32 %v502_v45, 0.0  ;;  %v666_v52 = vadd.f32 %v665_v49, %v664_v46  ;;  %v667_v54 = vpop.f32.mrb[18].mxu0  ;;  %v713_v55 = vpop.f32.mrb[18].mxu1 }
 0x118   :  { %v668_v56 = vpop.f32.mrb[19].mxu0  ;;  %v509_v57 = vpop.f32.mrb[19].mxu1 }
 0x119   :  { %560 = vst.msk [vmem:[%s1038_s3 + $0x38] sm:$0xff] %vm318_vm0, %v544_v51  ;;  %v410_v58 = vadd.f32 %v666_v52, %v949_v2  ;;  %v669_v59 = vadd.f32 %v668_v56, %v667_v54 }
 0x11b   :  { %v507_v61 = vadd.f32 %v506_v50, %v410_v58  ;;  %v413_v62 = vadd.f32 %v669_v59, %v949_v2 }
 0x11d   :  { %v545_v0 = vmax.f32 %v507_v61, 0.0  ;;  %v510_v3 = vadd.f32 %v509_v57, %v413_v62  ;;  %v670_v4 = vpop.f32.mrb[20].mxu0  ;;  %v716_v5 = vpop.f32.mrb[20].mxu1 }
 0x11e   :  { %v531_v7 = vadd.f32 %v716_v5, %v434_v63  ;;  %v671_v8 = vpop.f32.mrb[21].mxu0  ;;  %v522_v9 = vpop.f32.mrb[21].mxu1 }
 0x11f   :  { %561 = vst.msk [vmem:[%s1038_s3 + $0x40] sm:$0xff] %vm318_vm0, %v545_v0  ;;  %v546_v11 = vmax.f32 %v510_v3, 0.0  ;;  %v672_v60 = vadd.f32 %v671_v8, %v670_v4  ;;  %v523_v12 = vadd.f32 %v522_v9, %v426_v6  ;;  %v673_v13 = vpop.f32.mrb[22].mxu0  ;;  %v717_v14 = vpop.f32.mrb[22].mxu1 }
 0x120   :  { %v551_v48 = vmax.f32 %v531_v7, 0.0  ;;  %v534_v16 = vadd.f32 %v717_v14, %v437_v10  ;;  %v674_v17 = vpop.f32.mrb[23].mxu0  ;;  %v525_v18 = vpop.f32.mrb[23].mxu1 }
 0x121   :  { %562 = vst.msk [vmem:[%s1038_s3 + $0x48] sm:$0xff] %vm318_vm0, %v546_v11  ;;  %v418_v1 = vadd.f32 %v672_v60, %v949_v2  ;;  %v549_v19 = vmax.f32 %v523_v12, 0.0  ;;  %v675_v20 = vadd.f32 %v674_v17, %v673_v13  ;;  %v526_v21 = vadd.f32 %v525_v18, %v429_v15 }
 0x122   :  { %567 = vst.msk [vmem:[%s1038_s3 + $0x70] sm:$0xff] %vm318_vm0, %v551_v48  ;;  %v552_v53 = vmax.f32 %v534_v16, 0.0 }
 0x123   :  { %v515_v22 = vadd.f32 %v712_v47, %v418_v1  ;;  %565 = vst.msk [vmem:[%s1038_s3 + $0x60] sm:$0xff] %vm318_vm0, %v549_v19  ;;  %v421_v23 = vadd.f32 %v675_v20, %v949_v2  ;;  %v550_v24 = vmax.f32 %v526_v21, 0.0 }
 0x124   :  { %568 = vst.msk [vmem:[%s1038_s3 + $0x78] sm:$0xff] %vm318_vm0, %v552_v53 }
 0x125   :  { %v547_v25 = vmax.f32 %v515_v22, 0.0  ;;  %v518_v26 = vadd.f32 %v713_v55, %v421_v23  ;;  %566 = vst.msk [vmem:[%s1038_s3 + $0x68] sm:$0xff] %vm318_vm0, %v550_v24 }
 0x127   :  { %563 = vst.msk [vmem:[%s1038_s3 + $0x50] sm:$0xff] %vm318_vm0, %v547_v25  ;;  %v548_v27 = vmax.f32 %v518_v26, 0.0 }
 0x129   :  { %564 = vst.msk [vmem:[%s1038_s3 + $0x58] sm:$0xff] %vm318_vm0, %v548_v27 }

// kernel: tile.13
= control target key start
LH: loop header
LB: loop body
LE: loop exit
PB: predicated region body
PF: predicated region fallthrough
CT: control target
= control target key end

     0   :  { %s22_s0 = inlined_call_operand.vmem [shape: f32[16], index: 0, kind: input, shape index: {}]   ;;  %s23_s1 = inlined_call_operand.vmem [shape: f32[4,16], index: 1, kind: output, shape index: {}]  }
   0x1   :  { %v4_v0 = vld [vmem:[%s22_s0] ss:$0 sm:$0xff] }
   0x2   :  { %5 = vst [vmem:[%s23_s1] sm:$0xf] %v4_v0 }

// kernel: tile.14
= control target key start
LH: loop header
LB: loop body
LE: loop exit
PB: predicated region body
PF: predicated region fallthrough
CT: control target
= control target key end

     0   :  { %vm7_vm0 = vcmask 130048   ;;  %s37_s8 = smov 16   ;;  %s38_s9 = smov 32   ;;  %vm13_vm1 = vcmask 523648   ;;  %vm19_vm2 = vcmask 392448   ;;  %vm25_vm3 = vcmask 261248   ;;  %s55_s0 = inlined_call_operand.vmem [shape: f32[4,16], index: 0, kind: input, shape index: {}]   ;;  %s56_s1 = inlined_call_operand.vmem [shape: f32[1,64], index: 1, kind: output, shape index: {}]  }
   0x1   :  { %v4_v0 = vld [vmem:[%s55_s0] sm:$0xf]  ;;  %s36_s0 = smov 48  }
   0x2   :  { %5 = vst [vmem:[#allocation1] sm:$0xf] %v4_v0 }
   0x9   :  { %v10_v1 = vld [vmem:[#allocation1 + $0x3] sm:$0x1]   ;;  %v22_v2 = vld [vmem:[#allocation1 + $0x1] sm:$0x1]   ;;  %v6_v3 = vld [vmem:[#allocation1] sm:$0x1]  }
   0xa   :  { %11 = vrot.lane.b32.xlu0 %v10_v1, %s36_s0  ;;  %23 = vrot.lane.b32.xlu1 %v22_v2, %s37_s8  ;;  %v16_v4 = vld [vmem:[#allocation1 + $0x2] sm:$0x1]   ;;  %8 = vst.msk [vmem:[#allocation0] sm:$0x1] %vm7_vm0, %v6_v3  }
   0xe   :  { %17 = vrot.lane.b32.xlu0 %v16_v4, %s38_s9 }
  0x7c   :  { %v12_v5 = vpop.permute.xlu0 %11   ;;  %v24_v6 = vpop.permute.xlu1 %23  }
  0x7d   :  { %14 = vst.msk [vmem:[#allocation0] sm:$0x1] %vm13_vm1, %v12_v5  }
  0x80   :  { %v18_v7 = vpop.permute.xlu0 %17  }
  0x81   :  { %20 = vst.msk [vmem:[#allocation0] sm:$0x1] %vm19_vm2, %v18_v7  }
  0x82   :  { %26 = vst.msk [vmem:[#allocation0] sm:$0x1] %vm25_vm3, %v24_v6  }
  0x89   :  { %v30_v8 = vld [vmem:[#allocation0] sm:$0x1] }
  0x8a   :  { %32 = vst [vmem:[%s56_s1] sm:$0x1] %v30_v8 }

// kernel: decoder_forward.8
= control target key start
LH: loop header
LB: loop body
LE: loop exit
PB: predicated region body
PF: predicated region fallthrough
CT: control target
= control target key end

     0   :  { %vm318_vm0 = vcmask 261120   ;;  %vm553_vm1 = vcmask 523264   ;;  %s1036_s1 = inlined_call_operand.vmem [shape: bf16[288,64], index: 1, kind: input, shape index: {}]   ;;  %s1037_s0 = inlined_call_operand.vmem [shape: bf16[128,288], index: 0, kind: input, shape index: {}]   ;;  %s1038_s2 = inlined_call_operand.vmem [shape: f32[1,64], index: 2, kind: input, shape index: {}]   ;;  %s1039_s3 = inlined_call_operand.vmem [shape: f32[128,64], index: 3, kind: output, shape index: {}]  }
   0x1   :  { %v735_v0 = vld [vmem:[%s1036_s1 + $0x40] sm:$0xff]   ;;  %v737_v2 = vld [vmem:[%s1036_s1 + $0x48] sm:$0xff]   ;;  %v739_v4 = vld [vmem:[%s1036_s1 + $0x50] sm:$0xff]  }
   0x2   :  { %v736_v1 = vld [vmem:[%s1036_s1] sm:$0xff]   ;;  %625 = vmatprep.subr.bf16.mxu0 %v735_v0  ;;  %719 = vmatprep.subr.bf16.mxu1 %v735_v0  ;;  %v738_v3 = vld [vmem:[%s1036_s1 + $0x8] sm:$0xff]   ;;  %v740_v5 = vld [vmem:[%s1036_s1 + $0x10] sm:$0xff]  }
   0x3   :  { %626 = vmatpush3.bf16.msra.mxu0 %v736_v1  ;;  %727 = vmatpush3.bf16.msra.mxu1 %v736_v1  ;;  %v741_v6 = vld [vmem:[%s1036_s1 + $0x58] sm:$0xff]   ;;  %v743_v8 = vld [vmem:[%s1036_s1 + $0x60] sm:$0xff]   ;;  %v745_v10 = vld [vmem:[%s1036_s1 + $0x68] sm:$0xff]  }
   0x4   :  { %627 = vmatprep.subr.bf16.mxu0 %v737_v2  ;;  %720 = vmatprep.subr.bf16.mxu1 %v737_v2  ;;  %v742_v7 = vld [vmem:[%s1036_s1 + $0x18] sm:$0xff]   ;;  %v744_v9 = vld [vmem:[%s1036_s1 + $0x20] sm:$0xff]   ;;  %v746_v13 = vld [vmem:[%s1036_s1 + $0x28] sm:$0xff]  }
   0x5   :  { %v753_v11 = vld [vmem:[%s1037_s0 + $0x4] ss:$12 sps:$4 sm:$0xff]   ;;  %v756_v12 = vld [vmem:[%s1037_s0 + $0x94] ss:$12 sps:$4 sm:$0xff]   ;;  %v749_v16 = vld [vmem:[%s1036_s1 + $0x78] sm:$0xff]  }
   0x6   :  { %v747_v14 = vld [vmem:[%s1036_s1 + $0x70] sm:$0xff]   ;;  %375 = vmatprep.mubr.bf16.mxu0 %v753_v11  ;;  %423 = vmatprep.mubr.bf16.mxu1 %v756_v12  ;;  %v750_v17 = vld [vmem:[%s1036_s1 + $0x38] sm:$0xff]   ;;  %v751_v18 = vld [vmem:[%s1037_s0] ss:$12 sps:$4 sm:$0xff]  }
   0x7   :  { %628 = vmatpush3.bf16.msra.mxu0 %v738_v3  ;;  %728 = vmatpush3.bf16.msra.mxu1 %v738_v3  ;;  %v748_v15 = vld [vmem:[%s1036_s1 + $0x30] sm:$0xff]   ;;  %v757_v19 = vld [vmem:[%s1036_s1 + $0x80] sm:$0xff]   ;;  %v758_v21 = vld [vmem:[%s1037_s0 + $0x1c] ss:$12 sps:$4 sm:$0xff]  }
   0x8   :  { %629 = vmatprep.subr.bf16.mxu0 %v739_v4  ;;  %721 = vmatprep.subr.bf16.mxu1 %v739_v4  ;;  %v754_v20 = vld [vmem:[%s1037_s0 + $0x90] ss:$12 sps:$4 sm:$0xff]   ;;  %v760_v22 = vld [vmem:[%s1037_s0 + $0xac] ss:$12 sps:$4 sm:$0xff]   ;;  %v763_v25 = vld [vmem:[%s1037_s0 + $0xa8] ss:$12 sps:$4 sm:$0xff]  }
   0x9   :  { %v764_v23 = vld [vmem:[%s1036_s1 + $0x88] sm:$0xff]   ;;  %v762_v24 = vld [vmem:[%s1037_s0 + $0x18] ss:$12 sps:$4 sm:$0xff]   ;;  %v765_v26 = vld [vmem:[%s1037_s0 + $0x34] ss:$12 sps:$4 sm:$0xff]  }
   0xa   :  { %v767_v27 = vld [vmem:[%s1037_s0 + $0x8] ss:$12 sps:$4 sm:$0xff]   ;;  %v768_v28 = vld [vmem:[%s1037_s0 + $0x30] ss:$12 sps:$4 sm:$0xff]   ;;  %v769_v29 = vld [vmem:[%s1037_s0 + $0x20] ss:$12 sps:$4 sm:$0xff]  }
   0xb   :  { %630 = vmatpush3.bf16.msra.mxu0 %v740_v5  ;;  %729 = vmatpush3.bf16.msra.mxu1 %v740_v5  ;;  %v770_v30 = vld [vmem:[%s1037_s0 + $0x4c] ss:$12 sps:$4 sm:$0xff]   ;;  %v773_v32 = vld [vmem:[%s1037_s0 + $0x48] ss:$12 sps:$4 sm:$0xff]   ;;  %v774_v33 = vld [vmem:[%s1037_s0 + $0x50] ss:$12 sps:$4 sm:$0xff]  }
   0xc   :  { %631 = vmatprep.subr.bf16.mxu0 %v741_v6  ;;  %722 = vmatprep.subr.bf16.mxu1 %v741_v6  ;;  %v772_v31 = vld [vmem:[%s1037_s0 + $0x38] ss:$12 sps:$4 sm:$0xff]   ;;  %v777_v35 = vld [vmem:[%s1037_s0 + $0x68] ss:$12 sps:$4 sm:$0xff]   ;;  %v778_v36 = vld [vmem:[%s1037_s0 + $0x60] ss:$12 sps:$4 sm:$0xff]  }
   0xd   :  { %v775_v34 = vld [vmem:[%s1037_s0 + $0x64] ss:$12 sps:$4 sm:$0xff]   ;;  %v779_v37 = vld [vmem:[%s1037_s0 + $0x80] ss:$12 sps:$4 sm:$0xff]   ;;  %v780_v38 = vld [vmem:[%s1037_s0 + $0x7c] ss:$12 sps:$4 sm:$0xff]  }
   0xe   :  { %v782_v39 = vld [vmem:[%s1037_s0 + $0x98] ss:$12 sps:$4 sm:$0xff]   ;;  %v784_v41 = vld [vmem:[%s1037_s0 + $0xb0] ss:$12 sps:$4 sm:$0xff]   ;;  %v950_v2 = vld [vmem:[%s1038_s2] ss:$0 sm:$0xff] }
   0xf   :  { %632 = vmatpush3.bf16.msra.mxu0 %v742_v7  ;;  %730 = vmatpush3.bf16.msra.mxu1 %v742_v7  ;;  %v783_v40 = vld [vmem:[%s1037_s0 + $0x78] ss:$12 sps:$4 sm:$0xff]  }
  0x10   :  { %633 = vmatprep.subr.bf16.mxu0 %v743_v8  ;;  %723 = vmatprep.subr.bf16.mxu1 %v743_v8 }
  0x13   :  { %634 = vmatpush3.bf16.msra.mxu0 %v744_v9  ;;  %731 = vmatpush3.bf16.msra.mxu1 %v744_v9 }
  0x14   :  { %635 = vmatprep.subr.bf16.mxu0 %v745_v10  ;;  %724 = vmatprep.subr.bf16.mxu1 %v745_v10 }
  0x17   :  { %636 = vmatpush3.bf16.msra.mxu0 %v746_v13  ;;  %732 = vmatpush3.bf16.msra.mxu1 %v746_v13 }
  0x18   :  { %637 = vmatprep.subr.bf16.mxu0 %v747_v14  ;;  %725 = vmatprep.subr.bf16.mxu1 %v747_v14 }
  0x1b   :  { %638 = vmatpush3.bf16.msra.mxu0 %v748_v15  ;;  %733 = vmatpush3.bf16.msra.mxu1 %v748_v15 }
  0x1c   :  { %639 = vmatprep.subr.bf16.mxu0 %v749_v16  ;;  %726 = vmatprep.subr.bf16.mxu1 %v749_v16 }
  0x1f   :  { %640 = vmatpush3.bf16.msra.mxu0 %v750_v17  ;;  %734 = vmatpush3.bf16.msra.mxu1 %v750_v17 }
  0x20   :  { %699 = vmatprep.subr.bf16.mxu1 %v757_v19 }
  0x22   :  { %376 = vmatmul.mubr.bf16.vlgmr.msra.gmra.mrb[0].mxu0 %v751_v18  ;;  %424 = vmatmul.mubr.bf16.vlgmr.msra.gmra.mrb[0].mxu1 %v754_v20 }
  0x23   :  { %700 = vmatpush3.bf16.msra.mxu1 %v757_v19  ;;  %383 = vmatprep.mubr.bf16.mxu0 %v758_v21 }
  0x24   :  { %431 = vmatprep.mubr.bf16.mxu1 %v760_v22  ;;  %701 = vmatprep.subr.bf16.mxu1 %v764_v23 }
  0x27   :  { %702 = vmatpush3.bf16.msra.mxu1 %v764_v23 }
  0x2a   :  { %384 = vmatmul.mubr.bf16.gmra.mrb[4].mxu0 %v762_v24  ;;  %432 = vmatmul.mubr.bf16.gmra.mrb[4].mxu1 %v763_v25 }
  0x2b   :  { %391 = vmatprep.mubr.bf16.mxu0 %v765_v26  ;;  %703 = vmatprep.mubr.msk.bf16.mxu1 %vm318_vm0, %v767_v27 }
  0x32   :  { %392 = vmatmul.mubr.bf16.gmra.mrb[8].mxu0 %v768_v28  ;;  %704 = vmatmul.mubr.msk.bf16.vlgmr.msra.gmra.mrb[8].mxu1 %vm318_vm0, %v769_v29 }
  0x33   :  { %399 = vmatprep.mubr.bf16.mxu0 %v770_v30  ;;  %707 = vmatprep.mubr.msk.bf16.mxu1 %vm318_vm0, %v772_v31 }
  0x3a   :  { %400 = vmatmul.mubr.bf16.gmra.mrb[12].mxu0 %v773_v32  ;;  %708 = vmatmul.mubr.msk.bf16.gmra.mrb[12].mxu1 %vm318_vm0, %v774_v33 }
  0x3b   :  { %407 = vmatprep.mubr.bf16.mxu0 %v775_v34  ;;  %711 = vmatprep.mubr.msk.bf16.mxu1 %vm318_vm0, %v777_v35 }
  0x42   :  { %408 = vmatmul.mubr.bf16.gmra.mrb[16].mxu0 %v778_v36  ;;  %712 = vmatmul.mubr.msk.bf16.gmra.mrb[16].mxu1 %vm318_vm0, %v779_v37 }
  0x43   :  { %415 = vmatprep.mubr.bf16.mxu0 %v780_v38  ;;  %715 = vmatprep.mubr.msk.bf16.mxu1 %vm318_vm0, %v782_v39 }
  0x4a   :  { %416 = vmatmul.mubr.bf16.gmra.mrb[20].mxu0 %v783_v40  ;;  %716 = vmatmul.mubr.msk.bf16.gmra.mrb[20].mxu1 %vm318_vm0, %v784_v41 }
  0xf5   :  { %v641_v42 = vpop.f32.mrb[0].mxu0  ;;  %v677_v43 = vpop.f32.mrb[0].mxu1 }
  0xf6   :  { %v642_v44 = vpop.f32.mrb[1].mxu0  ;;  %v678_v45 = vpop.f32.mrb[1].mxu1 }
  0xf7   :  { %v643_v46 = vadd.f32 %v642_v44, %v641_v42  ;;  %v644_v47 = vpop.f32.mrb[2].mxu0  ;;  %v939_v48 = vadd.f32 %v678_v45, %v677_v43  ;;  %v680_v49 = vpop.f32.mrb[2].mxu1 }
  0xf8   :  { %v645_v50 = vpop.f32.mrb[3].mxu0  ;;  %v681_v51 = vpop.f32.mrb[3].mxu1 }
  0xf9   :  { %v646_v52 = vadd.f32 %v645_v50, %v644_v47  ;;  %v941_v53 = vadd.f32 %v681_v51, %v680_v49  ;;  %v378_v6 = vadd.f32 %v643_v46, %v950_v2 }
  0xfb   :  { %v381_v15 = vadd.f32 %v646_v52, %v950_v2 }
  0xfd   :  { %v647_v54 = vpop.f32.mrb[4].mxu0  ;;  %v683_v55 = vpop.f32.mrb[4].mxu1 }
  0xfe   :  { %v648_v56 = vpop.f32.mrb[5].mxu0  ;;  %v684_v57 = vpop.f32.mrb[5].mxu1 }
  0xff   :  { %v649_v58 = vadd.f32 %v648_v56, %v647_v54  ;;  %v650_v59 = vpop.f32.mrb[6].mxu0  ;;  %v943_v60 = vadd.f32 %v684_v57, %v683_v55  ;;  %v686_v61 = vpop.f32.mrb[6].mxu1 }
 0x100   :  { %v651_v62 = vpop.f32.mrb[7].mxu0  ;;  %v687_v63 = vpop.f32.mrb[7].mxu1 }
 0x101   :  { %v652_v0 = vadd.f32 %v651_v62, %v650_v59  ;;  %v945_v1 = vadd.f32 %v687_v63, %v686_v61  ;;  %v386_v3 = vadd.f32 %v649_v58, %v950_v2  ;;  %v434_v63 = vadd.f32 %v943_v60, %v950_v2 }
 0x103   :  { %v389_v10 = vadd.f32 %v652_v0, %v950_v2 }
 0x105   :  { %v653_v4 = vpop.f32.mrb[8].mxu0  ;;  %v705_v5 = vpop.f32.mrb[8].mxu1 }
 0x106   :  { %v483_v7 = vadd.f32 %v705_v5, %v386_v3  ;;  %v654_v8 = vpop.f32.mrb[9].mxu0  ;;  %v474_v9 = vpop.f32.mrb[9].mxu1 }
 0x107   :  { %v655_v11 = vadd.f32 %v654_v8, %v653_v4  ;;  %v475_v12 = vadd.f32 %v474_v9, %v378_v6  ;;  %v656_v13 = vpop.f32.mrb[10].mxu0  ;;  %v706_v14 = vpop.f32.mrb[10].mxu1  ;;  %v426_v6 = vadd.f32 %v939_v48, %v950_v2 }
 0x108   :  { %v539_v16 = vmax.f32 %v483_v7, 0.0  ;;  %v486_v17 = vadd.f32 %v706_v14, %v389_v10  ;;  %v657_v18 = vpop.f32.mrb[11].mxu0  ;;  %v477_v19 = vpop.f32.mrb[11].mxu1  ;;  %v437_v10 = vadd.f32 %v945_v1, %v950_v2 }
 0x109   :  { %v537_v20 = vmax.f32 %v475_v12, 0.0  ;;  %v658_v21 = vadd.f32 %v657_v18, %v656_v13  ;;  %v478_v22 = vadd.f32 %v477_v19, %v381_v15  ;;  %v394_v27 = vadd.f32 %v655_v11, %v950_v2 }
 0x10a   :  { %556 = vst.msk [vmem:[%s1039_s3 + $0x10] sm:$0xff] %vm553_vm1, %v539_v16  ;;  %v540_v23 = vmax.f32 %v486_v17, 0.0  ;;  %v429_v15 = vadd.f32 %v941_v53, %v950_v2 }
 0x10b   :  { %554 = vst.msk [vmem:[%s1039_s3] sm:$0xff] %vm553_vm1, %v537_v20  ;;  %v538_v24 = vmax.f32 %v478_v22, 0.0  ;;  %v397_v34 = vadd.f32 %v658_v21, %v950_v2 }
 0x10c   :  { %557 = vst.msk [vmem:[%s1039_s3 + $0x18] sm:$0xff] %vm553_vm1, %v540_v23 }
 0x10d   :  { %555 = vst.msk [vmem:[%s1039_s3 + $0x8] sm:$0xff] %vm553_vm1, %v538_v24  ;;  %v659_v25 = vpop.f32.mrb[12].mxu0  ;;  %v709_v26 = vpop.f32.mrb[12].mxu1 }
 0x10e   :  { %v660_v28 = vpop.f32.mrb[13].mxu0  ;;  %v490_v29 = vpop.f32.mrb[13].mxu1 }
 0x10f   :  { %v661_v30 = vadd.f32 %v660_v28, %v659_v25  ;;  %v491_v31 = vadd.f32 %v490_v29, %v394_v27  ;;  %v662_v32 = vpop.f32.mrb[14].mxu0  ;;  %v710_v33 = vpop.f32.mrb[14].mxu1 }
 0x110   :  { %v663_v35 = vpop.f32.mrb[15].mxu0  ;;  %v493_v36 = vpop.f32.mrb[15].mxu1 }
 0x111   :  { %v402_v37 = vadd.f32 %v661_v30, %v950_v2  ;;  %v541_v38 = vmax.f32 %v491_v31, 0.0  ;;  %v664_v39 = vadd.f32 %v663_v35, %v662_v32  ;;  %v494_v40 = vadd.f32 %v493_v36, %v397_v34 }
 0x113   :  { %v499_v41 = vadd.f32 %v709_v26, %v402_v37  ;;  %558 = vst.msk [vmem:[%s1039_s3 + $0x20] sm:$0xff] %vm553_vm1, %v541_v38  ;;  %v405_v42 = vadd.f32 %v664_v39, %v950_v2  ;;  %v542_v43 = vmax.f32 %v494_v40, 0.0 }
 0x115   :  { %v543_v44 = vmax.f32 %v499_v41, 0.0  ;;  %v502_v45 = vadd.f32 %v710_v33, %v405_v42  ;;  %559 = vst.msk [vmem:[%s1039_s3 + $0x28] sm:$0xff] %vm553_vm1, %v542_v43  ;;  %v665_v46 = vpop.f32.mrb[16].mxu0  ;;  %v713_v47 = vpop.f32.mrb[16].mxu1 }
 0x116   :  { %v666_v49 = vpop.f32.mrb[17].mxu0  ;;  %v506_v50 = vpop.f32.mrb[17].mxu1 }
 0x117   :  { %560 = vst.msk [vmem:[%s1039_s3 + $0x30] sm:$0xff] %vm553_vm1, %v543_v44  ;;  %v544_v51 = vmax.f32 %v502_v45, 0.0  ;;  %v667_v52 = vadd.f32 %v666_v49, %v665_v46  ;;  %v668_v54 = vpop.f32.mrb[18].mxu0  ;;  %v714_v55 = vpop.f32.mrb[18].mxu1 }
 0x118   :  { %v669_v56 = vpop.f32.mrb[19].mxu0  ;;  %v509_v57 = vpop.f32.mrb[19].mxu1 }
 0x119   :  { %561 = vst.msk [vmem:[%s1039_s3 + $0x38] sm:$0xff] %vm553_vm1, %v544_v51  ;;  %v410_v58 = vadd.f32 %v667_v52, %v950_v2  ;;  %v670_v59 = vadd.f32 %v669_v56, %v668_v54 }
 0x11b   :  { %v507_v61 = vadd.f32 %v506_v50, %v410_v58  ;;  %v413_v62 = vadd.f32 %v670_v59, %v950_v2 }
 0x11d   :  { %v545_v0 = vmax.f32 %v507_v61, 0.0  ;;  %v510_v3 = vadd.f32 %v509_v57, %v413_v62  ;;  %v671_v4 = vpop.f32.mrb[20].mxu0  ;;  %v717_v5 = vpop.f32.mrb[20].mxu1 }
 0x11e   :  { %v531_v7 = vadd.f32 %v717_v5, %v434_v63  ;;  %v672_v8 = vpop.f32.mrb[21].mxu0  ;;  %v522_v9 = vpop.f32.mrb[21].mxu1 }
 0x11f   :  { %562 = vst.msk [vmem:[%s1039_s3 + $0x40] sm:$0xff] %vm553_vm1, %v545_v0  ;;  %v546_v11 = vmax.f32 %v510_v3, 0.0  ;;  %v673_v60 = vadd.f32 %v672_v8, %v671_v4  ;;  %v523_v12 = vadd.f32 %v522_v9, %v426_v6  ;;  %v674_v13 = vpop.f32.mrb[22].mxu0  ;;  %v718_v14 = vpop.f32.mrb[22].mxu1 }
 0x120   :  { %v551_v48 = vmax.f32 %v531_v7, 0.0  ;;  %v534_v16 = vadd.f32 %v718_v14, %v437_v10  ;;  %v675_v17 = vpop.f32.mrb[23].mxu0  ;;  %v525_v18 = vpop.f32.mrb[23].mxu1 }
 0x121   :  { %563 = vst.msk [vmem:[%s1039_s3 + $0x48] sm:$0xff] %vm553_vm1, %v546_v11  ;;  %v418_v1 = vadd.f32 %v673_v60, %v950_v2  ;;  %v549_v19 = vmax.f32 %v523_v12, 0.0  ;;  %v676_v20 = vadd.f32 %v675_v17, %v674_v13  ;;  %v526_v21 = vadd.f32 %v525_v18, %v429_v15 }
 0x122   :  { %568 = vst.msk [vmem:[%s1039_s3 + $0x70] sm:$0xff] %vm553_vm1, %v551_v48  ;;  %v552_v53 = vmax.f32 %v534_v16, 0.0 }
 0x123   :  { %v515_v22 = vadd.f32 %v713_v47, %v418_v1  ;;  %566 = vst.msk [vmem:[%s1039_s3 + $0x60] sm:$0xff] %vm553_vm1, %v549_v19  ;;  %v421_v23 = vadd.f32 %v676_v20, %v950_v2  ;;  %v550_v24 = vmax.f32 %v526_v21, 0.0 }
 0x124   :  { %569 = vst.msk [vmem:[%s1039_s3 + $0x78] sm:$0xff] %vm553_vm1, %v552_v53 }
 0x125   :  { %v547_v25 = vmax.f32 %v515_v22, 0.0  ;;  %v518_v26 = vadd.f32 %v714_v55, %v421_v23  ;;  %567 = vst.msk [vmem:[%s1039_s3 + $0x68] sm:$0xff] %vm553_vm1, %v550_v24 }
 0x127   :  { %564 = vst.msk [vmem:[%s1039_s3 + $0x50] sm:$0xff] %vm553_vm1, %v547_v25  ;;  %v548_v27 = vmax.f32 %v518_v26, 0.0 }
 0x129   :  { %565 = vst.msk [vmem:[%s1039_s3 + $0x58] sm:$0xff] %vm553_vm1, %v548_v27 }

// kernel: tile.18
= control target key start
LH: loop header
LB: loop body
LE: loop exit
PB: predicated region body
PF: predicated region fallthrough
CT: control target
= control target key end

     0   :  { %s22_s0 = inlined_call_operand.vmem [shape: f32[3], index: 0, kind: input, shape index: {}]   ;;  %s23_s1 = inlined_call_operand.vmem [shape: f32[4,3], index: 1, kind: output, shape index: {}]  }
   0x1   :  { %v4_v0 = vld [vmem:[%s22_s0] ss:$0 sm:$0xff] }
   0x2   :  { %5 = vst [vmem:[%s23_s1] sm:$0xf] %v4_v0 }

// kernel: tile.19
= control target key start
LH: loop header
LB: loop body
LE: loop exit
PB: predicated region body
PF: predicated region fallthrough
CT: control target
= control target key end

     0   :  { %vm7_vm0 = vcmask 23552   ;;  %s37_s8 = smov 3   ;;  %s38_s9 = smov 6   ;;  %vm13_vm1 = vcmask 97352   ;;  %vm19_vm2 = vcmask 72752   ;;  %vm25_vm3 = vcmask 48152   ;;  %s55_s0 = inlined_call_operand.vmem [shape: f32[4,3], index: 0, kind: input, shape index: {}]   ;;  %s56_s1 = inlined_call_operand.vmem [shape: f32[1,12], index: 1, kind: output, shape index: {}]  }
   0x1   :  { %v4_v0 = vld [vmem:[%s55_s0] sm:$0xf]  ;;  %s36_s0 = smov 9  }
   0x2   :  { %5 = vst [vmem:[#allocation1] sm:$0xf] %v4_v0 }
   0x9   :  { %v10_v1 = vld [vmem:[#allocation1 + $0x3] sm:$0x1]   ;;  %v22_v2 = vld [vmem:[#allocation1 + $0x1] sm:$0x1]   ;;  %v6_v3 = vld [vmem:[#allocation1] sm:$0x1]  }
   0xa   :  { %11 = vrot.lane.b32.xlu0 %v10_v1, %s36_s0  ;;  %23 = vrot.lane.b32.xlu1 %v22_v2, %s37_s8  ;;  %v16_v4 = vld [vmem:[#allocation1 + $0x2] sm:$0x1]   ;;  %8 = vst.msk [vmem:[#allocation0] sm:$0x1] %vm7_vm0, %v6_v3  }
   0xe   :  { %17 = vrot.lane.b32.xlu0 %v16_v4, %s38_s9 }
  0x7c   :  { %v12_v5 = vpop.permute.xlu0 %11   ;;  %v24_v6 = vpop.permute.xlu1 %23  }
  0x7d   :  { %14 = vst.msk [vmem:[#allocation0] sm:$0x1] %vm13_vm1, %v12_v5  }
  0x80   :  { %v18_v7 = vpop.permute.xlu0 %17  }
  0x81   :  { %20 = vst.msk [vmem:[#allocation0] sm:$0x1] %vm19_vm2, %v18_v7  }
  0x82   :  { %26 = vst.msk [vmem:[#allocation0] sm:$0x1] %vm25_vm3, %v24_v6  }
  0x89   :  { %v30_v8 = vld [vmem:[#allocation0] sm:$0x1] }
  0x8a   :  { %32 = vst [vmem:[%s56_s1] sm:$0x1] %v30_v8 }

// kernel: decoder_forward.9
= control target key start
LH: loop header
LB: loop body
LE: loop exit
PB: predicated region body
PF: predicated region fallthrough
CT: control target
= control target key end

     0   :  { %s1268_s12 = smov 0   ;;  %s1472_s0 = inlined_call_operand.vmem [shape: bf16[512,144], index: 0, kind: input, shape index: {}]   ;;  %s1473_s1 = inlined_call_operand.vmem [shape: bf16[144,12], index: 1, kind: input, shape index: {}]   ;;  %s1474_s2 = inlined_call_operand.vmem [shape: f32[1,12], index: 2, kind: input, shape index: {}]   ;;  %s1475_s3 = inlined_call_operand.vmem [shape: f32[512,12], index: 3, kind: output, shape index: {}]  }
   0x1 LB: > { %s924_s13 = sadd.s32 4294967295, %s1245_s12   ;;  %p928_p0 = scmp.ge.s32.totalorder %s1245_s12, 1  ;;  %s1245_s12 = sphi %s1268_s12, %s13_s12  }
   0x2   : > { %p139_p1 = scmp.lt.s32.totalorder %s1245_s12, 3 }
   0x4   : > { %p140_p2 = pnand %p928_p0, %p139_p1 }
   0x5   : > { %v1054_v0 = vld [vmem:[%s1473_s1] sm:$0xff] (!%p140_p2)   ;;  %v1247_v1 = vmov (!%p140_p2), 0   ;;  %s929_s16 = sshll.u32 (!%p140_p2), %s924_s13, 5  ;;  %v1055_v2 = vld [vmem:[%s1473_s1 + $0x8] sm:$0xff] (!%p140_p2)   ;;  %v1056_v3 = vld [vmem:[%s1473_s1 + $0x10] sm:$0xff] (!%p140_p2)   ;;  %vm433_vm0 = vcmask (!%p140_p2), 130048  }
   0x6   : > { %143 = sbr.rel (%p140_p2) target bundleno = 347 (0x15b), region = 32  ;;  %482 = vmatprep.subr.bf16.mxu0 (!%p140_p2), %v1247_v1  ;;  %1027 = vmatprep.subr.bf16.mxu1 (!%p140_p2), %v1247_v1  ;;  %p165_p3 = scmp.lt.s32.totalorder (!%p140_p2), %s929_s16, 63  ;;  %v1057_v4 = vld [vmem:[%s1473_s1 + $0x18] sm:$0xff] (!%p140_p2)   ;;  %v1058_v7 = vld [vmem:[%s1473_s1 + $0x20] sm:$0xff] (!%p140_p2)   ;;  %v1059_v8 = vld [vmem:[%s1473_s1 + $0x28] sm:$0xff] (!%p140_p2)   ;;  %vm835_vm1 = vcmask (!%p140_p2), 97280  }
   0x7   : > { %483 = vmatpush1.bf16.msra.mxu0 (!%p140_p2), %v1054_v0  ;;  %1036 = vmatpush1.bf16.msra.mxu1 (!%p140_p2), %v1054_v0  ;;  %v1060_v9 = vld [vmem:[%s1473_s1 + $0x30] sm:$0xff] (!%p140_p2)   ;;  %v1061_v10 = vld [vmem:[%s1473_s1 + $0x38] sm:$0xff] (!%p140_p2)   ;;  %v1062_v11 = vld [vmem:[%s1473_s1 + $0x40] sm:$0xff] (!%p140_p2)  }
   0x8   : > { %484 = vmatprep.subr.bf16.mxu0 (!%p140_p2), %v1247_v1  ;;  %1028 = vmatprep.subr.bf16.mxu1 (!%p140_p2), %v1247_v1  ;;  %v1364_v42 = vld [vmem:[%s1474_s2] ss:$0 sm:$0xff] (!%p140_p2) }
   0xb   : > { %485 = vmatpush1.bf16.msra.mxu0 (!%p140_p2), %v1055_v2  ;;  %1037 = vmatpush1.bf16.msra.mxu1 (!%p140_p2), %v1055_v2 }
   0xc   : > { %486 = vmatprep.subr.bf16.mxu0 (!%p140_p2), %v1247_v1  ;;  %1029 = vmatprep.subr.bf16.mxu1 (!%p140_p2), %v1247_v1 }
   0xd   : > { %s1477_s16 = smov (!%p165_p3, %s929_s16), 63 }
   0xe   : > { %s1026_s21 = sshll.u32 %s1477_s16, 3 }
   0xf   : > { %s1293_s24 = scalar_lea.vmem %s1472_s0, %s1026_s21  ;;  %487 = vmatpush1.bf16.msra.mxu0 %v1056_v3  ;;  %1038 = vmatpush1.bf16.msra.mxu1 %v1056_v3  ;;  %s1385_s15 = scalar_lea.vmem %s1475_s3, %s1026_s21 }
  0x10   : > { %v1065_v5 = vld [vmem:[%s1293_s24 + $0x4] ss:$8 sps:$4 sm:$0xff]   ;;  %488 = vmatprep.subr.bf16.mxu0 %v1247_v1  ;;  %1030 = vmatprep.subr.bf16.mxu1 %v1247_v1  ;;  %v1063_v12 = vld [vmem:[%s1293_s24] ss:$8 sps:$4 sm:$0xff]   ;;  %v1069_v14 = vld [vmem:[%s1293_s24 + $0x14] ss:$8 sps:$4 sm:$0xff]  }
  0x11   : > { %v1068_v6 = vld [vmem:[%s1293_s24 + $0x84] ss:$8 sps:$4 sm:$0xff]   ;;  %976 = vmatprep.mubr.msk.bf16.mxu0 %vm433_vm0, %v1065_v5  ;;  %v1066_v13 = vld [vmem:[%s1293_s24 + $0x80] ss:$8 sps:$4 sm:$0xff]   ;;  %v1071_v15 = vld [vmem:[%s1293_s24 + $0x94] ss:$8 sps:$4 sm:$0xff]  }
  0x12   : > { %984 = vmatprep.mubr.msk.bf16.mxu1 %vm433_vm0, %v1068_v6  ;;  %v1073_v16 = vld [vmem:[%s1293_s24 + $0x10] ss:$8 sps:$4 sm:$0xff]   ;;  %v1075_v18 = vld [vmem:[%s1293_s24 + $0x24] ss:$8 sps:$4 sm:$0xff]   ;;  %v1079_v20 = vld [vmem:[%s1293_s24 + $0x20] ss:$8 sps:$4 sm:$0xff]  }
  0x13   : > { %489 = vmatpush1.bf16.msra.mxu0 %v1057_v4  ;;  %1039 = vmatpush1.bf16.msra.mxu1 %v1057_v4  ;;  %v1074_v17 = vld [vmem:[%s1293_s24 + $0x90] ss:$8 sps:$4 sm:$0xff]   ;;  %v1077_v19 = vld [vmem:[%s1293_s24 + $0xa4] ss:$8 sps:$4 sm:$0xff]   ;;  %v1080_v21 = vld [vmem:[%s1293_s24 + $0xa0] ss:$8 sps:$4 sm:$0xff]  }
  0x14   : > { %490 = vmatprep.subr.bf16.mxu0 %v1247_v1  ;;  %1031 = vmatprep.subr.bf16.mxu1 %v1247_v1  ;;  %v1081_v22 = vld [vmem:[%s1293_s24 + $0x34] ss:$8 sps:$4 sm:$0xff]   ;;  %v1085_v24 = vld [vmem:[%s1293_s24 + $0x30] ss:$8 sps:$4 sm:$0xff]   ;;  %v1087_v26 = vld [vmem:[%s1293_s24 + $0x44] ss:$8 sps:$4 sm:$0xff]  }
  0x15   : > { %v1083_v23 = vld [vmem:[%s1293_s24 + $0xb4] ss:$8 sps:$4 sm:$0xff]   ;;  %v1086_v25 = vld [vmem:[%s1293_s24 + $0xb0] ss:$8 sps:$4 sm:$0xff]   ;;  %v1089_v27 = vld [vmem:[%s1293_s24 + $0xc4] ss:$8 sps:$4 sm:$0xff]  }
  0x16   : > { %v1091_v28 = vld [vmem:[%s1293_s24 + $0x40] ss:$8 sps:$4 sm:$0xff]   ;;  %v1093_v30 = vld [vmem:[%s1293_s24 + $0x54] ss:$8 sps:$4 sm:$0xff]   ;;  %v1097_v32 = vld [vmem:[%s1293_s24 + $0x50] ss:$8 sps:$4 sm:$0xff]  }
  0x17   : > { %491 = vmatpush1.bf16.msra.mxu0 %v1058_v7  ;;  %1040 = vmatpush1.bf16.msra.mxu1 %v1058_v7  ;;  %v1092_v29 = vld [vmem:[%s1293_s24 + $0xc0] ss:$8 sps:$4 sm:$0xff]   ;;  %v1095_v31 = vld [vmem:[%s1293_s24 + $0xd4] ss:$8 sps:$4 sm:$0xff]   ;;  %v1098_v33 = vld [vmem:[%s1293_s24 + $0xd0] ss:$8 sps:$4 sm:$0xff]  }
  0x18   : > { %492 = vmatprep.subr.bf16.mxu0 %v1247_v1  ;;  %1032 = vmatprep.subr.bf16.mxu1 %v1247_v1  ;;  %v1099_v34 = vld [vmem:[%s1293_s24 + $0x64] ss:$8 sps:$4 sm:$0xff]   ;;  %v1103_v36 = vld [vmem:[%s1293_s24 + $0x60] ss:$8 sps:$4 sm:$0xff]   ;;  %v1105_v38 = vld [vmem:[%s1293_s24 + $0x74] ss:$8 sps:$4 sm:$0xff]  }
  0x19   : > { %v1101_v35 = vld [vmem:[%s1293_s24 + $0xe4] ss:$8 sps:$4 sm:$0xff]   ;;  %v1104_v37 = vld [vmem:[%s1293_s24 + $0xe0] ss:$8 sps:$4 sm:$0xff]   ;;  %v1107_v39 = vld [vmem:[%s1293_s24 + $0xf4] ss:$8 sps:$4 sm:$0xff]  }
  0x1a   : > { %v1109_v40 = vld [vmem:[%s1293_s24 + $0x70] ss:$8 sps:$4 sm:$0xff]  }
  0x1b   : > { %493 = vmatpush1.bf16.msra.mxu0 %v1059_v8  ;;  %1041 = vmatpush1.bf16.msra.mxu1 %v1059_v8  ;;  %v1110_v41 = vld [vmem:[%s1293_s24 + $0xf0] ss:$8 sps:$4 sm:$0xff]  }
  0x1c   : > { %494 = vmatprep.subr.bf16.mxu0 %v1247_v1  ;;  %1033 = vmatprep.subr.bf16.mxu1 %v1247_v1 }
  0x1f   : > { %495 = vmatpush1.bf16.msra.mxu0 %v1060_v9  ;;  %1042 = vmatpush1.bf16.msra.mxu1 %v1060_v9 }
  0x20   : > { %496 = vmatprep.subr.bf16.mxu0 %v1247_v1  ;;  %1034 = vmatprep.subr.bf16.mxu1 %v1247_v1 }
  0x23   : > { %497 = vmatpush1.bf16.msra.mxu0 %v1061_v10  ;;  %1043 = vmatpush1.bf16.msra.mxu1 %v1061_v10 }
  0x24   : > { %498 = vmatprep.subr.bf16.mxu0 %v1247_v1  ;;  %1035 = vmatprep.subr.bf16.mxu1 %v1247_v1 }
  0x27   : > { %499 = vmatpush1.bf16.msra.mxu0 %v1062_v11  ;;  %1044 = vmatpush1.bf16.msra.mxu1 %v1062_v11 }
  0x2a   : > { %515 = vmatmul.mubr.bf16.vlgmr.msra.gmra.mrb[0].mxu0 %v1063_v12  ;;  %579 = vmatmul.mubr.bf16.vlgmr.msra.gmra.mrb[0].mxu1 %v1066_v13 }
  0x2b   : > { %977 = vmatprep.mubr.msk.bf16.mxu0 %vm433_vm0, %v1069_v14  ;;  %985 = vmatprep.mubr.msk.bf16.mxu1 %vm433_vm0, %v1071_v15 }
  0x32   : > { %523 = vmatmul.mubr.bf16.gmra.mrb[4].mxu0 %v1073_v16  ;;  %587 = vmatmul.mubr.bf16.gmra.mrb[4].mxu1 %v1074_v17 }
  0x33   : > { %978 = vmatprep.mubr.msk.bf16.mxu0 %vm433_vm0, %v1075_v18  ;;  %986 = vmatprep.mubr.msk.bf16.mxu1 %vm433_vm0, %v1077_v19 }
  0x3a   : > { %531 = vmatmul.mubr.bf16.gmra.mrb[8].mxu0 %v1079_v20  ;;  %595 = vmatmul.mubr.bf16.gmra.mrb[8].mxu1 %v1080_v21 }
  0x3b   : > { %979 = vmatprep.mubr.msk.bf16.mxu0 %vm433_vm0, %v1081_v22  ;;  %987 = vmatprep.mubr.msk.bf16.mxu1 %vm433_vm0, %v1083_v23 }
  0x42   : > { %539 = vmatmul.mubr.bf16.gmra.mrb[12].mxu0 %v1085_v24  ;;  %603 = vmatmul.mubr.bf16.gmra.mrb[12].mxu1 %v1086_v25 }
  0x43   : > { %980 = vmatprep.mubr.msk.bf16.mxu0 %vm433_vm0, %v1087_v26  ;;  %988 = vmatprep.mubr.msk.bf16.mxu1 %vm433_vm0, %v1089_v27 }
  0x4a   : > { %547 = vmatmul.mubr.bf16.gmra.mrb[16].mxu0 %v1091_v28  ;;  %611 = vmatmul.mubr.bf16.gmra.mrb[16].mxu1 %v1092_v29 }
  0x4b   : > { %981 = vmatprep.mubr.msk.bf16.mxu0 %vm433_vm0, %v1093_v30  ;;  %989 = vmatprep.mubr.msk.bf16.mxu1 %vm433_vm0, %v1095_v31 }
  0x52   : > { %555 = vmatmul.mubr.bf16.gmra.mrb[20].mxu0 %v1097_v32  ;;  %619 = vmatmul.mubr.bf16.gmra.mrb[20].mxu1 %v1098_v33 }
  0x53   : > { %982 = vmatprep.mubr.msk.bf16.mxu0 %vm433_vm0, %v1099_v34  ;;  %990 = vmatprep.mubr.msk.bf16.mxu1 %vm433_vm0, %v1101_v35 }
  0x5a   : > { %563 = vmatmul.mubr.bf16.gmra.mrb[24].mxu0 %v1103_v36  ;;  %627 = vmatmul.mubr.bf16.gmra.mrb[24].mxu1 %v1104_v37 }
  0x5b   : > { %983 = vmatprep.mubr.msk.bf16.mxu0 %vm433_vm0, %v1105_v38  ;;  %991 = vmatprep.mubr.msk.bf16.mxu1 %vm433_vm0, %v1107_v39 }
  0x62   : > { %571 = vmatmul.mubr.bf16.gmra.mrb[28].mxu0 %v1109_v40  ;;  %635 = vmatmul.mubr.bf16.gmra.mrb[28].mxu1 %v1110_v41 }
  0xfd   : > { %v516_v43 = vpop.f32.mrb[0].mxu0  ;;  %v580_v44 = vpop.f32.mrb[0].mxu1 }
  0xfe   : > { %v517_v45 = vadd.f32 %v1364_v42, %v516_v43  ;;  %v581_v46 = vadd.f32 %v1364_v42, %v580_v44  ;;  %v518_v47 = vpop.f32.mrb[1].mxu0  ;;  %v582_v48 = vpop.f32.mrb[1].mxu1 }
  0xff   : > { %v519_v49 = vpop.f32.mrb[2].mxu0  ;;  %v583_v50 = vpop.f32.mrb[2].mxu1 }
 0x100   : > { %v992_v51 = vmul.f32 -1.442695, %v517_v45  ;;  %v1008_v52 = vmul.f32 -1.442695, %v581_v46  ;;  %v520_v53 = vadd.f32 %v1364_v42, %v519_v49  ;;  %v584_v54 = vadd.f32 %v1364_v42, %v583_v50  ;;  %v521_v55 = vpop.f32.mrb[3].mxu0  ;;  %v585_v56 = vpop.f32.mrb[3].mxu1 }
 0x102   : > { %1111 = vpow2.f32 %v992_v51  ;;  %v993_v57 = vmul.f32 -1.442695, %v520_v53  ;;  %v1009_v58 = vmul.f32 -1.442695, %v584_v54 }
 0x103   : > { %1113 = vpow2.f32 %v1008_v52 }
 0x104   : > { %1115 = vpow2.f32 %v993_v57 }
 0x105   : > { %1117 = vpow2.f32 %v1009_v58  ;;  %v524_v59 = vpop.f32.mrb[4].mxu0  ;;  %v588_v60 = vpop.f32.mrb[4].mxu1 }
 0x106   : > { %v525_v61 = vadd.f32 %v1364_v42, %v524_v59  ;;  %v589_v62 = vadd.f32 %v1364_v42, %v588_v60  ;;  %v526_v63 = vpop.f32.mrb[5].mxu0  ;;  %v590_v0 = vpop.f32.mrb[5].mxu1 }
 0x107   : > { %v527_v1 = vpop.f32.mrb[6].mxu0  ;;  %v591_v2 = vpop.f32.mrb[6].mxu1 }
 0x108   : > { %v994_v3 = vmul.f32 -1.442695, %v525_v61  ;;  %v1010_v4 = vmul.f32 -1.442695, %v589_v62  ;;  %v528_v5 = vadd.f32 %v1364_v42, %v527_v1  ;;  %v592_v6 = vadd.f32 %v1364_v42, %v591_v2  ;;  %v529_v7 = vpop.f32.mrb[7].mxu0  ;;  %v593_v8 = vpop.f32.mrb[7].mxu1 }
 0x10a   : > { %1119 = vpow2.f32 %v994_v3  ;;  %v995_v9 = vmul.f32 -1.442695, %v528_v5  ;;  %v1011_v10 = vmul.f32 -1.442695, %v592_v6 }
 0x10b   : > { %1121 = vpow2.f32 %v1010_v4 }
 0x10c   : > { %v1112_v11 = vpop.eup %1111  ;;  %1123 = vpow2.f32 %v995_v9 }
 0x10d   : > { %v1114_v12 = vpop.eup %1113  ;;  %v739_v13 = vadd.f32 1.0, %v1112_v11  ;;  %1125 = vpow2.f32 %v1011_v10  ;;  %v532_v14 = vpop.f32.mrb[8].mxu0 }
 0x10e   : > { %v596_v15 = vpop.f32.mrb[8].mxu1  ;;  %v1116_v16 = vpop.eup %1115  ;;  %v755_v17 = vadd.f32 1.0, %v1114_v12  ;;  %v533_v18 = vadd.f32 %v1364_v42, %v532_v14 }
 0x10f   : > { %v597_v19 = vadd.f32 %v1364_v42, %v596_v15  ;;  %v534_v20 = vpop.f32.mrb[9].mxu0  ;;  %v598_v21 = vpop.f32.mrb[9].mxu1  ;;  %1127 = vrcp.f32 %v739_v13  ;;  %v740_v23 = vadd.f32 1.0, %v1116_v16 }
 0x110   : > { %v1118_v22 = vpop.eup %1117  ;;  %v535_v24 = vpop.f32.mrb[10].mxu0  ;;  %1129 = vrcp.f32 %v755_v17  ;;  %v996_v27 = vmul.f32 -1.442695, %v533_v18 }
 0x111   : > { %v599_v25 = vpop.f32.mrb[10].mxu1  ;;  %v756_v26 = vadd.f32 1.0, %v1118_v22  ;;  %v1012_v28 = vmul.f32 -1.442695, %v597_v19  ;;  %v537_v29 = vpop.f32.mrb[11].mxu0  ;;  %1131 = vrcp.f32 %v740_v23  ;;  %v536_v30 = vadd.f32 %v1364_v42, %v535_v24 }
 0x112   : > { %v600_v31 = vadd.f32 %v1364_v42, %v599_v25  ;;  %v601_v32 = vpop.f32.mrb[11].mxu1 }
 0x113   : > { %1133 = vrcp.f32 %v756_v26  ;;  %v997_v33 = vmul.f32 -1.442695, %v536_v30 }
 0x114   : > { %1135 = vpow2.f32 %v996_v27  ;;  %v1013_v34 = vmul.f32 -1.442695, %v600_v31  ;;  %v1120_v35 = vpop.eup %1119 }
 0x115   : > { %1137 = vpow2.f32 %v1012_v28  ;;  %v1122_v36 = vpop.eup %1121  ;;  %v741_v37 = vadd.f32 1.0, %v1120_v35  ;;  %v540_v38 = vpop.f32.mrb[12].mxu0 }
 0x116   : > { %1139 = vpow2.f32 %v997_v33  ;;  %v604_v39 = vpop.f32.mrb[12].mxu1  ;;  %v1124_v40 = vpop.eup %1123  ;;  %v757_v41 = vadd.f32 1.0, %v1122_v36  ;;  %v541_v43 = vadd.f32 %v1364_v42, %v540_v38 }
 0x117   : > { %1141 = vpow2.f32 %v1013_v34  ;;  %v605_v44 = vadd.f32 %v1364_v42, %v604_v39  ;;  %v542_v45 = vpop.f32.mrb[13].mxu0  ;;  %v606_v46 = vpop.f32.mrb[13].mxu1  ;;  %v742_v48 = vadd.f32 1.0, %v1124_v40 }
 0x118   : > { %v1126_v47 = vpop.eup %1125  ;;  %1143 = vrcp.f32 %v741_v37  ;;  %v543_v49 = vpop.f32.mrb[14].mxu0  ;;  %v998_v52 = vmul.f32 -1.442695, %v541_v43 }
 0x119   : > { %v607_v50 = vpop.f32.mrb[14].mxu1  ;;  %1145 = vrcp.f32 %v757_v41  ;;  %v758_v51 = vadd.f32 1.0, %v1126_v47  ;;  %v1014_v53 = vmul.f32 -1.442695, %v605_v44  ;;  %v545_v54 = vpop.f32.mrb[15].mxu0  ;;  %v544_v56 = vadd.f32 %v1364_v42, %v543_v49 }
 0x11a   : > { %v1128_v55 = vpop.eup %1127  ;;  %1147 = vrcp.f32 %v742_v48  ;;  %v608_v57 = vadd.f32 %v1364_v42, %v607_v50  ;;  %v609_v58 = vpop.f32.mrb[15].mxu1 }
 0x11b   : > { %v1130_v59 = vpop.eup %1129  ;;  %836 = vst.msk [vmem:[%s1385_s15] sm:$0xff] %vm835_vm1, %v1128_v55  ;;  %1149 = vrcp.f32 %v758_v51  ;;  %v999_v61 = vmul.f32 -1.442695, %v544_v56 }
 0x11c   : > { %v1132_v60 = vpop.eup %1131  ;;  %852 = vst.msk [vmem:[%s1385_s15 + $0x80] sm:$0xff] %vm835_vm1, %v1130_v59  ;;  %1151 = vpow2.f32 %v998_v52  ;;  %v1015_v62 = vmul.f32 -1.442695, %v608_v57 }
 0x11d   : > { %v1134_v63 = vpop.eup %1133  ;;  %837 = vst.msk [vmem:[%s1385_s15 + $0x8] sm:$0xff] %vm835_vm1, %v1132_v60  ;;  %1153 = vpow2.f32 %v1014_v53  ;;  %v548_v1 = vpop.f32.mrb[16].mxu0 }
 0x11e   : > { %v1136_v0 = vpop.eup %1135  ;;  %853 = vst.msk [vmem:[%s1385_s15 + $0x88] sm:$0xff] %vm835_vm1, %v1134_v63  ;;  %1155 = vpow2.f32 %v999_v61  ;;  %v612_v2 = vpop.f32.mrb[16].mxu1  ;;  %v549_v5 = vadd.f32 %v1364_v42, %v548_v1 }
 0x11f   : > { %v1138_v3 = vpop.eup %1137  ;;  %v743_v4 = vadd.f32 1.0, %v1136_v0  ;;  %1157 = vpow2.f32 %v1015_v62  ;;  %v613_v6 = vadd.f32 %v1364_v42, %v612_v2  ;;  %v550_v7 = vpop.f32.mrb[17].mxu0 }
 0x120   : > { %v614_v8 = vpop.f32.mrb[17].mxu1  ;;  %v1140_v9 = vpop.eup %1139  ;;  %v759_v10 = vadd.f32 1.0, %v1138_v3  ;;  %v1000_v15 = vmul.f32 -1.442695, %v549_v5 }
 0x121   : > { %v551_v11 = vpop.f32.mrb[18].mxu0  ;;  %v615_v12 = vpop.f32.mrb[18].mxu1  ;;  %1159 = vrcp.f32 %v743_v4  ;;  %v744_v14 = vadd.f32 1.0, %v1140_v9  ;;  %v1016_v16 = vmul.f32 -1.442695, %v613_v6 }
 0x122   : > { %v1142_v13 = vpop.eup %1141  ;;  %v553_v17 = vpop.f32.mrb[19].mxu0  ;;  %1161 = vrcp.f32 %v759_v10  ;;  %v552_v20 = vadd.f32 %v1364_v42, %v551_v11  ;;  %v616_v21 = vadd.f32 %v1364_v42, %v615_v12 }
 0x123   : > { %v1144_v18 = vpop.eup %1143  ;;  %v760_v19 = vadd.f32 1.0, %v1142_v13  ;;  %v617_v22 = vpop.f32.mrb[19].mxu1  ;;  %1163 = vrcp.f32 %v744_v14 }
 0x124   : > { %v1146_v23 = vpop.eup %1145  ;;  %838 = vst.msk [vmem:[%s1385_s15 + $0x10] sm:$0xff] %vm835_vm1, %v1144_v18  ;;  %v1001_v25 = vmul.f32 -1.442695, %v552_v20  ;;  %v1017_v26 = vmul.f32 -1.442695, %v616_v21 }
 0x125   : > { %v1148_v24 = vpop.eup %1147  ;;  %854 = vst.msk [vmem:[%s1385_s15 + $0x90] sm:$0xff] %vm835_vm1, %v1146_v23  ;;  %1165 = vrcp.f32 %v760_v19  ;;  %v556_v29 = vpop.f32.mrb[20].mxu0 }
 0x126   : > { %v1150_v27 = vpop.eup %1149  ;;  %839 = vst.msk [vmem:[%s1385_s15 + $0x18] sm:$0xff] %vm835_vm1, %v1148_v24  ;;  %1167 = vpow2.f32 %v1000_v15  ;;  %v620_v30 = vpop.f32.mrb[20].mxu1  ;;  %v557_v33 = vadd.f32 %v1364_v42, %v556_v29 }
 0x127   : > { %v1152_v28 = vpop.eup %1151  ;;  %855 = vst.msk [vmem:[%s1385_s15 + $0x98] sm:$0xff] %vm835_vm1, %v1150_v27  ;;  %1169 = vpow2.f32 %v1016_v16  ;;  %v621_v34 = vadd.f32 %v1364_v42, %v620_v30  ;;  %v558_v35 = vpop.f32.mrb[21].mxu0 }
 0x128   : > { %v1154_v31 = vpop.eup %1153  ;;  %v745_v32 = vadd.f32 1.0, %v1152_v28  ;;  %1171 = vpow2.f32 %v1001_v25  ;;  %v622_v36 = vpop.f32.mrb[21].mxu1  ;;  %v1002_v44 = vmul.f32 -1.442695, %v557_v33 }
 0x129   : > { %v1156_v37 = vpop.eup %1155  ;;  %v761_v38 = vadd.f32 1.0, %v1154_v31  ;;  %1173 = vpow2.f32 %v1017_v26  ;;  %v559_v39 = vpop.f32.mrb[22].mxu0  ;;  %v1018_v45 = vmul.f32 -1.442695, %v621_v34 }
 0x12a   : > { %v623_v40 = vpop.f32.mrb[22].mxu1  ;;  %v1158_v41 = vpop.eup %1157  ;;  %1175 = vrcp.f32 %v745_v32  ;;  %v746_v43 = vadd.f32 1.0, %v1156_v37  ;;  %v560_v48 = vadd.f32 %v1364_v42, %v559_v39 }
 0x12b   : > { %v561_v46 = vpop.f32.mrb[23].mxu0  ;;  %1177 = vrcp.f32 %v761_v38  ;;  %v762_v47 = vadd.f32 1.0, %v1158_v41  ;;  %v624_v49 = vadd.f32 %v1364_v42, %v623_v40  ;;  %v625_v50 = vpop.f32.mrb[23].mxu1 }
 0x12c   : > { %v1160_v51 = vpop.eup %1159  ;;  %1179 = vrcp.f32 %v746_v43  ;;  %v1003_v53 = vmul.f32 -1.442695, %v560_v48 }
 0x12d   : > { %v1162_v52 = vpop.eup %1161  ;;  %840 = vst.msk [vmem:[%s1385_s15 + $0x20] sm:$0xff] %vm835_vm1, %v1160_v51  ;;  %1181 = vrcp.f32 %v762_v47  ;;  %v1019_v54 = vmul.f32 -1.442695, %v624_v49  ;;  %v564_v57 = vpop.f32.mrb[24].mxu0 }
 0x12e   : > { %v1164_v55 = vpop.eup %1163  ;;  %856 = vst.msk [vmem:[%s1385_s15 + $0xa0] sm:$0xff] %vm835_vm1, %v1162_v52  ;;  %1183 = vpow2.f32 %v1002_v44  ;;  %v628_v58 = vpop.f32.mrb[24].mxu1  ;;  %v565_v60 = vadd.f32 %v1364_v42, %v564_v57 }
 0x12f   : > { %v1166_v56 = vpop.eup %1165  ;;  %841 = vst.msk [vmem:[%s1385_s15 + $0x28] sm:$0xff] %vm835_vm1, %v1164_v55  ;;  %1185 = vpow2.f32 %v1018_v45  ;;  %v629_v61 = vadd.f32 %v1364_v42, %v628_v58  ;;  %v566_v62 = vpop.f32.mrb[25].mxu0 }
 0x130   : > { %v1168_v59 = vpop.eup %1167  ;;  %857 = vst.msk [vmem:[%s1385_s15 + $0xa8] sm:$0xff] %vm835_vm1, %v1166_v56  ;;  %1187 = vpow2.f32 %v1003_v53  ;;  %v630_v63 = vpop.f32.mrb[25].mxu1  ;;  %v1004_v10 = vmul.f32 -1.442695, %v565_v60 }
 0x131   : > { %v1170_v0 = vpop.eup %1169  ;;  %v747_v1 = vadd.f32 1.0, %v1168_v59  ;;  %1189 = vpow2.f32 %v1019_v54  ;;  %v567_v2 = vpop.f32.mrb[26].mxu0  ;;  %v1020_v15 = vmul.f32 -1.442695, %v629_v61 }
 0x132   : > { %v631_v3 = vpop.f32.mrb[26].mxu1  ;;  %v1172_v4 = vpop.eup %1171  ;;  %v763_v5 = vadd.f32 1.0, %v1170_v0  ;;  %v568_v6 = vadd.f32 %v1364_v42, %v567_v2 }
 0x133   : > { %v569_v7 = vpop.f32.mrb[27].mxu0  ;;  %v1174_v8 = vpop.eup %1173  ;;  %1191 = vrcp.f32 %v747_v1  ;;  %v748_v9 = vadd.f32 1.0, %v1172_v4  ;;  %v632_v11 = vadd.f32 %v1364_v42, %v631_v3 }
 0x134   : > { %v633_v12 = vpop.f32.mrb[27].mxu1  ;;  %v1176_v13 = vpop.eup %1175  ;;  %1193 = vrcp.f32 %v763_v5  ;;  %v764_v14 = vadd.f32 1.0, %v1174_v8  ;;  %v1005_v17 = vmul.f32 -1.442695, %v568_v6 }
 0x135   : > { %v1178_v16 = vpop.eup %1177  ;;  %842 = vst.msk [vmem:[%s1385_s15 + $0x30] sm:$0xff] %vm835_vm1, %v1176_v13  ;;  %1195 = vrcp.f32 %v748_v9  ;;  %v1021_v19 = vmul.f32 -1.442695, %v632_v11  ;;  %v572_v21 = vpop.f32.mrb[28].mxu0 }
 0x136   : > { %v1180_v18 = vpop.eup %1179  ;;  %858 = vst.msk [vmem:[%s1385_s15 + $0xb0] sm:$0xff] %vm835_vm1, %v1178_v16  ;;  %1197 = vrcp.f32 %v764_v14  ;;  %v636_v22 = vpop.f32.mrb[28].mxu1  ;;  %v573_v24 = vadd.f32 %v1364_v42, %v572_v21 }
 0x137   : > { %v1182_v20 = vpop.eup %1181  ;;  %843 = vst.msk [vmem:[%s1385_s15 + $0x38] sm:$0xff] %vm835_vm1, %v1180_v18  ;;  %1199 = vpow2.f32 %v1004_v10  ;;  %v637_v25 = vadd.f32 %v1364_v42, %v636_v22  ;;  %v574_v26 = vpop.f32.mrb[29].mxu0 }
 0x138   : > { %v1184_v23 = vpop.eup %1183  ;;  %859 = vst.msk [vmem:[%s1385_s15 + $0xb8] sm:$0xff] %vm835_vm1, %v1182_v20  ;;  %1201 = vpow2.f32 %v1020_v15  ;;  %v638_v27 = vpop.f32.mrb[29].mxu1  ;;  %v1006_v34 = vmul.f32 -1.442695, %v573_v24 }
 0x139   : > { %v1186_v28 = vpop.eup %1185  ;;  %v749_v29 = vadd.f32 1.0, %v1184_v23  ;;  %1203 = vpow2.f32 %v1005_v17  ;;  %v575_v30 = vpop.f32.mrb[30].mxu0  ;;  %v1022_v43 = vmul.f32 -1.442695, %v637_v25 }
 0x13a   : > { %v639_v31 = vpop.f32.mrb[30].mxu1  ;;  %v1188_v32 = vpop.eup %1187  ;;  %v765_v33 = vadd.f32 1.0, %v1186_v28  ;;  %1205 = vpow2.f32 %v1021_v19  ;;  %v576_v38 = vadd.f32 %v1364_v42, %v575_v30 }
 0x13b   : > { %v577_v35 = vpop.f32.mrb[31].mxu0  ;;  %v1190_v36 = vpop.eup %1189  ;;  %1207 = vrcp.f32 %v749_v29  ;;  %v750_v37 = vadd.f32 1.0, %v1188_v32  ;;  %v640_v39 = vadd.f32 %v1364_v42, %v639_v31 }
 0x13c   : > { %v641_v40 = vpop.f32.mrb[31].mxu1  ;;  %1209 = vrcp.f32 %v765_v33  ;;  %v766_v41 = vadd.f32 1.0, %v1190_v36  ;;  %v1007_v45 = vmul.f32 -1.442695, %v576_v38 }
 0x13d   : > { %v1192_v44 = vpop.eup %1191  ;;  %1211 = vrcp.f32 %v750_v37  ;;  %v1023_v47 = vmul.f32 -1.442695, %v640_v39 }
 0x13e   : > { %v1194_v46 = vpop.eup %1193  ;;  %844 = vst.msk [vmem:[%s1385_s15 + $0x40] sm:$0xff] %vm835_vm1, %v1192_v44  ;;  %1213 = vrcp.f32 %v766_v41 }
 0x13f   : > { %v1196_v48 = vpop.eup %1195  ;;  %860 = vst.msk [vmem:[%s1385_s15 + $0xc0] sm:$0xff] %vm835_vm1, %v1194_v46  ;;  %1215 = vpow2.f32 %v1006_v34 }
 0x140   : > { %v1198_v49 = vpop.eup %1197  ;;  %845 = vst.msk [vmem:[%s1385_s15 + $0x48] sm:$0xff] %vm835_vm1, %v1196_v48  ;;  %1217 = vpow2.f32 %v1022_v43 }
 0x141   : > { %v1200_v42 = vpop.eup %1199  ;;  %861 = vst.msk [vmem:[%s1385_s15 + $0xc8] sm:$0xff] %vm835_vm1, %v1198_v49  ;;  %1219 = vpow2.f32 %v1007_v45 }
 0x142   : > { %v1202_v50 = vpop.eup %1201  ;;  %v751_v51 = vadd.f32 1.0, %v1200_v42  ;;  %1221 = vpow2.f32 %v1023_v47 }
 0x143   : > { %v1204_v52 = vpop.eup %1203  ;;  %v767_v53 = vadd.f32 1.0, %v1202_v50 }
 0x144   : > { %v1206_v54 = vpop.eup %1205  ;;  %1223 = vrcp.f32 %v751_v51  ;;  %v752_v55 = vadd.f32 1.0, %v1204_v52 }
 0x145   : > { %v1208_v56 = vpop.eup %1207  ;;  %1225 = vrcp.f32 %v767_v53  ;;  %v768_v57 = vadd.f32 1.0, %v1206_v54 }
 0x146   : > { %v1210_v58 = vpop.eup %1209  ;;  %846 = vst.msk [vmem:[%s1385_s15 + $0x50] sm:$0xff] %vm835_vm1, %v1208_v56  ;;  %1227 = vrcp.f32 %v752_v55 }
 0x147   : > { %v1212_v59 = vpop.eup %1211  ;;  %862 = vst.msk [vmem:[%s1385_s15 + $0xd0] sm:$0xff] %vm835_vm1, %v1210_v58  ;;  %1229 = vrcp.f32 %v768_v57 }
 0x148   : > { %v1214_v60 = vpop.eup %1213  ;;  %847 = vst.msk [vmem:[%s1385_s15 + $0x58] sm:$0xff] %vm835_vm1, %v1212_v59 }
 0x149   : > { %v1216_v61 = vpop.eup %1215  ;;  %863 = vst.msk [vmem:[%s1385_s15 + $0xd8] sm:$0xff] %vm835_vm1, %v1214_v60 }
 0x14a   : > { %v1218_v62 = vpop.eup %1217  ;;  %v753_v63 = vadd.f32 1.0, %v1216_v61 }
 0x14b   : > { %v1220_v0 = vpop.eup %1219  ;;  %v769_v1 = vadd.f32 1.0, %v1218_v62 }
 0x14c   : > { %v1222_v2 = vpop.eup %1221  ;;  %1231 = vrcp.f32 %v753_v63  ;;  %v754_v3 = vadd.f32 1.0, %v1220_v0 }
 0x14d   : > { %1233 = vrcp.f32 %v769_v1  ;;  %v770_v4 = vadd.f32 1.0, %v1222_v2 }
 0x14e   : > { %v1224_v5 = vpop.eup %1223  ;;  %1235 = vrcp.f32 %v754_v3 }
 0x14f   : > { %v1226_v6 = vpop.eup %1225  ;;  %848 = vst.msk [vmem:[%s1385_s15 + $0x60] sm:$0xff] %vm835_vm1, %v1224_v5  ;;  %1237 = vrcp.f32 %v770_v4 }
 0x150   : > { %v1228_v7 = vpop.eup %1227  ;;  %864 = vst.msk [vmem:[%s1385_s15 + $0xe0] sm:$0xff] %vm835_vm1, %v1226_v6 }
 0x151   : > { %v1230_v8 = vpop.eup %1229  ;;  %849 = vst.msk [vmem:[%s1385_s15 + $0x68] sm:$0xff] %vm835_vm1, %v1228_v7 }
 0x152   : > { %865 = vst.msk [vmem:[%s1385_s15 + $0xe8] sm:$0xff] %vm835_vm1, %v1230_v8 }
 0x156   : > { %v1232_v9 = vpop.eup %1231 }
 0x157   : > { %v1234_v10 = vpop.eup %1233  ;;  %850 = vst.msk [vmem:[%s1385_s15 + $0x70] sm:$0xff] %vm835_vm1, %v1232_v9 }
 0x158   : > { %v1236_v11 = vpop.eup %1235  ;;  %866 = vst.msk [vmem:[%s1385_s15 + $0xf0] sm:$0xff] %vm835_vm1, %v1234_v10 }
 0x159   : > { %v1238_v12 = vpop.eup %1237  ;;  %851 = vst.msk [vmem:[%s1385_s15 + $0x78] sm:$0xff] %vm835_vm1, %v1236_v11 }
 0x15a   : > { %867 = vst.msk [vmem:[%s1385_s15 + $0xf8] sm:$0xff] %vm835_vm1, %v1238_v12 }
 0x15b PF: > { %s13_s12 = sadd.s32 1, %s1245_s12  }
 0x15c   : > { %p10_p4 = scmp.ge.s32.totalorder %s13_s12, 4  }
 0x15e   :  { %12 = sbr.rel (!%p10_p4) target bundleno = 1 (0x1), region = 62 }

// kernel: decoder_forward.10
= control target key start
LH: loop header
LB: loop body
LE: loop exit
PB: predicated region body
PF: predicated region fallthrough
CT: control target
= control target key end

     0   :  { %s1300_s12 = smov 0   ;;  %s1601_s0 = inlined_call_operand.vmem [shape: bf16[2048,75], index: 0, kind: input, shape index: {}]   ;;  %s1602_s1 = inlined_call_operand.vmem [shape: bf16[75,32], index: 1, kind: input, shape index: {}]   ;;  %s1603_s2 = inlined_call_operand.vmem [shape: f32[1,32], index: 2, kind: input, shape index: {}]   ;;  %s1604_s3 = inlined_call_operand.vmem [shape: f32[2048,32], index: 3, kind: output, shape index: {}]  }
   0x1 LB: > { %s1023_s13 = sadd.s32 4294967295, %s1277_s12   ;;  %p1027_p0 = scmp.ge.s32.totalorder %s1277_s12, 1  ;;  %s1277_s12 = sphi %s1300_s12, %s13_s12  }
   0x2   : > { %p138_p1 = scmp.lt.s32.totalorder %s1277_s12, 5 }
   0x4   : > { %p139_p2 = pnand %p1027_p0, %p138_p1 }
   0x5   : > { %v1234_v0 = vld [vmem:[%s1602_s1] sm:$0xff] (!%p139_p2)   ;;  %v1235_v1 = vld [vmem:[%s1602_s1 + $0x8] sm:$0xff] (!%p139_p2)   ;;  %vm542_vm0 = vcmask (!%p139_p2), 1044480   ;;  %v1236_v2 = vld [vmem:[%s1602_s1 + $0x10] sm:$0xff] (!%p139_p2)   ;;  %s1028_s20 = sshll.u32 (!%p139_p2), %s1023_s13, 6  ;;  %vm543_vm1 = vcmask (!%p139_p2), 1045504  }
   0x6   : > { %142 = sbr.rel (%p139_p2) target bundleno = 302 (0x12e), region = 32  ;;  %1141 = vmatprep.subr.bf16.mxu0 (!%p139_p2), %v1234_v0  ;;  %1215 = vmatprep.subr.bf16.mxu1 (!%p139_p2), %v1234_v0  ;;  %v1279_v3 = vmov (!%p139_p2), 65535   ;;  %p163_p3 = scmp.lt.s32.totalorder (!%p139_p2), %s1028_s20, 255  ;;  %v1237_v5 = vld [vmem:[%s1602_s1 + $0x18] sm:$0xff] (!%p139_p2)   ;;  %v1238_v6 = vld [vmem:[%s1602_s1 + $0x20] sm:$0x3f] (!%p139_p2)  }
   0x7   : > { %1142 = vmatpush3.bf16.msra.mxu0 (!%p139_p2), %v1234_v0  ;;  %1220 = vmatpush3.bf16.msra.mxu1 (!%p139_p2), %v1234_v0  ;;  %v544_v4 = vsel (!%p139_p2), %vm542_vm0, 4294967295, %v1279_v3  ;;  %vm445_vm2 = vcmask (!%p139_p2), 613376   ;;  %v1398_v41 = vld [vmem:[%s1603_s2] ss:$0 sm:$0xff] (!%p139_p2)  ;;  %vm902_vm3 = vcmask (!%p139_p2), 261120  }
   0x8   : > { %1143 = vmatprep.subr.bf16.mxu0 (!%p139_p2), %v1235_v1  ;;  %1216 = vmatprep.subr.bf16.mxu1 (!%p139_p2), %v1235_v1  ;;  %v545_v7 = vsel (!%p139_p2), %vm543_vm1, %v544_v4, 0 }
   0x9   : > { %v547_v8 = vand.u32 (!%p139_p2), %v1238_v6, %v545_v7 }
   0xb   : > { %1144 = vmatpush3.bf16.msra.mxu0 (!%p139_p2), %v1235_v1  ;;  %1221 = vmatpush3.bf16.msra.mxu1 (!%p139_p2), %v1235_v1 }
   0xc   : > { %1145 = vmatprep.subr.bf16.mxu0 (!%p139_p2), %v1236_v2  ;;  %1217 = vmatprep.subr.bf16.mxu1 (!%p139_p2), %v1236_v2 }
   0xd   : > { %s1606_s20 = smov (!%p163_p3, %s1028_s20), 255 }
   0xe   : > { %s1029_s25 = sshll.u32 %s1606_s20, 2  ;;  %s1031_s4 = sshll.u32 %s1606_s20, 3 }
   0xf   : > { %1146 = vmatpush3.bf16.msra.mxu0 %v1236_v2  ;;  %1222 = vmatpush3.bf16.msra.mxu1 %v1236_v2  ;;  %s1329_s28 = scalar_lea.vmem %s1601_s0, %s1029_s25  ;;  %s1406_s7 = scalar_lea.vmem %s1604_s3, %s1031_s4 }
  0x10   : > { %1147 = vmatprep.subr.bf16.mxu0 %v1237_v5  ;;  %1218 = vmatprep.subr.bf16.mxu1 %v1237_v5  ;;  %v1239_v9 = vld [vmem:[%s1329_s28] sm:$0xff]   ;;  %v1241_v11 = vld [vmem:[%s1329_s28 + $0x8] sm:$0xff]   ;;  %v1243_v13 = vld [vmem:[%s1329_s28 + $0x10] sm:$0xff]  }
  0x11   : > { %v1240_v10 = vld [vmem:[%s1329_s28 + $0x80] sm:$0xff]   ;;  %1151 = vmatprep.mubr.msk.bf16.mxu0 %vm445_vm2, %v1239_v9  ;;  %v1242_v12 = vld [vmem:[%s1329_s28 + $0x88] sm:$0xff]   ;;  %v1244_v14 = vld [vmem:[%s1329_s28 + $0x90] sm:$0xff]  }
  0x12   : > { %1183 = vmatprep.mubr.msk.bf16.mxu1 %vm445_vm2, %v1240_v10  ;;  %v1245_v15 = vld [vmem:[%s1329_s28 + $0x18] sm:$0xff]   ;;  %v1247_v17 = vld [vmem:[%s1329_s28 + $0x20] sm:$0xff]   ;;  %v1249_v19 = vld [vmem:[%s1329_s28 + $0x28] sm:$0xff]  }
  0x13   : > { %1148 = vmatpush3.bf16.msra.mxu0 %v1237_v5  ;;  %1223 = vmatpush3.bf16.msra.mxu1 %v1237_v5  ;;  %v1246_v16 = vld [vmem:[%s1329_s28 + $0x98] sm:$0xff]   ;;  %v1248_v18 = vld [vmem:[%s1329_s28 + $0xa0] sm:$0xff]   ;;  %v1250_v20 = vld [vmem:[%s1329_s28 + $0xa8] sm:$0xff]  }
  0x14   : > { %1149 = vmatprep.subr.bf16.mxu0 %v547_v8  ;;  %1219 = vmatprep.subr.bf16.mxu1 %v547_v8  ;;  %v1251_v21 = vld [vmem:[%s1329_s28 + $0x30] sm:$0xff]   ;;  %v1253_v23 = vld [vmem:[%s1329_s28 + $0x38] sm:$0xff]   ;;  %v1255_v25 = vld [vmem:[%s1329_s28 + $0x40] sm:$0xff]  }
  0x15   : > { %v1252_v22 = vld [vmem:[%s1329_s28 + $0xb0] sm:$0xff]   ;;  %v1254_v24 = vld [vmem:[%s1329_s28 + $0xb8] sm:$0xff]   ;;  %v1256_v26 = vld [vmem:[%s1329_s28 + $0xc0] sm:$0xff]  }
  0x16   : > { %v1257_v27 = vld [vmem:[%s1329_s28 + $0x48] sm:$0xff]   ;;  %v1259_v29 = vld [vmem:[%s1329_s28 + $0x50] sm:$0xff]   ;;  %v1261_v31 = vld [vmem:[%s1329_s28 + $0x58] sm:$0xff]  }
  0x17   : > { %1150 = vmatpush3.bf16.msra.mxu0 %v547_v8  ;;  %1224 = vmatpush3.bf16.msra.mxu1 %v547_v8  ;;  %v1258_v28 = vld [vmem:[%s1329_s28 + $0xc8] sm:$0xff]   ;;  %v1260_v30 = vld [vmem:[%s1329_s28 + $0xd0] sm:$0xff]   ;;  %v1262_v32 = vld [vmem:[%s1329_s28 + $0xd8] sm:$0xff]  }
  0x18   : > { %v1263_v33 = vld [vmem:[%s1329_s28 + $0x60] sm:$0xff]   ;;  %v1265_v35 = vld [vmem:[%s1329_s28 + $0x68] sm:$0xff]   ;;  %v1267_v37 = vld [vmem:[%s1329_s28 + $0x70] sm:$0xff]  }
  0x19   : > { %v1264_v34 = vld [vmem:[%s1329_s28 + $0xe0] sm:$0xff]   ;;  %v1266_v36 = vld [vmem:[%s1329_s28 + $0xe8] sm:$0xff]   ;;  %v1268_v38 = vld [vmem:[%s1329_s28 + $0xf0] sm:$0xff]  }
  0x1a   : > { %1152 = vmatmul.mubr.msk.bf16.vlgmr.msra.gmra.mrb[0].mxu0 %vm445_vm2, %v1241_v11  ;;  %1184 = vmatmul.mubr.msk.bf16.vlgmr.msra.gmra.mrb[0].mxu1 %vm445_vm2, %v1242_v12  ;;  %v1269_v39 = vld [vmem:[%s1329_s28 + $0x78] sm:$0xff]  }
  0x1b   : > { %1155 = vmatprep.mubr.msk.bf16.mxu0 %vm445_vm2, %v1243_v13  ;;  %1187 = vmatprep.mubr.msk.bf16.mxu1 %vm445_vm2, %v1244_v14  ;;  %v1270_v40 = vld [vmem:[%s1329_s28 + $0xf8] sm:$0xff]  }
  0x22   : > { %1156 = vmatmul.mubr.msk.bf16.gmra.mrb[4].mxu0 %vm445_vm2, %v1245_v15  ;;  %1188 = vmatmul.mubr.msk.bf16.gmra.mrb[4].mxu1 %vm445_vm2, %v1246_v16 }
  0x23   : > { %1159 = vmatprep.mubr.msk.bf16.mxu0 %vm445_vm2, %v1247_v17  ;;  %1191 = vmatprep.mubr.msk.bf16.mxu1 %vm445_vm2, %v1248_v18 }
  0x2a   : > { %1160 = vmatmul.mubr.msk.bf16.gmra.mrb[8].mxu0 %vm445_vm2, %v1249_v19  ;;  %1192 = vmatmul.mubr.msk.bf16.gmra.mrb[8].mxu1 %vm445_vm2, %v1250_v20 }
  0x2b   : > { %1163 = vmatprep.mubr.msk.bf16.mxu0 %vm445_vm2, %v1251_v21  ;;  %1195 = vmatprep.mubr.msk.bf16.mxu1 %vm445_vm2, %v1252_v22 }
  0x32   : > { %1164 = vmatmul.mubr.msk.bf16.gmra.mrb[12].mxu0 %vm445_vm2, %v1253_v23  ;;  %1196 = vmatmul.mubr.msk.bf16.gmra.mrb[12].mxu1 %vm445_vm2, %v1254_v24 }
  0x33   : > { %1167 = vmatprep.mubr.msk.bf16.mxu0 %vm445_vm2, %v1255_v25  ;;  %1199 = vmatprep.mubr.msk.bf16.mxu1 %vm445_vm2, %v1256_v26 }
  0x3a   : > { %1168 = vmatmul.mubr.msk.bf16.gmra.mrb[16].mxu0 %vm445_vm2, %v1257_v27  ;;  %1200 = vmatmul.mubr.msk.bf16.gmra.mrb[16].mxu1 %vm445_vm2, %v1258_v28 }
  0x3b   : > { %1171 = vmatprep.mubr.msk.bf16.mxu0 %vm445_vm2, %v1259_v29  ;;  %1203 = vmatprep.mubr.msk.bf16.mxu1 %vm445_vm2, %v1260_v30 }
  0x42   : > { %1172 = vmatmul.mubr.msk.bf16.gmra.mrb[20].mxu0 %vm445_vm2, %v1261_v31  ;;  %1204 = vmatmul.mubr.msk.bf16.gmra.mrb[20].mxu1 %vm445_vm2, %v1262_v32 }
  0x43   : > { %1175 = vmatprep.mubr.msk.bf16.mxu0 %vm445_vm2, %v1263_v33  ;;  %1207 = vmatprep.mubr.msk.bf16.mxu1 %vm445_vm2, %v1264_v34 }
  0x4a   : > { %1176 = vmatmul.mubr.msk.bf16.gmra.mrb[24].mxu0 %vm445_vm2, %v1265_v35  ;;  %1208 = vmatmul.mubr.msk.bf16.gmra.mrb[24].mxu1 %vm445_vm2, %v1266_v36 }
  0x4b   : > { %1179 = vmatprep.mubr.msk.bf16.mxu0 %vm445_vm2, %v1267_v37  ;;  %1211 = vmatprep.mubr.msk.bf16.mxu1 %vm445_vm2, %v1268_v38 }
  0x52   : > { %1180 = vmatmul.mubr.msk.bf16.gmra.mrb[28].mxu0 %vm445_vm2, %v1269_v39  ;;  %1212 = vmatmul.mubr.msk.bf16.gmra.mrb[28].mxu1 %vm445_vm2, %v1270_v40 }
  0xed   : > { %v1153_v42 = vpop.f32.mrb[0].mxu0  ;;  %v1185_v43 = vpop.f32.mrb[0].mxu1 }
  0xee   : > { %v592_v44 = vadd.f32 %v1153_v42, %v1398_v41  ;;  %v720_v45 = vadd.f32 %v1185_v43, %v1398_v41  ;;  %v583_v46 = vpop.f32.mrb[1].mxu0  ;;  %v711_v47 = vpop.f32.mrb[1].mxu1 }
  0xef   : > { %v584_v48 = vadd.f32 %v1398_v41, %v583_v46  ;;  %v712_v49 = vadd.f32 %v1398_v41, %v711_v47  ;;  %v1154_v50 = vpop.f32.mrb[2].mxu0  ;;  %v1186_v51 = vpop.f32.mrb[2].mxu1 }
  0xf0   : > { %v840_v52 = vmax.f32 %v592_v44, 0.0  ;;  %v872_v53 = vmax.f32 %v720_v45, 0.0  ;;  %v595_v54 = vadd.f32 %v1154_v50, %v1398_v41  ;;  %v723_v55 = vadd.f32 %v1186_v51, %v1398_v41  ;;  %v586_v56 = vpop.f32.mrb[3].mxu0  ;;  %v714_v57 = vpop.f32.mrb[3].mxu1 }
  0xf1   : > { %v838_v58 = vmax.f32 %v584_v48, 0.0  ;;  %v870_v59 = vmax.f32 %v712_v49, 0.0  ;;  %v587_v60 = vadd.f32 %v1398_v41, %v586_v56  ;;  %v715_v61 = vadd.f32 %v1398_v41, %v714_v57 }
  0xf2   : > { %905 = vst.msk [vmem:[%s1406_s7 + $0x10] sm:$0xff] %vm902_vm3, %v840_v52  ;;  %937 = vst.msk [vmem:[%s1406_s7 + $0x110] sm:$0xff] %vm902_vm3, %v872_v53  ;;  %v841_v62 = vmax.f32 %v595_v54, 0.0  ;;  %v873_v63 = vmax.f32 %v723_v55, 0.0 }
  0xf3   : > { %903 = vst.msk [vmem:[%s1406_s7] sm:$0xff] %vm902_vm3, %v838_v58  ;;  %935 = vst.msk [vmem:[%s1406_s7 + $0x100] sm:$0xff] %vm902_vm3, %v870_v59  ;;  %v839_v0 = vmax.f32 %v587_v60, 0.0  ;;  %v871_v1 = vmax.f32 %v715_v61, 0.0 }
  0xf4   : > { %906 = vst.msk [vmem:[%s1406_s7 + $0x18] sm:$0xff] %vm902_vm3, %v841_v62  ;;  %938 = vst.msk [vmem:[%s1406_s7 + $0x118] sm:$0xff] %vm902_vm3, %v873_v63 }
  0xf5   : > { %904 = vst.msk [vmem:[%s1406_s7 + $0x8] sm:$0xff] %vm902_vm3, %v839_v0  ;;  %936 = vst.msk [vmem:[%s1406_s7 + $0x108] sm:$0xff] %vm902_vm3, %v871_v1  ;;  %v1157_v2 = vpop.f32.mrb[4].mxu0  ;;  %v1189_v3 = vpop.f32.mrb[4].mxu1 }
  0xf6   : > { %v608_v4 = vadd.f32 %v1157_v2, %v1398_v41  ;;  %v736_v5 = vadd.f32 %v1189_v3, %v1398_v41  ;;  %v599_v6 = vpop.f32.mrb[5].mxu0  ;;  %v727_v7 = vpop.f32.mrb[5].mxu1 }
  0xf7   : > { %v600_v8 = vadd.f32 %v1398_v41, %v599_v6  ;;  %v728_v9 = vadd.f32 %v1398_v41, %v727_v7  ;;  %v1158_v10 = vpop.f32.mrb[6].mxu0  ;;  %v1190_v11 = vpop.f32.mrb[6].mxu1 }
  0xf8   : > { %v844_v12 = vmax.f32 %v608_v4, 0.0  ;;  %v876_v13 = vmax.f32 %v736_v5, 0.0  ;;  %v611_v14 = vadd.f32 %v1158_v10, %v1398_v41  ;;  %v739_v15 = vadd.f32 %v1190_v11, %v1398_v41  ;;  %v602_v16 = vpop.f32.mrb[7].mxu0  ;;  %v730_v17 = vpop.f32.mrb[7].mxu1 }
  0xf9   : > { %v842_v18 = vmax.f32 %v600_v8, 0.0  ;;  %v874_v19 = vmax.f32 %v728_v9, 0.0  ;;  %v603_v20 = vadd.f32 %v1398_v41, %v602_v16  ;;  %v731_v21 = vadd.f32 %v1398_v41, %v730_v17 }
  0xfa   : > { %909 = vst.msk [vmem:[%s1406_s7 + $0x30] sm:$0xff] %vm902_vm3, %v844_v12  ;;  %941 = vst.msk [vmem:[%s1406_s7 + $0x130] sm:$0xff] %vm902_vm3, %v876_v13  ;;  %v845_v22 = vmax.f32 %v611_v14, 0.0  ;;  %v877_v23 = vmax.f32 %v739_v15, 0.0 }
  0xfb   : > { %907 = vst.msk [vmem:[%s1406_s7 + $0x20] sm:$0xff] %vm902_vm3, %v842_v18  ;;  %939 = vst.msk [vmem:[%s1406_s7 + $0x120] sm:$0xff] %vm902_vm3, %v874_v19  ;;  %v843_v24 = vmax.f32 %v603_v20, 0.0  ;;  %v875_v25 = vmax.f32 %v731_v21, 0.0 }
  0xfc   : > { %910 = vst.msk [vmem:[%s1406_s7 + $0x38] sm:$0xff] %vm902_vm3, %v845_v22  ;;  %942 = vst.msk [vmem:[%s1406_s7 + $0x138] sm:$0xff] %vm902_vm3, %v877_v23 }
  0xfd   : > { %908 = vst.msk [vmem:[%s1406_s7 + $0x28] sm:$0xff] %vm902_vm3, %v843_v24  ;;  %940 = vst.msk [vmem:[%s1406_s7 + $0x128] sm:$0xff] %vm902_vm3, %v875_v25  ;;  %v1161_v26 = vpop.f32.mrb[8].mxu0  ;;  %v1193_v27 = vpop.f32.mrb[8].mxu1 }
  0xfe   : > { %v624_v28 = vadd.f32 %v1161_v26, %v1398_v41  ;;  %v752_v29 = vadd.f32 %v1193_v27, %v1398_v41  ;;  %v615_v30 = vpop.f32.mrb[9].mxu0  ;;  %v743_v31 = vpop.f32.mrb[9].mxu1 }
  0xff   : > { %v616_v32 = vadd.f32 %v1398_v41, %v615_v30  ;;  %v744_v33 = vadd.f32 %v1398_v41, %v743_v31  ;;  %v1162_v34 = vpop.f32.mrb[10].mxu0  ;;  %v1194_v35 = vpop.f32.mrb[10].mxu1 }
 0x100   : > { %v848_v36 = vmax.f32 %v624_v28, 0.0  ;;  %v880_v37 = vmax.f32 %v752_v29, 0.0  ;;  %v627_v38 = vadd.f32 %v1162_v34, %v1398_v41  ;;  %v755_v39 = vadd.f32 %v1194_v35, %v1398_v41  ;;  %v618_v40 = vpop.f32.mrb[11].mxu0  ;;  %v746_v42 = vpop.f32.mrb[11].mxu1 }
 0x101   : > { %v846_v43 = vmax.f32 %v616_v32, 0.0  ;;  %v878_v44 = vmax.f32 %v744_v33, 0.0  ;;  %v619_v45 = vadd.f32 %v1398_v41, %v618_v40  ;;  %v747_v46 = vadd.f32 %v1398_v41, %v746_v42 }
 0x102   : > { %913 = vst.msk [vmem:[%s1406_s7 + $0x50] sm:$0xff] %vm902_vm3, %v848_v36  ;;  %945 = vst.msk [vmem:[%s1406_s7 + $0x150] sm:$0xff] %vm902_vm3, %v880_v37  ;;  %v849_v47 = vmax.f32 %v627_v38, 0.0  ;;  %v881_v48 = vmax.f32 %v755_v39, 0.0 }
 0x103   : > { %911 = vst.msk [vmem:[%s1406_s7 + $0x40] sm:$0xff] %vm902_vm3, %v846_v43  ;;  %943 = vst.msk [vmem:[%s1406_s7 + $0x140] sm:$0xff] %vm902_vm3, %v878_v44  ;;  %v847_v49 = vmax.f32 %v619_v45, 0.0  ;;  %v879_v50 = vmax.f32 %v747_v46, 0.0 }
 0x104   : > { %914 = vst.msk [vmem:[%s1406_s7 + $0x58] sm:$0xff] %vm902_vm3, %v849_v47  ;;  %946 = vst.msk [vmem:[%s1406_s7 + $0x158] sm:$0xff] %vm902_vm3, %v881_v48 }
 0x105   : > { %912 = vst.msk [vmem:[%s1406_s7 + $0x48] sm:$0xff] %vm902_vm3, %v847_v49  ;;  %944 = vst.msk [vmem:[%s1406_s7 + $0x148] sm:$0xff] %vm902_vm3, %v879_v50  ;;  %v1165_v51 = vpop.f32.mrb[12].mxu0  ;;  %v1197_v52 = vpop.f32.mrb[12].mxu1 }
 0x106   : > { %v640_v53 = vadd.f32 %v1165_v51, %v1398_v41  ;;  %v768_v54 = vadd.f32 %v1197_v52, %v1398_v41  ;;  %v631_v55 = vpop.f32.mrb[13].mxu0  ;;  %v759_v56 = vpop.f32.mrb[13].mxu1 }
 0x107   : > { %v632_v57 = vadd.f32 %v1398_v41, %v631_v55  ;;  %v760_v58 = vadd.f32 %v1398_v41, %v759_v56  ;;  %v1166_v59 = vpop.f32.mrb[14].mxu0  ;;  %v1198_v60 = vpop.f32.mrb[14].mxu1 }
 0x108   : > { %v852_v61 = vmax.f32 %v640_v53, 0.0  ;;  %v884_v62 = vmax.f32 %v768_v54, 0.0  ;;  %v643_v63 = vadd.f32 %v1166_v59, %v1398_v41  ;;  %v771_v0 = vadd.f32 %v1198_v60, %v1398_v41  ;;  %v634_v1 = vpop.f32.mrb[15].mxu0  ;;  %v762_v2 = vpop.f32.mrb[15].mxu1 }
 0x109   : > { %v850_v3 = vmax.f32 %v632_v57, 0.0  ;;  %v882_v4 = vmax.f32 %v760_v58, 0.0  ;;  %v635_v5 = vadd.f32 %v1398_v41, %v634_v1  ;;  %v763_v6 = vadd.f32 %v1398_v41, %v762_v2 }
 0x10a   : > { %917 = vst.msk [vmem:[%s1406_s7 + $0x70] sm:$0xff] %vm902_vm3, %v852_v61  ;;  %949 = vst.msk [vmem:[%s1406_s7 + $0x170] sm:$0xff] %vm902_vm3, %v884_v62  ;;  %v853_v7 = vmax.f32 %v643_v63, 0.0  ;;  %v885_v8 = vmax.f32 %v771_v0, 0.0 }
 0x10b   : > { %915 = vst.msk [vmem:[%s1406_s7 + $0x60] sm:$0xff] %vm902_vm3, %v850_v3  ;;  %947 = vst.msk [vmem:[%s1406_s7 + $0x160] sm:$0xff] %vm902_vm3, %v882_v4  ;;  %v851_v9 = vmax.f32 %v635_v5, 0.0  ;;  %v883_v10 = vmax.f32 %v763_v6, 0.0 }
 0x10c   : > { %918 = vst.msk [vmem:[%s1406_s7 + $0x78] sm:$0xff] %vm902_vm3, %v853_v7  ;;  %950 = vst.msk [vmem:[%s1406_s7 + $0x178] sm:$0xff] %vm902_vm3, %v885_v8 }
 0x10d   : > { %916 = vst.msk [vmem:[%s1406_s7 + $0x68] sm:$0xff] %vm902_vm3, %v851_v9  ;;  %948 = vst.msk [vmem:[%s1406_s7 + $0x168] sm:$0xff] %vm902_vm3, %v883_v10  ;;  %v1169_v11 = vpop.f32.mrb[16].mxu0  ;;  %v1201_v12 = vpop.f32.mrb[16].mxu1 }
 0x10e   : > { %v656_v13 = vadd.f32 %v1169_v11, %v1398_v41  ;;  %v784_v14 = vadd.f32 %v1201_v12, %v1398_v41  ;;  %v647_v15 = vpop.f32.mrb[17].mxu0  ;;  %v775_v16 = vpop.f32.mrb[17].mxu1 }
 0x10f   : > { %v648_v17 = vadd.f32 %v1398_v41, %v647_v15  ;;  %v776_v18 = vadd.f32 %v1398_v41, %v775_v16  ;;  %v1170_v19 = vpop.f32.mrb[18].mxu0  ;;  %v1202_v20 = vpop.f32.mrb[18].mxu1 }
 0x110   : > { %v856_v21 = vmax.f32 %v656_v13, 0.0  ;;  %v888_v22 = vmax.f32 %v784_v14, 0.0  ;;  %v659_v23 = vadd.f32 %v1170_v19, %v1398_v41  ;;  %v787_v24 = vadd.f32 %v1202_v20, %v1398_v41  ;;  %v650_v25 = vpop.f32.mrb[19].mxu0  ;;  %v778_v26 = vpop.f32.mrb[19].mxu1 }
 0x111   : > { %v854_v27 = vmax.f32 %v648_v17, 0.0  ;;  %v886_v28 = vmax.f32 %v776_v18, 0.0  ;;  %v651_v29 = vadd.f32 %v1398_v41, %v650_v25  ;;  %v779_v30 = vadd.f32 %v1398_v41, %v778_v26 }
 0x112   : > { %921 = vst.msk [vmem:[%s1406_s7 + $0x90] sm:$0xff] %vm902_vm3, %v856_v21  ;;  %953 = vst.msk [vmem:[%s1406_s7 + $0x190] sm:$0xff] %vm902_vm3, %v888_v22  ;;  %v857_v31 = vmax.f32 %v659_v23, 0.0  ;;  %v889_v32 = vmax.f32 %v787_v24, 0.0 }
 0x113   : > { %919 = vst.msk [vmem:[%s1406_s7 + $0x80] sm:$0xff] %vm902_vm3, %v854_v27  ;;  %951 = vst.msk [vmem:[%s1406_s7 + $0x180] sm:$0xff] %vm902_vm3, %v886_v28  ;;  %v855_v33 = vmax.f32 %v651_v29, 0.0  ;;  %v887_v34 = vmax.f32 %v779_v30, 0.0 }
 0x114   : > { %922 = vst.msk [vmem:[%s1406_s7 + $0x98] sm:$0xff] %vm902_vm3, %v857_v31  ;;  %954 = vst.msk [vmem:[%s1406_s7 + $0x198] sm:$0xff] %vm902_vm3, %v889_v32 }
 0x115   : > { %920 = vst.msk [vmem:[%s1406_s7 + $0x88] sm:$0xff] %vm902_vm3, %v855_v33  ;;  %952 = vst.msk [vmem:[%s1406_s7 + $0x188] sm:$0xff] %vm902_vm3, %v887_v34  ;;  %v1173_v35 = vpop.f32.mrb[20].mxu0  ;;  %v1205_v36 = vpop.f32.mrb[20].mxu1 }
 0x116   : > { %v672_v37 = vadd.f32 %v1173_v35, %v1398_v41  ;;  %v800_v38 = vadd.f32 %v1205_v36, %v1398_v41  ;;  %v663_v39 = vpop.f32.mrb[21].mxu0  ;;  %v791_v40 = vpop.f32.mrb[21].mxu1 }
 0x117   : > { %v664_v42 = vadd.f32 %v1398_v41, %v663_v39  ;;  %v792_v43 = vadd.f32 %v1398_v41, %v791_v40  ;;  %v1174_v44 = vpop.f32.mrb[22].mxu0  ;;  %v1206_v45 = vpop.f32.mrb[22].mxu1 }
 0x118   : > { %v860_v46 = vmax.f32 %v672_v37, 0.0  ;;  %v892_v47 = vmax.f32 %v800_v38, 0.0  ;;  %v675_v48 = vadd.f32 %v1174_v44, %v1398_v41  ;;  %v803_v49 = vadd.f32 %v1206_v45, %v1398_v41  ;;  %v666_v50 = vpop.f32.mrb[23].mxu0  ;;  %v794_v51 = vpop.f32.mrb[23].mxu1 }
 0x119   : > { %v858_v52 = vmax.f32 %v664_v42, 0.0  ;;  %v890_v53 = vmax.f32 %v792_v43, 0.0  ;;  %v667_v54 = vadd.f32 %v1398_v41, %v666_v50  ;;  %v795_v55 = vadd.f32 %v1398_v41, %v794_v51 }
 0x11a   : > { %925 = vst.msk [vmem:[%s1406_s7 + $0xb0] sm:$0xff] %vm902_vm3, %v860_v46  ;;  %957 = vst.msk [vmem:[%s1406_s7 + $0x1b0] sm:$0xff] %vm902_vm3, %v892_v47  ;;  %v861_v56 = vmax.f32 %v675_v48, 0.0  ;;  %v893_v57 = vmax.f32 %v803_v49, 0.0 }
 0x11b   : > { %923 = vst.msk [vmem:[%s1406_s7 + $0xa0] sm:$0xff] %vm902_vm3, %v858_v52  ;;  %955 = vst.msk [vmem:[%s1406_s7 + $0x1a0] sm:$0xff] %vm902_vm3, %v890_v53  ;;  %v859_v58 = vmax.f32 %v667_v54, 0.0  ;;  %v891_v59 = vmax.f32 %v795_v55, 0.0 }
 0x11c   : > { %926 = vst.msk [vmem:[%s1406_s7 + $0xb8] sm:$0xff] %vm902_vm3, %v861_v56  ;;  %958 = vst.msk [vmem:[%s1406_s7 + $0x1b8] sm:$0xff] %vm902_vm3, %v893_v57 }
 0x11d   : > { %924 = vst.msk [vmem:[%s1406_s7 + $0xa8] sm:$0xff] %vm902_vm3, %v859_v58  ;;  %956 = vst.msk [vmem:[%s1406_s7 + $0x1a8] sm:$0xff] %vm902_vm3, %v891_v59  ;;  %v1177_v60 = vpop.f32.mrb[24].mxu0  ;;  %v1209_v61 = vpop.f32.mrb[24].mxu1 }
 0x11e   : > { %v688_v62 = vadd.f32 %v1177_v60, %v1398_v41  ;;  %v816_v63 = vadd.f32 %v1209_v61, %v1398_v41  ;;  %v679_v0 = vpop.f32.mrb[25].mxu0  ;;  %v807_v1 = vpop.f32.mrb[25].mxu1 }
 0x11f   : > { %v680_v2 = vadd.f32 %v1398_v41, %v679_v0  ;;  %v808_v3 = vadd.f32 %v1398_v41, %v807_v1  ;;  %v1178_v4 = vpop.f32.mrb[26].mxu0  ;;  %v1210_v5 = vpop.f32.mrb[26].mxu1 }
 0x120   : > { %v864_v6 = vmax.f32 %v688_v62, 0.0  ;;  %v896_v7 = vmax.f32 %v816_v63, 0.0  ;;  %v691_v8 = vadd.f32 %v1178_v4, %v1398_v41  ;;  %v819_v9 = vadd.f32 %v1210_v5, %v1398_v41  ;;  %v682_v10 = vpop.f32.mrb[27].mxu0  ;;  %v810_v11 = vpop.f32.mrb[27].mxu1 }
 0x121   : > { %v862_v12 = vmax.f32 %v680_v2, 0.0  ;;  %v894_v13 = vmax.f32 %v808_v3, 0.0  ;;  %v683_v14 = vadd.f32 %v1398_v41, %v682_v10  ;;  %v811_v15 = vadd.f32 %v1398_v41, %v810_v11 }
 0x122   : > { %929 = vst.msk [vmem:[%s1406_s7 + $0xd0] sm:$0xff] %vm902_vm3, %v864_v6  ;;  %961 = vst.msk [vmem:[%s1406_s7 + $0x1d0] sm:$0xff] %vm902_vm3, %v896_v7  ;;  %v865_v16 = vmax.f32 %v691_v8, 0.0  ;;  %v897_v17 = vmax.f32 %v819_v9, 0.0 }
 0x123   : > { %927 = vst.msk [vmem:[%s1406_s7 + $0xc0] sm:$0xff] %vm902_vm3, %v862_v12  ;;  %959 = vst.msk [vmem:[%s1406_s7 + $0x1c0] sm:$0xff] %vm902_vm3, %v894_v13  ;;  %v863_v18 = vmax.f32 %v683_v14, 0.0  ;;  %v895_v19 = vmax.f32 %v811_v15, 0.0 }
 0x124   : > { %930 = vst.msk [vmem:[%s1406_s7 + $0xd8] sm:$0xff] %vm902_vm3, %v865_v16  ;;  %962 = vst.msk [vmem:[%s1406_s7 + $0x1d8] sm:$0xff] %vm902_vm3, %v897_v17 }
 0x125   : > { %928 = vst.msk [vmem:[%s1406_s7 + $0xc8] sm:$0xff] %vm902_vm3, %v863_v18  ;;  %960 = vst.msk [vmem:[%s1406_s7 + $0x1c8] sm:$0xff] %vm902_vm3, %v895_v19  ;;  %v1181_v20 = vpop.f32.mrb[28].mxu0  ;;  %v1213_v21 = vpop.f32.mrb[28].mxu1 }
 0x126   : > { %v704_v22 = vadd.f32 %v1181_v20, %v1398_v41  ;;  %v832_v23 = vadd.f32 %v1213_v21, %v1398_v41  ;;  %v695_v24 = vpop.f32.mrb[29].mxu0  ;;  %v823_v25 = vpop.f32.mrb[29].mxu1 }
 0x127   : > { %v696_v26 = vadd.f32 %v1398_v41, %v695_v24  ;;  %v824_v27 = vadd.f32 %v1398_v41, %v823_v25  ;;  %v1182_v28 = vpop.f32.mrb[30].mxu0  ;;  %v1214_v29 = vpop.f32.mrb[30].mxu1 }
 0x128   : > { %v868_v30 = vmax.f32 %v704_v22, 0.0  ;;  %v900_v31 = vmax.f32 %v832_v23, 0.0  ;;  %v707_v32 = vadd.f32 %v1182_v28, %v1398_v41  ;;  %v835_v33 = vadd.f32 %v1214_v29, %v1398_v41  ;;  %v698_v34 = vpop.f32.mrb[31].mxu0  ;;  %v826_v35 = vpop.f32.mrb[31].mxu1 }
 0x129   : > { %v866_v36 = vmax.f32 %v696_v26, 0.0  ;;  %v898_v37 = vmax.f32 %v824_v27, 0.0  ;;  %v699_v38 = vadd.f32 %v1398_v41, %v698_v34  ;;  %v827_v39 = vadd.f32 %v1398_v41, %v826_v35 }
 0x12a   : > { %933 = vst.msk [vmem:[%s1406_s7 + $0xf0] sm:$0xff] %vm902_vm3, %v868_v30  ;;  %965 = vst.msk [vmem:[%s1406_s7 + $0x1f0] sm:$0xff] %vm902_vm3, %v900_v31  ;;  %v869_v40 = vmax.f32 %v707_v32, 0.0  ;;  %v901_v42 = vmax.f32 %v835_v33, 0.0 }
 0x12b   : > { %931 = vst.msk [vmem:[%s1406_s7 + $0xe0] sm:$0xff] %vm902_vm3, %v866_v36  ;;  %963 = vst.msk [vmem:[%s1406_s7 + $0x1e0] sm:$0xff] %vm902_vm3, %v898_v37  ;;  %v867_v43 = vmax.f32 %v699_v38, 0.0  ;;  %v899_v44 = vmax.f32 %v827_v39, 0.0 }
 0x12c   : > { %934 = vst.msk [vmem:[%s1406_s7 + $0xf8] sm:$0xff] %vm902_vm3, %v869_v40  ;;  %966 = vst.msk [vmem:[%s1406_s7 + $0x1f8] sm:$0xff] %vm902_vm3, %v901_v42 }
 0x12d   : > { %932 = vst.msk [vmem:[%s1406_s7 + $0xe8] sm:$0xff] %vm902_vm3, %v867_v43  ;;  %964 = vst.msk [vmem:[%s1406_s7 + $0x1e8] sm:$0xff] %vm902_vm3, %v899_v44 }
 0x12e PF: > { %s13_s12 = sadd.s32 1, %s1277_s12  }
 0x12f   : > { %p10_p4 = scmp.ge.s32.totalorder %s13_s12, 6  }
 0x131   :  { %12 = sbr.rel (!%p10_p4) target bundleno = 1 (0x1), region = 62 }

// kernel: decoder_forward.11
= control target key start
LH: loop header
LB: loop body
LE: loop exit
PB: predicated region body
PF: predicated region fallthrough
CT: control target
= control target key end

     0   :  { %s2535_s15 = smov 0   ;;  %s3359_s0 = inlined_call_operand.vmem [shape: bf16[2048,288], index: 0, kind: input, shape index: {}]   ;;  %s3360_s1 = inlined_call_operand.vmem [shape: bf16[288,3], index: 1, kind: input, shape index: {}]   ;;  %s3361_s2 = inlined_call_operand.vmem [shape: f32[1,3], index: 2, kind: input, shape index: {}]   ;;  %s3362_s3 = inlined_call_operand.vmem [shape: f32[2048,3], index: 3, kind: input, shape index: {}, may-alias: {3,4}]   ;;  %s3363_s4 = inlined_call_operand.vmem [shape: f32[2048,3], index: 4, kind: output, shape index: {}, may-alias: {3,4}]  }
   0x1 LB: > { %s2050_s16 = sadd.s32 4294967295, %s2507_s15   ;;  %p2054_p0 = scmp.ge.s32.totalorder %s2507_s15, 1  ;;  %s2507_s15 = sphi %s2535_s15, %s14_s15  }
   0x2   : > { %p175_p1 = scmp.lt.s32.totalorder %s2507_s15, 5 }
   0x4   : > { %p176_p2 = pnand %p2054_p0, %p175_p1 }
   0x6   : > { %179 = sbr.rel (%p176_p2) target bundleno = 487 (0x1e7), region = 36 }
   0xd   : > { %v2354_v0 = vld [vmem:[%s3360_s1] sm:$0xff]   ;;  %v2509_v1 = vmov 0   ;;  %s2055_s19 = sshll.u32 %s2050_s16, 6  ;;  %v2355_v2 = vld [vmem:[%s3360_s1 + $0x8] sm:$0xff]   ;;  %v2356_v3 = vld [vmem:[%s3360_s1 + $0x10] sm:$0xff]   ;;  %vm986_vm0 = vcmask 261120  }
   0xe   : > { %1083 = vmatprep.subr.bf16.mxu0 %v2509_v1  ;;  %2312 = vmatprep.subr.bf16.mxu1 %v2509_v1  ;;  %p208_p3 = scmp.lt.s32.totalorder %s2055_s19, 255  ;;  %v2357_v4 = vld [vmem:[%s3360_s1 + $0x18] sm:$0xff]   ;;  %v2358_v5 = vld [vmem:[%s3360_s1 + $0x20] sm:$0xff]   ;;  %v2359_v7 = vld [vmem:[%s3360_s1 + $0x28] sm:$0xff]   ;;  %vm1917_vm1 = vcmask 23552  }
   0xf   : > { %1084 = vmatpush1.bf16.msra.mxu0 %v2354_v0  ;;  %2328 = vmatpush1.bf16.msra.mxu1 %v2354_v0  ;;  %v2360_v9 = vld [vmem:[%s3360_s1 + $0x30] sm:$0xff]   ;;  %v2361_v10 = vld [vmem:[%s3360_s1 + $0x38] sm:$0xff]   ;;  %v2362_v11 = vld [vmem:[%s3360_s1 + $0x40] sm:$0xff]  }
  0x10   : > { %1085 = vmatprep.subr.bf16.mxu0 %v2509_v1  ;;  %2313 = vmatprep.subr.bf16.mxu1 %v2509_v1  ;;  %s3453_s19 = smov (!%p208_p3, %s2055_s19), 255  ;;  %v2363_v12 = vld [vmem:[%s3360_s1 + $0x48] sm:$0xff]   ;;  %v2364_v13 = vld [vmem:[%s3360_s1 + $0x50] sm:$0xff]   ;;  %v2365_v14 = vld [vmem:[%s3360_s1 + $0x58] sm:$0xff]  }
  0x11   : > { %s2344_s26 = smul.u32 12, %s3453_s19  ;;  %v2366_v15 = vld [vmem:[%s3360_s1 + $0x60] sm:$0xff]   ;;  %v2367_v16 = vld [vmem:[%s3360_s1 + $0x68] sm:$0xff]   ;;  %v2368_v17 = vld [vmem:[%s3360_s1 + $0x70] sm:$0xff]  }
  0x12   : > { %v2369_v18 = vld [vmem:[%s3360_s1 + $0x78] sm:$0xff]   ;;  %v2376_v19 = vld [vmem:[%s3360_s1 + $0x80] sm:$0xff]   ;;  %v2401_v24 = vld [vmem:[%s3360_s1 + $0x88] sm:$0xff]  }
  0x13   : > { %1086 = vmatpush1.bf16.msra.mxu0 %v2355_v2  ;;  %2329 = vmatpush1.bf16.msra.mxu1 %v2355_v2  ;;  %s2572_s5 = scalar_lea.vmem %s3359_s0, %s2344_s26 }
  0x14   : > { %1087 = vmatprep.subr.bf16.mxu0 %v2509_v1  ;;  %2314 = vmatprep.subr.bf16.mxu1 %v2509_v1  ;;  %v2372_v6 = vld [vmem:[%s2572_s5 + $0x4] ss:$12 sps:$4 sm:$0xff]   ;;  %v2370_v20 = vld [vmem:[%s2572_s5] ss:$12 sps:$4 sm:$0xff]   ;;  %v2377_v22 = vld [vmem:[%s2572_s5 + $0x1c] ss:$12 sps:$4 sm:$0xff]  }
  0x15   : > { %v2375_v8 = vld [vmem:[%s2572_s5 + $0x244] ss:$12 sps:$4 sm:$0xff]   ;;  %1115 = vmatprep.mubr.bf16.mxu0 %v2372_v6  ;;  %v2373_v21 = vld [vmem:[%s2572_s5 + $0x240] ss:$12 sps:$4 sm:$0xff]   ;;  %v2379_v23 = vld [vmem:[%s2572_s5 + $0x25c] ss:$12 sps:$4 sm:$0xff]  }
  0x16   : > { %1307 = vmatprep.mubr.bf16.mxu1 %v2375_v8  ;;  %v2381_v25 = vld [vmem:[%s2572_s5 + $0x18] ss:$12 sps:$4 sm:$0xff]   ;;  %v2383_v27 = vld [vmem:[%s2572_s5 + $0x34] ss:$12 sps:$4 sm:$0xff]   ;;  %v2387_v29 = vld [vmem:[%s2572_s5 + $0x30] ss:$12 sps:$4 sm:$0xff]  }
  0x17   : > { %1088 = vmatpush1.bf16.msra.mxu0 %v2356_v3  ;;  %2330 = vmatpush1.bf16.msra.mxu1 %v2356_v3  ;;  %v2382_v26 = vld [vmem:[%s2572_s5 + $0x258] ss:$12 sps:$4 sm:$0xff]   ;;  %v2385_v28 = vld [vmem:[%s2572_s5 + $0x274] ss:$12 sps:$4 sm:$0xff]   ;;  %v2388_v30 = vld [vmem:[%s2572_s5 + $0x270] ss:$12 sps:$4 sm:$0xff]  }
  0x18   : > { %1089 = vmatprep.subr.bf16.mxu0 %v2509_v1  ;;  %2315 = vmatprep.subr.bf16.mxu1 %v2509_v1  ;;  %v2389_v31 = vld [vmem:[%s2572_s5 + $0x4c] ss:$12 sps:$4 sm:$0xff]   ;;  %v2393_v33 = vld [vmem:[%s2572_s5 + $0x48] ss:$12 sps:$4 sm:$0xff]   ;;  %v2395_v35 = vld [vmem:[%s2572_s5 + $0x64] ss:$12 sps:$4 sm:$0xff]  }
  0x19   : > { %v2391_v32 = vld [vmem:[%s2572_s5 + $0x28c] ss:$12 sps:$4 sm:$0xff]   ;;  %v2394_v34 = vld [vmem:[%s2572_s5 + $0x288] ss:$12 sps:$4 sm:$0xff]   ;;  %v2397_v36 = vld [vmem:[%s2572_s5 + $0x2a4] ss:$12 sps:$4 sm:$0xff]  }
  0x1a   : > { %v2399_v37 = vld [vmem:[%s2572_s5 + $0x60] ss:$12 sps:$4 sm:$0xff]   ;;  %v2402_v39 = vld [vmem:[%s2572_s5 + $0x7c] ss:$12 sps:$4 sm:$0xff]   ;;  %v2406_v41 = vld [vmem:[%s2572_s5 + $0x78] ss:$12 sps:$4 sm:$0xff]  }
  0x1b   : > { %1090 = vmatpush1.bf16.msra.mxu0 %v2357_v4  ;;  %2331 = vmatpush1.bf16.msra.mxu1 %v2357_v4  ;;  %v2400_v38 = vld [vmem:[%s2572_s5 + $0x2a0] ss:$12 sps:$4 sm:$0xff]   ;;  %v2404_v40 = vld [vmem:[%s2572_s5 + $0x2bc] ss:$12 sps:$4 sm:$0xff]   ;;  %v2407_v42 = vld [vmem:[%s2572_s5 + $0x2b8] ss:$12 sps:$4 sm:$0xff]  }
  0x1c   : > { %1091 = vmatprep.subr.bf16.mxu0 %v2509_v1  ;;  %2316 = vmatprep.subr.bf16.mxu1 %v2509_v1  ;;  %v2408_v43 = vld [vmem:[%s2572_s5 + $0x94] ss:$12 sps:$4 sm:$0xff]   ;;  %v2412_v45 = vld [vmem:[%s2572_s5 + $0x90] ss:$12 sps:$4 sm:$0xff]   ;;  %v2414_v47 = vld [vmem:[%s2572_s5 + $0xac] ss:$12 sps:$4 sm:$0xff]  }
  0x1d   : > { %v2410_v44 = vld [vmem:[%s2572_s5 + $0x2d4] ss:$12 sps:$4 sm:$0xff]   ;;  %v2413_v46 = vld [vmem:[%s2572_s5 + $0x2d0] ss:$12 sps:$4 sm:$0xff]   ;;  %v2416_v48 = vld [vmem:[%s2572_s5 + $0x2ec] ss:$12 sps:$4 sm:$0xff]  }
  0x1e   : > { %v2418_v49 = vld [vmem:[%s2572_s5 + $0xa8] ss:$12 sps:$4 sm:$0xff]   ;;  %v2420_v51 = vld [vmem:[%s2572_s5 + $0xc4] ss:$12 sps:$4 sm:$0xff]   ;;  %v2423_v53 = vld [vmem:[%s2572_s5 + $0xc0] ss:$12 sps:$4 sm:$0xff]  }
  0x1f   : > { %1092 = vmatpush1.bf16.msra.mxu0 %v2358_v5  ;;  %2332 = vmatpush1.bf16.msra.mxu1 %v2358_v5  ;;  %v2419_v50 = vld [vmem:[%s2572_s5 + $0x2e8] ss:$12 sps:$4 sm:$0xff]   ;;  %v2424_v54 = vld [vmem:[%s2572_s5 + $0x20] ss:$12 sps:$4 sm:$0xff]   ;;  %v2427_v56 = vld [vmem:[%s2572_s5 + $0x38] ss:$12 sps:$4 sm:$0xff]  }
  0x20   : > { %1093 = vmatprep.subr.bf16.mxu0 %v2509_v1  ;;  %2317 = vmatprep.subr.bf16.mxu1 %v2509_v1  ;;  %v2422_v52 = vld [vmem:[%s2572_s5 + $0x8] ss:$12 sps:$4 sm:$0xff]   ;;  %v2428_v57 = vld [vmem:[%s2572_s5 + $0xd8] ss:$12 sps:$4 sm:$0xff]   ;;  %v2429_v58 = vld [vmem:[%s2572_s5 + $0x50] ss:$12 sps:$4 sm:$0xff]  }
  0x21   : > { %v2425_v55 = vld [vmem:[%s2572_s5 + $0xdc] ss:$12 sps:$4 sm:$0xff]   ;;  %v2430_v59 = vld [vmem:[%s2572_s5 + $0xf4] ss:$12 sps:$4 sm:$0xff]   ;;  %v2435_v63 = vld [vmem:[%s2572_s5 + $0x10c] ss:$12 sps:$4 sm:$0xff]  }
  0x22   : > { %v2432_v60 = vld [vmem:[%s2572_s5 + $0x68] ss:$12 sps:$4 sm:$0xff]   ;;  %v2433_v61 = vld [vmem:[%s2572_s5 + $0xf0] ss:$12 sps:$4 sm:$0xff]   ;;  %v2434_v62 = vld [vmem:[%s2572_s5 + $0x80] ss:$12 sps:$4 sm:$0xff]  }
  0x23   : > { %1094 = vmatpush1.bf16.msra.mxu0 %v2359_v7  ;;  %2333 = vmatpush1.bf16.msra.mxu1 %v2359_v7  ;;  %v2437_v0 = vld [vmem:[%s2572_s5 + $0x98] ss:$12 sps:$4 sm:$0xff]   ;;  %v2439_v2 = vld [vmem:[%s2572_s5 + $0xb0] ss:$12 sps:$4 sm:$0xff]   ;;  %v2442_v4 = vld [vmem:[%s2572_s5 + $0xc8] ss:$12 sps:$4 sm:$0xff]  }
  0x24   : > { %1095 = vmatprep.subr.bf16.mxu0 %v2509_v1  ;;  %2318 = vmatprep.subr.bf16.mxu1 %v2509_v1  ;;  %v2440_v3 = vld [vmem:[%s2572_s5 + $0x124] ss:$12 sps:$4 sm:$0xff]   ;;  %v2443_v5 = vld [vmem:[%s2572_s5 + $0x120] ss:$12 sps:$4 sm:$0xff]   ;;  %v2445_v7 = vld [vmem:[%s2572_s5 + $0x13c] ss:$12 sps:$4 sm:$0xff]  }
  0x25   : > { %v2444_v6 = vld [vmem:[%s2572_s5 + $0xe0] ss:$12 sps:$4 sm:$0xff]   ;;  %v2447_v8 = vld [vmem:[%s2572_s5 + $0xf8] ss:$12 sps:$4 sm:$0xff]  }
  0x27   : > { %1096 = vmatpush1.bf16.msra.mxu0 %v2360_v9  ;;  %2334 = vmatpush1.bf16.msra.mxu1 %v2360_v9  ;;  %v2448_v9 = vld [vmem:[%s2572_s5 + $0x138] ss:$12 sps:$4 sm:$0xff]  }
  0x28   : > { %1097 = vmatprep.subr.bf16.mxu0 %v2509_v1  ;;  %2319 = vmatprep.subr.bf16.mxu1 %v2509_v1 }
  0x2b   : > { %1098 = vmatpush1.bf16.msra.mxu0 %v2361_v10  ;;  %2335 = vmatpush1.bf16.msra.mxu1 %v2361_v10  ;;  %v2449_v10 = vld [vmem:[%s2572_s5 + $0x110] ss:$12 sps:$4 sm:$0xff]  }
  0x2c   : > { %1099 = vmatprep.subr.bf16.mxu0 %v2509_v1  ;;  %2320 = vmatprep.subr.bf16.mxu1 %v2509_v1 }
  0x2f   : > { %1100 = vmatpush1.bf16.msra.mxu0 %v2362_v11  ;;  %2336 = vmatpush1.bf16.msra.mxu1 %v2362_v11  ;;  %v2450_v11 = vld [vmem:[%s2572_s5 + $0x154] ss:$12 sps:$4 sm:$0xff]  }
  0x30   : > { %1101 = vmatprep.subr.bf16.mxu0 %v2509_v1  ;;  %2321 = vmatprep.subr.bf16.mxu1 %v2509_v1 }
  0x33   : > { %1102 = vmatpush1.bf16.msra.mxu0 %v2363_v12  ;;  %2337 = vmatpush1.bf16.msra.mxu1 %v2363_v12  ;;  %v2452_v12 = vld [vmem:[%s2572_s5 + $0x128] ss:$12 sps:$4 sm:$0xff]  }
  0x34   : > { %1103 = vmatprep.subr.bf16.mxu0 %v2509_v1  ;;  %2322 = vmatprep.subr.bf16.mxu1 %v2509_v1 }
  0x37   : > { %1104 = vmatpush1.bf16.msra.mxu0 %v2364_v13  ;;  %2338 = vmatpush1.bf16.msra.mxu1 %v2364_v13  ;;  %v2453_v13 = vld [vmem:[%s2572_s5 + $0x150] ss:$12 sps:$4 sm:$0xff]  }
  0x38   : > { %1105 = vmatprep.subr.bf16.mxu0 %v2509_v1  ;;  %2323 = vmatprep.subr.bf16.mxu1 %v2509_v1 }
  0x3b   : > { %1106 = vmatpush1.bf16.msra.mxu0 %v2365_v14  ;;  %2339 = vmatpush1.bf16.msra.mxu1 %v2365_v14  ;;  %v2454_v14 = vld [vmem:[%s2572_s5 + $0x140] ss:$12 sps:$4 sm:$0xff]  }
  0x3c   : > { %1107 = vmatprep.subr.bf16.mxu0 %v2509_v1  ;;  %2324 = vmatprep.subr.bf16.mxu1 %v2509_v1 }
  0x3f   : > { %1108 = vmatpush1.bf16.msra.mxu0 %v2366_v15  ;;  %2340 = vmatpush1.bf16.msra.mxu1 %v2366_v15  ;;  %v2455_v15 = vld [vmem:[%s2572_s5 + $0x16c] ss:$12 sps:$4 sm:$0xff]  }
  0x40   : > { %1109 = vmatprep.subr.bf16.mxu0 %v2509_v1  ;;  %2325 = vmatprep.subr.bf16.mxu1 %v2509_v1 }
  0x43   : > { %1110 = vmatpush1.bf16.msra.mxu0 %v2367_v16  ;;  %2341 = vmatpush1.bf16.msra.mxu1 %v2367_v16  ;;  %v2457_v16 = vld [vmem:[%s2572_s5 + $0x158] ss:$12 sps:$4 sm:$0xff]  }
  0x44   : > { %1111 = vmatprep.subr.bf16.mxu0 %v2509_v1  ;;  %2326 = vmatprep.subr.bf16.mxu1 %v2509_v1 }
  0x47   : > { %1112 = vmatpush1.bf16.msra.mxu0 %v2368_v17  ;;  %2342 = vmatpush1.bf16.msra.mxu1 %v2368_v17  ;;  %v2458_v17 = vld [vmem:[%s2572_s5 + $0x168] ss:$12 sps:$4 sm:$0xff]  }
  0x48   : > { %1113 = vmatprep.subr.bf16.mxu0 %v2509_v1  ;;  %2327 = vmatprep.subr.bf16.mxu1 %v2509_v1  ;;  %v2438_v1 = vld [vmem:[%s2572_s5 + $0x108] ss:$12 sps:$4 sm:$0xff]  }
  0x4b   : > { %1114 = vmatpush1.bf16.msra.mxu0 %v2369_v18  ;;  %2343 = vmatpush1.bf16.msra.mxu1 %v2369_v18  ;;  %v2459_v18 = vld [vmem:[%s2572_s5 + $0x170] ss:$12 sps:$4 sm:$0xff]  }
  0x4c   : > { %2244 = vmatprep.subr.bf16.mxu1 %v2376_v19 }
  0x4e   : > { %1116 = vmatmul.mubr.bf16.vlgmr.msra.gmra.mrb[0].mxu0 %v2370_v20  ;;  %1308 = vmatmul.mubr.bf16.vlgmr.msra.gmra.mrb[0].mxu1 %v2373_v21  ;;  %v2462_v20 = vld [vmem:[%s2572_s5 + $0x188] ss:$12 sps:$4 sm:$0xff]   ;;  %v2463_v21 = vld [vmem:[%s2572_s5 + $0x180] ss:$12 sps:$4 sm:$0xff]  }
  0x4f   : > { %2245 = vmatpush3.bf16.msra.mxu1 %v2376_v19  ;;  %1123 = vmatprep.mubr.bf16.mxu0 %v2377_v22  ;;  %v2460_v19 = vld [vmem:[%s2572_s5 + $0x184] ss:$12 sps:$4 sm:$0xff]   ;;  %v2464_v22 = vld [vmem:[%s2572_s5 + $0x1a0] ss:$12 sps:$4 sm:$0xff]  }
  0x50   : > { %1315 = vmatprep.mubr.bf16.mxu1 %v2379_v23  ;;  %2246 = vmatprep.subr.bf16.mxu1 %v2401_v24  ;;  %v2465_v23 = vld [vmem:[%s2572_s5 + $0x19c] ss:$12 sps:$4 sm:$0xff]  }
  0x53   : > { %2247 = vmatpush3.bf16.msra.mxu1 %v2401_v24  ;;  %v2467_v24 = vld [vmem:[%s2572_s5 + $0x1b8] ss:$12 sps:$4 sm:$0xff]  }
  0x56   : > { %1124 = vmatmul.mubr.bf16.gmra.mrb[4].mxu0 %v2381_v25  ;;  %1316 = vmatmul.mubr.bf16.gmra.mrb[4].mxu1 %v2382_v26  ;;  %v2468_v25 = vld [vmem:[%s2572_s5 + $0x198] ss:$12 sps:$4 sm:$0xff]   ;;  %v2469_v26 = vld [vmem:[%s2572_s5 + $0x1d0] ss:$12 sps:$4 sm:$0xff]  }
  0x57   : > { %1131 = vmatprep.mubr.bf16.mxu0 %v2383_v27  ;;  %1323 = vmatprep.mubr.bf16.mxu1 %v2385_v28  ;;  %v2470_v27 = vld [vmem:[%s2572_s5 + $0x1b4] ss:$12 sps:$4 sm:$0xff]  }
  0x58   : > { %v2472_v28 = vld [vmem:[%s2572_s5 + $0x1e8] ss:$12 sps:$4 sm:$0xff]  }
  0x5e   : > { %1132 = vmatmul.mubr.bf16.gmra.mrb[8].mxu0 %v2387_v29  ;;  %1324 = vmatmul.mubr.bf16.gmra.mrb[8].mxu1 %v2388_v30  ;;  %v2473_v29 = vld [vmem:[%s2572_s5 + $0x1b0] ss:$12 sps:$4 sm:$0xff]   ;;  %v2474_v30 = vld [vmem:[%s2572_s5 + $0x200] ss:$12 sps:$4 sm:$0xff]  }
  0x5f   : > { %1139 = vmatprep.mubr.bf16.mxu0 %v2389_v31  ;;  %1331 = vmatprep.mubr.bf16.mxu1 %v2391_v32  ;;  %v2475_v31 = vld [vmem:[%s2572_s5 + $0x1cc] ss:$12 sps:$4 sm:$0xff]  }
  0x60   : > { %v2477_v32 = vld [vmem:[%s2572_s5 + $0x218] ss:$12 sps:$4 sm:$0xff]  }
  0x66   : > { %1140 = vmatmul.mubr.bf16.gmra.mrb[12].mxu0 %v2393_v33  ;;  %1332 = vmatmul.mubr.bf16.gmra.mrb[12].mxu1 %v2394_v34  ;;  %v2478_v33 = vld [vmem:[%s2572_s5 + $0x1c8] ss:$12 sps:$4 sm:$0xff]   ;;  %v2479_v34 = vld [vmem:[%s2572_s5 + $0x230] ss:$12 sps:$4 sm:$0xff]  }
  0x67   : > { %1147 = vmatprep.mubr.bf16.mxu0 %v2395_v35  ;;  %1339 = vmatprep.mubr.bf16.mxu1 %v2397_v36  ;;  %v2480_v35 = vld [vmem:[%s2572_s5 + $0x1e4] ss:$12 sps:$4 sm:$0xff]   ;;  %v2482_v36 = vld [vmem:[%s2572_s5 + $0x248] ss:$12 sps:$4 sm:$0xff]  }
  0x6e   : > { %1148 = vmatmul.mubr.bf16.gmra.mrb[16].mxu0 %v2399_v37  ;;  %1340 = vmatmul.mubr.bf16.gmra.mrb[16].mxu1 %v2400_v38  ;;  %v2483_v37 = vld [vmem:[%s2572_s5 + $0x1e0] ss:$12 sps:$4 sm:$0xff]  }
  0x6f   : > { %1155 = vmatprep.mubr.bf16.mxu0 %v2402_v39  ;;  %1347 = vmatprep.mubr.bf16.mxu1 %v2404_v40  ;;  %v2484_v38 = vld [vmem:[%s2572_s5 + $0x260] ss:$12 sps:$4 sm:$0xff]   ;;  %v2485_v39 = vld [vmem:[%s2572_s5 + $0x1fc] ss:$12 sps:$4 sm:$0xff]   ;;  %v2487_v40 = vld [vmem:[%s2572_s5 + $0x278] ss:$12 sps:$4 sm:$0xff]  }
  0x76   : > { %1156 = vmatmul.mubr.bf16.gmra.mrb[20].mxu0 %v2406_v41  ;;  %1348 = vmatmul.mubr.bf16.gmra.mrb[20].mxu1 %v2407_v42  ;;  %v2488_v41 = vld [vmem:[%s2572_s5 + $0x1f8] ss:$12 sps:$4 sm:$0xff]   ;;  %v2489_v42 = vld [vmem:[%s2572_s5 + $0x290] ss:$12 sps:$4 sm:$0xff]  }
  0x77   : > { %1163 = vmatprep.mubr.bf16.mxu0 %v2408_v43  ;;  %1355 = vmatprep.mubr.bf16.mxu1 %v2410_v44  ;;  %v2490_v43 = vld [vmem:[%s2572_s5 + $0x214] ss:$12 sps:$4 sm:$0xff]  }
  0x78   : > { %v2492_v44 = vld [vmem:[%s2572_s5 + $0x2a8] ss:$12 sps:$4 sm:$0xff]  }
  0x7e   : > { %1164 = vmatmul.mubr.bf16.gmra.mrb[24].mxu0 %v2412_v45  ;;  %1356 = vmatmul.mubr.bf16.gmra.mrb[24].mxu1 %v2413_v46  ;;  %v2493_v45 = vld [vmem:[%s2572_s5 + $0x210] ss:$12 sps:$4 sm:$0xff]   ;;  %v2494_v46 = vld [vmem:[%s2572_s5 + $0x2c0] ss:$12 sps:$4 sm:$0xff]  }
  0x7f   : > { %1171 = vmatprep.mubr.bf16.mxu0 %v2414_v47  ;;  %1363 = vmatprep.mubr.bf16.mxu1 %v2416_v48  ;;  %v2495_v47 = vld [vmem:[%s2572_s5 + $0x22c] ss:$12 sps:$4 sm:$0xff]  }
  0x80   : > { %v2497_v48 = vld [vmem:[%s2572_s5 + $0x2d8] ss:$12 sps:$4 sm:$0xff]  }
  0x86   : > { %1172 = vmatmul.mubr.bf16.gmra.mrb[28].mxu0 %v2418_v49  ;;  %1364 = vmatmul.mubr.bf16.gmra.mrb[28].mxu1 %v2419_v50  ;;  %v2498_v49 = vld [vmem:[%s2572_s5 + $0x228] ss:$12 sps:$4 sm:$0xff]   ;;  %v2499_v50 = vld [vmem:[%s2572_s5 + $0x2f0] ss:$12 sps:$4 sm:$0xff]   ;;  %s2058_s5 = sshll.u32 %s3453_s19, 3 }
  0x87   : > { %1179 = vmatprep.mubr.bf16.mxu0 %v2420_v51  ;;  %2248 = vmatprep.mubr.msk.bf16.mxu1 %vm986_vm0, %v2422_v52  ;;  %s2836_s13 = scalar_lea.vmem %s3362_s3, %s2058_s5  ;;  %s3040_s17 = scalar_lea.vmem %s3363_s4, %s2058_s5 }
  0x8e   : > { %1180 = vmatmul.mubr.bf16.gmra.mrb[32].mxu0 %v2423_v53  ;;  %2249 = vmatmul.mubr.msk.bf16.vlgmr.msra.gmra.mrb[32].mxu1 %vm986_vm0, %v2424_v54 }
  0x8f   : > { %1187 = vmatprep.mubr.bf16.mxu0 %v2425_v55  ;;  %2252 = vmatprep.mubr.msk.bf16.mxu1 %vm986_vm0, %v2427_v56 }
  0x96   : > { %1188 = vmatmul.mubr.bf16.gmra.mrb[36].mxu0 %v2428_v57  ;;  %2253 = vmatmul.mubr.msk.bf16.gmra.mrb[36].mxu1 %vm986_vm0, %v2429_v58 }
  0x97   : > { %1195 = vmatprep.mubr.bf16.mxu0 %v2430_v59  ;;  %2256 = vmatprep.mubr.msk.bf16.mxu1 %vm986_vm0, %v2432_v60 }
  0x9e   : > { %1196 = vmatmul.mubr.bf16.gmra.mrb[40].mxu0 %v2433_v61  ;;  %2257 = vmatmul.mubr.msk.bf16.gmra.mrb[40].mxu1 %vm986_vm0, %v2434_v62 }
  0x9f   : > { %1203 = vmatprep.mubr.bf16.mxu0 %v2435_v63  ;;  %2260 = vmatprep.mubr.msk.bf16.mxu1 %vm986_vm0, %v2437_v0 }
  0xa6   : > { %1204 = vmatmul.mubr.bf16.gmra.mrb[44].mxu0 %v2438_v1  ;;  %2261 = vmatmul.mubr.msk.bf16.gmra.mrb[44].mxu1 %vm986_vm0, %v2439_v2 }
  0xa7   : > { %1211 = vmatprep.mubr.bf16.mxu0 %v2440_v3  ;;  %2264 = vmatprep.mubr.msk.bf16.mxu1 %vm986_vm0, %v2442_v4 }
  0xae   : > { %1212 = vmatmul.mubr.bf16.gmra.mrb[48].mxu0 %v2443_v5  ;;  %2265 = vmatmul.mubr.msk.bf16.gmra.mrb[48].mxu1 %vm986_vm0, %v2444_v6 }
  0xaf   : > { %1219 = vmatprep.mubr.bf16.mxu0 %v2445_v7  ;;  %2268 = vmatprep.mubr.msk.bf16.mxu1 %vm986_vm0, %v2447_v8 }
  0xb6   : > { %1220 = vmatmul.mubr.bf16.gmra.mrb[52].mxu0 %v2448_v9  ;;  %2269 = vmatmul.mubr.msk.bf16.gmra.mrb[52].mxu1 %vm986_vm0, %v2449_v10 }
  0xb7   : > { %1227 = vmatprep.mubr.bf16.mxu0 %v2450_v11  ;;  %2272 = vmatprep.mubr.msk.bf16.mxu1 %vm986_vm0, %v2452_v12 }
  0xbe   : > { %1228 = vmatmul.mubr.bf16.gmra.mrb[56].mxu0 %v2453_v13  ;;  %2273 = vmatmul.mubr.msk.bf16.gmra.mrb[56].mxu1 %vm986_vm0, %v2454_v14 }
  0xbf   : > { %1235 = vmatprep.mubr.bf16.mxu0 %v2455_v15  ;;  %2276 = vmatprep.mubr.msk.bf16.mxu1 %vm986_vm0, %v2457_v16 }
  0xc6   : > { %1236 = vmatmul.mubr.bf16.gmra.mrb[60].mxu0 %v2458_v17  ;;  %2277 = vmatmul.mubr.msk.bf16.gmra.mrb[60].mxu1 %vm986_vm0, %v2459_v18 }
  0xc7   : > { %1243 = vmatprep.mubr.bf16.mxu0 %v2460_v19  ;;  %2280 = vmatprep.mubr.msk.bf16.mxu1 %vm986_vm0, %v2462_v20 }
  0xce   : > { %1244 = vmatmul.mubr.bf16.gmra.mrb[64].mxu0 %v2463_v21  ;;  %2281 = vmatmul.mubr.msk.bf16.gmra.mrb[64].mxu1 %vm986_vm0, %v2464_v22 }
  0xcf   : > { %1251 = vmatprep.mubr.bf16.mxu0 %v2465_v23  ;;  %2284 = vmatprep.mubr.msk.bf16.mxu1 %vm986_vm0, %v2467_v24 }
  0xd6   : > { %1252 = vmatmul.mubr.bf16.gmra.mrb[68].mxu0 %v2468_v25  ;;  %2285 = vmatmul.mubr.msk.bf16.gmra.mrb[68].mxu1 %vm986_vm0, %v2469_v26 }
  0xd7   : > { %1259 = vmatprep.mubr.bf16.mxu0 %v2470_v27  ;;  %2288 = vmatprep.mubr.msk.bf16.mxu1 %vm986_vm0, %v2472_v28 }
  0xde   : > { %1260 = vmatmul.mubr.bf16.gmra.mrb[72].mxu0 %v2473_v29  ;;  %2289 = vmatmul.mubr.msk.bf16.gmra.mrb[72].mxu1 %vm986_vm0, %v2474_v30 }
  0xdf   : > { %1267 = vmatprep.mubr.bf16.mxu0 %v2475_v31  ;;  %2292 = vmatprep.mubr.msk.bf16.mxu1 %vm986_vm0, %v2477_v32 }
  0xe6   : > { %1268 = vmatmul.mubr.bf16.gmra.mrb[76].mxu0 %v2478_v33  ;;  %2293 = vmatmul.mubr.msk.bf16.gmra.mrb[76].mxu1 %vm986_vm0, %v2479_v34 }
  0xe7   : > { %1275 = vmatprep.mubr.bf16.mxu0 %v2480_v35  ;;  %2296 = vmatprep.mubr.msk.bf16.mxu1 %vm986_vm0, %v2482_v36 }
  0xee   : > { %1276 = vmatmul.mubr.bf16.gmra.mrb[80].mxu0 %v2483_v37  ;;  %2297 = vmatmul.mubr.msk.bf16.gmra.mrb[80].mxu1 %vm986_vm0, %v2484_v38 }
  0xef   : > { %1283 = vmatprep.mubr.bf16.mxu0 %v2485_v39  ;;  %2300 = vmatprep.mubr.msk.bf16.mxu1 %vm986_vm0, %v2487_v40 }
  0xf6   : > { %1284 = vmatmul.mubr.bf16.gmra.mrb[84].mxu0 %v2488_v41  ;;  %2301 = vmatmul.mubr.msk.bf16.gmra.mrb[84].mxu1 %vm986_vm0, %v2489_v42 }
  0xf7   : > { %1291 = vmatprep.mubr.bf16.mxu0 %v2490_v43  ;;  %2304 = vmatprep.mubr.msk.bf16.mxu1 %vm986_vm0, %v2492_v44 }
  0xfe   : > { %1292 = vmatmul.mubr.bf16.gmra.mrb[88].mxu0 %v2493_v45  ;;  %2305 = vmatmul.mubr.msk.bf16.gmra.mrb[88].mxu1 %vm986_vm0, %v2494_v46 }
  0xff   : > { %1299 = vmatprep.mubr.bf16.mxu0 %v2495_v47  ;;  %2308 = vmatprep.mubr.msk.bf16.mxu1 %vm986_vm0, %v2497_v48 }
 0x106   : > { %1300 = vmatmul.mubr.bf16.gmra.mrb[92].mxu0 %v2498_v49  ;;  %2309 = vmatmul.mubr.msk.bf16.gmra.mrb[92].mxu1 %vm986_vm0, %v2499_v50 }
 0x121   : > { %v2765_v51 = vpop.f32.mrb[0].mxu0  ;;  %v2767_v52 = vpop.f32.mrb[0].mxu1 }
 0x122   : > { %3364 = vst [vmem:[#allocation2_spill] sm:$0xff] %v2767_v52  ;;  %v1119_v53 = vpop.f32.mrb[1].mxu0  ;;  %v1311_v54 = vpop.f32.mrb[1].mxu1  ;;  %v2984_v52 = vld [vmem:[%s2836_s13 + $0x188] sm:$0xff] }
 0x123   : > { %v2769_v55 = vpop.f32.mrb[2].mxu0  ;;  %v2771_v56 = vpop.f32.mrb[2].mxu1  ;;  %v2829_v53 = vld [vmem:[%s3361_s2] ss:$0 sm:$0xff]  ;;  %3389 = vst [vmem:[#allocation27_spill] sm:$0xff] %v2984_v52  ;;  %v3008_v52 = vld [vmem:[%s2836_s13 + $0x1d0] sm:$0xff] }
 0x124   : > { %3365 = vst [vmem:[#allocation3_spill] sm:$0xff] %v2771_v56  ;;  %v1122_v57 = vpop.f32.mrb[3].mxu0  ;;  %v1314_v58 = vpop.f32.mrb[3].mxu1  ;;  %v2981_v56 = vld [vmem:[%s2836_s13 + $0x198] sm:$0xff]  ;;  %3397 = vst [vmem:[#allocation35_spill] sm:$0xff] %v3008_v52 }
 0x125   : > { %v1118_v57 = vadd.f32 %v2829_v53, %v2765_v51  ;;  %3388 = vst [vmem:[#allocation26_spill] sm:$0xff] %v2981_v56  ;;  %v3005_v56 = vld [vmem:[%s2836_s13 + $0x160] sm:$0xff] }
 0x126   : > { %3396 = vst [vmem:[#allocation34_spill] sm:$0xff] %v3005_v56  ;;  %v3031_v56 = vld [vmem:[%s2836_s13 + $0x1e0] sm:$0xff] }
 0x127   : > { %3404 = vst [vmem:[#allocation42_spill] sm:$0xff] %v3031_v56 }
 0x129   : > { %v1125_v59 = vpop.f32.mrb[4].mxu0  ;;  %v2773_v60 = vpop.f32.mrb[4].mxu1 }
 0x12a   : > { %3366 = vst [vmem:[#allocation4_spill] sm:$0xff] %v2773_v60  ;;  %v1127_v61 = vpop.f32.mrb[5].mxu0  ;;  %v1319_v62 = vpop.f32.mrb[5].mxu1  ;;  %v1126_v54 = vadd.f32 %v2829_v53, %v1125_v59  ;;  %v1121_v59 = vadd.f32 %v2829_v53, %v2769_v55  ;;  %v2856_v55 = vld [vmem:[%s2836_s13 + $0x8] sm:$0xff]  ;;  %v2987_v60 = vld [vmem:[%s2836_s13 + $0x150] sm:$0xff] }
 0x12b   : > { %v1128_v63 = vpop.f32.mrb[6].mxu0  ;;  %v2775_v0 = vpop.f32.mrb[6].mxu1  ;;  %v1663_v62 = vld [vmem:[%s2836_s13 + $0x10] sm:$0xff]  ;;  %3390 = vst [vmem:[#allocation28_spill] sm:$0xff] %v2987_v60  ;;  %v3011_v60 = vld [vmem:[%s2836_s13 + $0x1c0] sm:$0xff] }
 0x12c   : > { %3367 = vst [vmem:[#allocation5_spill] sm:$0xff] %v2775_v0  ;;  %v1130_v1 = vpop.f32.mrb[7].mxu0  ;;  %v1322_v2 = vpop.f32.mrb[7].mxu1  ;;  %v2978_v0 = vld [vmem:[%s2836_s13 + $0x148] sm:$0xff]  ;;  %3398 = vst [vmem:[#allocation36_spill] sm:$0xff] %v3011_v60 }
 0x12d   : > { %v1129_v1 = vadd.f32 %v2829_v53, %v1128_v63  ;;  %v2851_v63 = vld [vmem:[%s2836_s13 + $0x18] sm:$0xff]  ;;  %3387 = vst [vmem:[#allocation25_spill] sm:$0xff] %v2978_v0  ;;  %v3002_v0 = vld [vmem:[%s2836_s13 + $0x1a8] sm:$0xff] }
 0x12e   : > { %3395 = vst [vmem:[#allocation33_spill] sm:$0xff] %v3002_v0  ;;  %v3028_v0 = vld [vmem:[%s2836_s13 + $0x1f0] sm:$0xff] }
 0x12f   : > { %3403 = vst [vmem:[#allocation41_spill] sm:$0xff] %v3028_v0 }
 0x131   : > { %v2777_v3 = vpop.f32.mrb[8].mxu0  ;;  %v2779_v4 = vpop.f32.mrb[8].mxu1 }
 0x132   : > { %3368 = vst [vmem:[#allocation6_spill] sm:$0xff] %v2779_v4  ;;  %v1135_v5 = vpop.f32.mrb[9].mxu0  ;;  %v1327_v6 = vpop.f32.mrb[9].mxu1  ;;  %v2975_v4 = vld [vmem:[%s2836_s13 + $0x180] sm:$0xff] }
 0x133   : > { %v2781_v7 = vpop.f32.mrb[10].mxu0  ;;  %v2783_v8 = vpop.f32.mrb[10].mxu1  ;;  %3386 = vst [vmem:[#allocation24_spill] sm:$0xff] %v2975_v4  ;;  %v3014_v4 = vld [vmem:[%s2836_s13 + $0x168] sm:$0xff] }
 0x134   : > { %3369 = vst [vmem:[#allocation7_spill] sm:$0xff] %v2783_v8  ;;  %v1138_v9 = vpop.f32.mrb[11].mxu0  ;;  %v1330_v10 = vpop.f32.mrb[11].mxu1  ;;  %v2969_v8 = vld [vmem:[%s2836_s13 + $0x140] sm:$0xff]  ;;  %3399 = vst [vmem:[#allocation37_spill] sm:$0xff] %v3014_v4  ;;  %v3043_v4 = vld [vmem:[%s2836_s13 + $0x178] sm:$0xff] }
 0x135   : > { %v1661_v9 = vld [vmem:[%s2836_s13] sm:$0xff]  ;;  %3384 = vst [vmem:[#allocation22_spill] sm:$0xff] %v2969_v8  ;;  %3405 = vst [vmem:[#allocation43_spill] sm:$0xff] %v3043_v4 }
 0x136   : > { %v2993_v8 = vld [vmem:[%s2836_s13 + $0x1a0] sm:$0xff] }
 0x137   : > { %3392 = vst [vmem:[#allocation30_spill] sm:$0xff] %v2993_v8  ;;  %v3020_v8 = vld [vmem:[%s2836_s13 + $0x1c8] sm:$0xff] }
 0x138   : > { %3401 = vst [vmem:[#allocation39_spill] sm:$0xff] %v3020_v8 }
 0x139   : > { %v2785_v11 = vpop.f32.mrb[12].mxu0  ;;  %v2787_v12 = vpop.f32.mrb[12].mxu1 }
 0x13a   : > { %3370 = vst [vmem:[#allocation8_spill] sm:$0xff] %v2787_v12  ;;  %v1143_v13 = vpop.f32.mrb[13].mxu0  ;;  %v1335_v14 = vpop.f32.mrb[13].mxu1  ;;  %v2972_v12 = vld [vmem:[%s2836_s13 + $0x190] sm:$0xff] }
 0x13b   : > { %v2789_v15 = vpop.f32.mrb[14].mxu0  ;;  %v2791_v16 = vpop.f32.mrb[14].mxu1  ;;  %3385 = vst [vmem:[#allocation23_spill] sm:$0xff] %v2972_v12  ;;  %v2999_v12 = vld [vmem:[%s2836_s13 + $0x1b8] sm:$0xff] }
 0x13c   : > { %3371 = vst [vmem:[#allocation9_spill] sm:$0xff] %v2791_v16  ;;  %v1146_v17 = vpop.f32.mrb[15].mxu0  ;;  %v1338_v18 = vpop.f32.mrb[15].mxu1  ;;  %v2966_v16 = vld [vmem:[%s2836_s13 + $0x138] sm:$0xff]  ;;  %3394 = vst [vmem:[#allocation32_spill] sm:$0xff] %v2999_v12 }
 0x13d   : > { %3383 = vst [vmem:[#allocation21_spill] sm:$0xff] %v2966_v16  ;;  %v2990_v16 = vld [vmem:[%s2836_s13 + $0x1b0] sm:$0xff] }
 0x13e   : > { %3391 = vst [vmem:[#allocation29_spill] sm:$0xff] %v2990_v16  ;;  %v3017_v16 = vld [vmem:[%s2836_s13 + $0x1d8] sm:$0xff] }
 0x13f   : > { %3400 = vst [vmem:[#allocation38_spill] sm:$0xff] %v3017_v16 }
 0x141   : > { %v2793_v19 = vpop.f32.mrb[16].mxu0  ;;  %v2795_v20 = vpop.f32.mrb[16].mxu1 }
 0x142   : > { %3372 = vst [vmem:[#allocation10_spill] sm:$0xff] %v2795_v20  ;;  %v1151_v21 = vpop.f32.mrb[17].mxu0  ;;  %v1343_v22 = vpop.f32.mrb[17].mxu1  ;;  %v2963_v20 = vld [vmem:[%s2836_s13 + $0x130] sm:$0xff] }
 0x143   : > { %v2797_v23 = vpop.f32.mrb[18].mxu0  ;;  %v2799_v24 = vpop.f32.mrb[18].mxu1  ;;  %3382 = vst [vmem:[#allocation20_spill] sm:$0xff] %v2963_v20  ;;  %v2996_v20 = vld [vmem:[%s2836_s13 + $0x158] sm:$0xff] }
 0x144   : > { %3373 = vst [vmem:[#allocation11_spill] sm:$0xff] %v2799_v24  ;;  %v1154_v25 = vpop.f32.mrb[19].mxu0  ;;  %v1346_v26 = vpop.f32.mrb[19].mxu1  ;;  %v2957_v24 = vld [vmem:[%s2836_s13 + $0x120] sm:$0xff]  ;;  %3393 = vst [vmem:[#allocation31_spill] sm:$0xff] %v2996_v20 }
 0x145   : > { %v2861_v26 = vld [vmem:[%s2836_s13 + $0x30] sm:$0xff]  ;;  %3380 = vst [vmem:[#allocation18_spill] sm:$0xff] %v2957_v24 }
 0x149   : > { %v2801_v27 = vpop.f32.mrb[20].mxu0  ;;  %v2803_v28 = vpop.f32.mrb[20].mxu1 }
 0x14a   : > { %3374 = vst [vmem:[#allocation12_spill] sm:$0xff] %v2803_v28  ;;  %v1159_v29 = vpop.f32.mrb[21].mxu0  ;;  %v1351_v30 = vpop.f32.mrb[21].mxu1  ;;  %v2960_v28 = vld [vmem:[%s2836_s13 + $0x128] sm:$0xff] }
 0x14b   : > { %v2805_v31 = vpop.f32.mrb[22].mxu0  ;;  %v2807_v32 = vpop.f32.mrb[22].mxu1  ;;  %v2864_v29 = vld [vmem:[%s2836_s13 + $0x20] sm:$0xff]  ;;  %v2867_v30 = vld [vmem:[%s2836_s13 + $0x38] sm:$0xff]  ;;  %3381 = vst [vmem:[#allocation19_spill] sm:$0xff] %v2960_v28  ;;  %v3025_v28 = vld [vmem:[%s2836_s13 + $0x170] sm:$0xff] }
 0x14c   : > { %3375 = vst [vmem:[#allocation13_spill] sm:$0xff] %v2807_v32  ;;  %v1162_v33 = vpop.f32.mrb[23].mxu0  ;;  %v1354_v34 = vpop.f32.mrb[23].mxu1  ;;  %v2954_v32 = vld [vmem:[%s2836_s13 + $0x118] sm:$0xff]  ;;  %3402 = vst [vmem:[#allocation40_spill] sm:$0xff] %v3025_v28 }
 0x14d   : > { %v2870_v33 = vld [vmem:[%s2836_s13 + $0x28] sm:$0xff]  ;;  %v2873_v34 = vld [vmem:[%s2836_s13 + $0x50] sm:$0xff] }
 0x151   : > { %v2809_v35 = vpop.f32.mrb[24].mxu0  ;;  %v2811_v36 = vpop.f32.mrb[24].mxu1 }
 0x152   : > { %3376 = vst [vmem:[#allocation14_spill] sm:$0xff] %v2811_v36  ;;  %v1167_v37 = vpop.f32.mrb[25].mxu0  ;;  %v1359_v38 = vpop.f32.mrb[25].mxu1  ;;  %v2951_v36 = vld [vmem:[%s2836_s13 + $0x110] sm:$0xff] }
 0x153   : > { %v2813_v39 = vpop.f32.mrb[26].mxu0  ;;  %v2815_v40 = vpop.f32.mrb[26].mxu1  ;;  %v2876_v37 = vld [vmem:[%s2836_s13 + $0x40] sm:$0xff]  ;;  %v2879_v38 = vld [vmem:[%s2836_s13 + $0x58] sm:$0xff] }
 0x154   : > { %3377 = vst [vmem:[#allocation15_spill] sm:$0xff] %v2815_v40  ;;  %v1170_v41 = vpop.f32.mrb[27].mxu0  ;;  %v1362_v42 = vpop.f32.mrb[27].mxu1  ;;  %v2945_v40 = vld [vmem:[%s2836_s13 + $0x100] sm:$0xff] }
 0x155   : > { %v2882_v41 = vld [vmem:[%s2836_s13 + $0x48] sm:$0xff]  ;;  %v2885_v42 = vld [vmem:[%s2836_s13 + $0x70] sm:$0xff] }
 0x159   : > { %v2817_v43 = vpop.f32.mrb[28].mxu0  ;;  %v2819_v44 = vpop.f32.mrb[28].mxu1 }
 0x15a   : > { %3378 = vst [vmem:[#allocation16_spill] sm:$0xff] %v2819_v44  ;;  %v1175_v45 = vpop.f32.mrb[29].mxu0  ;;  %v1367_v46 = vpop.f32.mrb[29].mxu1  ;;  %v2948_v44 = vld [vmem:[%s2836_s13 + $0x108] sm:$0xff] }
 0x15b   : > { %v2821_v47 = vpop.f32.mrb[30].mxu0  ;;  %v2823_v48 = vpop.f32.mrb[30].mxu1  ;;  %v2888_v45 = vld [vmem:[%s2836_s13 + $0x60] sm:$0xff]  ;;  %v2891_v46 = vld [vmem:[%s2836_s13 + $0x78] sm:$0xff] }
 0x15c   : > { %3379 = vst [vmem:[#allocation17_spill] sm:$0xff] %v2823_v48  ;;  %v1178_v49 = vpop.f32.mrb[31].mxu0  ;;  %v1370_v50 = vpop.f32.mrb[31].mxu1  ;;  %v2942_v48 = vld [vmem:[%s2836_s13 + $0xe8] sm:$0xff] }
 0x15d   : > { %v2894_v49 = vld [vmem:[%s2836_s13 + $0x68] sm:$0xff]  ;;  %v2897_v50 = vld [vmem:[%s2836_s13 + $0x90] sm:$0xff] }
 0x161   : > { %v2841_v58 = vpop.f32.mrb[32].mxu0  ;;  %v2250_v61 = vpop.f32.mrb[32].mxu1 }
 0x162   : > { %v1415_v2 = vadd.f32 %v2250_v61, %v1126_v54  ;;  %v1183_v5 = vpop.f32.mrb[33].mxu0  ;;  %v1406_v6 = vpop.f32.mrb[33].mxu1  ;;  %v2900_v54 = vld [vmem:[%s2836_s13 + $0x80] sm:$0xff]  ;;  %v2906_v61 = vld [vmem:[%s2836_s13 + $0x88] sm:$0xff] }
 0x163   : > { %v1407_v51 = vadd.f32 %v1406_v6, %v1118_v57  ;;  %v2848_v10 = vpop.f32.mrb[34].mxu0  ;;  %v2251_v13 = vpop.f32.mrb[34].mxu1  ;;  %v2903_v57 = vld [vmem:[%s2836_s13 + $0x98] sm:$0xff]  ;;  %v2918_v5 = vld [vmem:[%s2836_s13 + $0xa8] sm:$0xff]  ;;  %v2921_v6 = vld [vmem:[%s2836_s13 + $0xd0] sm:$0xff] }
 0x164   : > { %v2853_v14 = vadd.f32 %v1663_v62, %v1415_v2  ;;  %v1418_v17 = vadd.f32 %v2251_v13, %v1129_v1  ;;  %v1186_v18 = vpop.f32.mrb[35].mxu0  ;;  %v1409_v21 = vpop.f32.mrb[35].mxu1  ;;  %v2909_v62 = vld [vmem:[%s2836_s13 + $0xb0] sm:$0xff]  ;;  %v2912_v1 = vld [vmem:[%s2836_s13 + $0xa0] sm:$0xff]  ;;  %v2915_v2 = vld [vmem:[%s2836_s13 + $0xb8] sm:$0xff] }
 0x165   : > { %v2858_v22 = vadd.f32 %v1661_v9, %v1407_v51  ;;  %v1410_v25 = vadd.f32 %v1409_v21, %v1121_v59  ;;  %v2924_v9 = vld [vmem:[%s2836_s13 + $0xc0] sm:$0xff]  ;;  %v2927_v59 = vld [vmem:[%s2836_s13 + $0xd8] sm:$0xff]  ;;  %v2930_v51 = vld [vmem:[%s2836_s13 + $0xc8] sm:$0xff] }
 0x166   : > { %v2933_v13 = vld [vmem:[%s2836_s13 + $0xf0] sm:$0xff]  ;;  %v2936_v18 = vld [vmem:[%s2836_s13 + $0xe0] sm:$0xff]  ;;  %v2939_v21 = vld [vmem:[%s2836_s13 + $0xf8] sm:$0xff]  ;;  %v1791_v20 = vmax.f32 %v2853_v14, 0.0  ;;  %v1728_v12 = vadd.f32 %v2851_v63, %v1418_v17  ;;  %v1142_v17 = vadd.f32 %v2829_v53, %v2785_v11 }
 0x167   : > { %v1789_v52 = vmax.f32 %v2858_v22, 0.0  ;;  %v1726_v60 = vadd.f32 %v2856_v55, %v1410_v25  ;;  %v3046_v14 = vld [vmem:[%s2836_s13 + $0x1f8] sm:$0xff]  ;;  %v3049_v63 = vld [vmem:[%s2836_s13 + $0x1e8] sm:$0xff]  ;;  %v1134_v55 = vadd.f32 %v2829_v53, %v2777_v3  ;;  %v1137_v3 = vadd.f32 %v2829_v53, %v2781_v7 }
 0x168   : > { %3406 = vst [vmem:[#allocation44_spill] sm:$0xff] %v3046_v14  ;;  %3407 = vst [vmem:[#allocation45_spill] sm:$0xff] %v3049_v63  ;;  %v1855_v22 = vmin.f32 %v1791_v20, 1.0  ;;  %v1792_v28 = vmax.f32 %v1728_v12, 0.0  ;;  %v1145_v14 = vadd.f32 %v2829_v53, %v2789_v15 }
 0x169   : > { %v1853_v25 = vmin.f32 %v1789_v52, 1.0  ;;  %v1790_v56 = vmax.f32 %v1726_v60, 0.0  ;;  %v3055_v0 = vpop.f32.mrb[36].mxu0  ;;  %v2254_v4 = vpop.f32.mrb[36].mxu1 }
 0x16a   : > { %v1856_v63 = vmin.f32 %v1792_v28, 1.0  ;;  %v1431_v8 = vadd.f32 %v2254_v4, %v1142_v17  ;;  %v1191_v16 = vpop.f32.mrb[37].mxu0  ;;  %v1422_v11 = vpop.f32.mrb[37].mxu1  ;;  %1920 = vst.msk [vmem:[%s3040_s17 + $0x10] sm:$0xff] %vm1917_vm1, %v1855_v22 }
 0x16b   : > { %v1854_v12 = vmin.f32 %v1790_v56, 1.0  ;;  %v1423_v52 = vadd.f32 %v1422_v11, %v1134_v55  ;;  %v3063_v60 = vpop.f32.mrb[38].mxu0  ;;  %v2255_v20 = vpop.f32.mrb[38].mxu1  ;;  %1918 = vst.msk [vmem:[%s3040_s17] sm:$0xff] %vm1917_vm1, %v1853_v25 }
 0x16c   : > { %v1731_v15 = vadd.f32 %v2861_v26, %v1431_v8  ;;  %v1434_v24 = vadd.f32 %v2255_v20, %v1145_v14  ;;  %v1194_v28 = vpop.f32.mrb[39].mxu0  ;;  %v1425_v4 = vpop.f32.mrb[39].mxu1  ;;  %1921 = vst.msk [vmem:[%s3040_s17 + $0x18] sm:$0xff] %vm1917_vm1, %v1856_v63  ;;  %v1158_v8 = vadd.f32 %v2829_v53, %v2801_v27  ;;  %v1150_v63 = vadd.f32 %v2829_v53, %v2793_v19 }
 0x16d   : > { %v1729_v16 = vadd.f32 %v2864_v29, %v1423_v52  ;;  %v1426_v17 = vadd.f32 %v1425_v4, %v1137_v3  ;;  %1919 = vst.msk [vmem:[%s3040_s17 + $0x8] sm:$0xff] %vm1917_vm1, %v1854_v12  ;;  %v1153_v19 = vadd.f32 %v2829_v53, %v2797_v23 }
 0x16e   : > { %v1795_v7 = vmax.f32 %v1731_v15, 0.0  ;;  %v1732_v56 = vadd.f32 %v2867_v30, %v1434_v24  ;;  %v1161_v24 = vadd.f32 %v2829_v53, %v2805_v31 }
 0x16f   : > { %v1793_v22 = vmax.f32 %v1729_v16, 0.0  ;;  %v1730_v55 = vadd.f32 %v2870_v33, %v1426_v17 }
 0x170   : > { %v1859_v26 = vmin.f32 %v1795_v7, 1.0  ;;  %v1796_v14 = vmax.f32 %v1732_v56, 0.0 }
 0x171   : > { %v1857_v29 = vmin.f32 %v1793_v22, 1.0  ;;  %v1794_v25 = vmax.f32 %v1730_v55, 0.0  ;;  %v3079_v11 = vpop.f32.mrb[40].mxu0  ;;  %v2258_v3 = vpop.f32.mrb[40].mxu1 }
 0x172   : > { %v1860_v30 = vmin.f32 %v1796_v14, 1.0  ;;  %v1447_v33 = vadd.f32 %v2258_v3, %v1158_v8  ;;  %v1199_v12 = vpop.f32.mrb[41].mxu0  ;;  %v1438_v27 = vpop.f32.mrb[41].mxu1  ;;  %1924 = vst.msk [vmem:[%s3040_s17 + $0x30] sm:$0xff] %vm1917_vm1, %v1859_v26 }
 0x173   : > { %v1858_v52 = vmin.f32 %v1794_v25, 1.0  ;;  %v1439_v20 = vadd.f32 %v1438_v27, %v1150_v63  ;;  %v3087_v15 = vpop.f32.mrb[42].mxu0  ;;  %v2259_v28 = vpop.f32.mrb[42].mxu1  ;;  %1922 = vst.msk [vmem:[%s3040_s17 + $0x20] sm:$0xff] %vm1917_vm1, %v1857_v29  ;;  %v1166_v63 = vadd.f32 %v2829_v53, %v2809_v35 }
 0x174   : > { %v1735_v31 = vadd.f32 %v2873_v34, %v1447_v33  ;;  %v1450_v4 = vadd.f32 %v2259_v28, %v1161_v24  ;;  %v1202_v16 = vpop.f32.mrb[43].mxu0  ;;  %v1441_v17 = vpop.f32.mrb[43].mxu1  ;;  %1925 = vst.msk [vmem:[%s3040_s17 + $0x38] sm:$0xff] %vm1917_vm1, %v1860_v30  ;;  %v1174_v34 = vadd.f32 %v2829_v53, %v2817_v43  ;;  %v1169_v43 = vadd.f32 %v2829_v53, %v2813_v39 }
 0x175   : > { %v1733_v7 = vadd.f32 %v2876_v37, %v1439_v20  ;;  %v1442_v56 = vadd.f32 %v1441_v17, %v1153_v19  ;;  %1923 = vst.msk [vmem:[%s3040_s17 + $0x28] sm:$0xff] %vm1917_vm1, %v1858_v52 }
 0x176   : > { %v1799_v23 = vmax.f32 %v1735_v31, 0.0  ;;  %v1736_v22 = vadd.f32 %v2879_v38, %v1450_v4  ;;  %v1177_v38 = vadd.f32 %v2829_v53, %v2821_v47 }
 0x177   : > { %v1797_v55 = vmax.f32 %v1733_v7, 0.0  ;;  %v1734_v8 = vadd.f32 %v2882_v41, %v1442_v56 }
 0x178   : > { %v1863_v26 = vmin.f32 %v1799_v23, 1.0  ;;  %v1800_v14 = vmax.f32 %v1736_v22, 0.0  ;;  %v1182_v22 = vadd.f32 %v2829_v53, %v2841_v58 }
 0x179   : > { %v1861_v37 = vmin.f32 %v1797_v55, 1.0  ;;  %v1798_v29 = vmax.f32 %v1734_v8, 0.0  ;;  %v1205_v25 = vpop.f32.mrb[44].mxu0  ;;  %v2262_v3 = vpop.f32.mrb[44].mxu1 }
 0x17a   : > { %v1864_v24 = vmin.f32 %v1800_v14, 1.0  ;;  %v1463_v30 = vadd.f32 %v2262_v3, %v1174_v34  ;;  %v1207_v41 = vpop.f32.mrb[45].mxu0  ;;  %v1454_v33 = vpop.f32.mrb[45].mxu1  ;;  %1928 = vst.msk [vmem:[%s3040_s17 + $0x50] sm:$0xff] %vm1917_vm1, %v1863_v26 }
 0x17b   : > { %v1862_v35 = vmin.f32 %v1798_v29, 1.0  ;;  %v1455_v12 = vadd.f32 %v1454_v33, %v1166_v63  ;;  %v1208_v27 = vpop.f32.mrb[46].mxu0  ;;  %v2263_v19 = vpop.f32.mrb[46].mxu1  ;;  %1926 = vst.msk [vmem:[%s3040_s17 + $0x40] sm:$0xff] %vm1917_vm1, %v1861_v37 }
 0x17c   : > { %v1739_v52 = vadd.f32 %v2885_v42, %v1463_v30  ;;  %v1466_v47 = vadd.f32 %v2263_v19, %v1177_v38  ;;  %v1210_v20 = vpop.f32.mrb[47].mxu0  ;;  %v1457_v28 = vpop.f32.mrb[47].mxu1  ;;  %1929 = vst.msk [vmem:[%s3040_s17 + $0x58] sm:$0xff] %vm1917_vm1, %v1864_v24  ;;  %v1190_v42 = vadd.f32 %v2829_v53, %v3055_v0  ;;  %v1185_v0 = vadd.f32 %v2829_v53, %v2848_v10 }
 0x17d   : > { %v1737_v31 = vadd.f32 %v2888_v45, %v1455_v12  ;;  %v1458_v4 = vadd.f32 %v1457_v28, %v1169_v43  ;;  %1927 = vst.msk [vmem:[%s3040_s17 + $0x48] sm:$0xff] %vm1917_vm1, %v1862_v35  ;;  %v1206_v19 = vadd.f32 %v2829_v53, %v1205_v25  ;;  %v1201_v25 = vadd.f32 %v2829_v53, %v3087_v15 }
 0x17e   : > { %v1803_v16 = vmax.f32 %v1739_v52, 0.0  ;;  %v1740_v39 = vadd.f32 %v2891_v46, %v1466_v47  ;;  %v1193_v46 = vadd.f32 %v2829_v53, %v3063_v60  ;;  %v1198_v47 = vadd.f32 %v2829_v53, %v3079_v11 }
 0x17f   : > { %v1801_v17 = vmax.f32 %v1737_v31, 0.0  ;;  %v1738_v7 = vadd.f32 %v2894_v49, %v1458_v4  ;;  %v1209_v4 = vadd.f32 %v2829_v53, %v1208_v27 }
 0x180   : > { %v1867_v56 = vmin.f32 %v1803_v16, 1.0  ;;  %v1804_v23 = vmax.f32 %v1740_v39, 0.0 }
 0x181   : > { %v1865_v45 = vmin.f32 %v1801_v17, 1.0  ;;  %v1802_v55 = vmax.f32 %v1738_v7, 0.0  ;;  %v1213_v8 = vpop.f32.mrb[48].mxu0  ;;  %v2266_v34 = vpop.f32.mrb[48].mxu1 }
 0x182   : > { %v1868_v26 = vmin.f32 %v1804_v23, 1.0  ;;  %v1479_v14 = vadd.f32 %v2266_v34, %v1190_v42  ;;  %v1215_v49 = vpop.f32.mrb[49].mxu0  ;;  %v1470_v63 = vpop.f32.mrb[49].mxu1  ;;  %1932 = vst.msk [vmem:[%s3040_s17 + $0x70] sm:$0xff] %vm1917_vm1, %v1867_v56 }
 0x183   : > { %v1866_v58 = vmin.f32 %v1802_v55, 1.0  ;;  %v1471_v37 = vadd.f32 %v1470_v63, %v1182_v22  ;;  %v1216_v29 = vpop.f32.mrb[50].mxu0  ;;  %v2267_v3 = vpop.f32.mrb[50].mxu1  ;;  %1930 = vst.msk [vmem:[%s3040_s17 + $0x60] sm:$0xff] %vm1917_vm1, %v1865_v45  ;;  %v1214_v63 = vadd.f32 %v2829_v53, %v1213_v8 }
 0x184   : > { %v1743_v38 = vadd.f32 %v2897_v50, %v1479_v14  ;;  %v1482_v60 = vadd.f32 %v2267_v3, %v1193_v46  ;;  %v1218_v24 = vpop.f32.mrb[51].mxu0  ;;  %v1473_v30 = vpop.f32.mrb[51].mxu1  ;;  %1933 = vst.msk [vmem:[%s3040_s17 + $0x78] sm:$0xff] %vm1917_vm1, %v1868_v26 }
 0x185   : > { %v1741_v41 = vadd.f32 %v2900_v54, %v1471_v37  ;;  %v1474_v33 = vadd.f32 %v1473_v30, %v1185_v0  ;;  %1931 = vst.msk [vmem:[%s3040_s17 + $0x68] sm:$0xff] %vm1917_vm1, %v1866_v58 }
 0x186   : > { %v1807_v43 = vmax.f32 %v1743_v38, 0.0  ;;  %v1744_v10 = vadd.f32 %v2903_v57, %v1482_v60 }
 0x187   : > { %v1805_v35 = vmax.f32 %v1741_v41, 0.0  ;;  %v1742_v12 = vadd.f32 %v2906_v61, %v1474_v33 }
 0x188   : > { %v1871_v50 = vmin.f32 %v1807_v43, 1.0  ;;  %v1808_v52 = vmax.f32 %v1744_v10, 0.0 }
 0x189   : > { %v1869_v20 = vmin.f32 %v1805_v35, 1.0  ;;  %v1806_v54 = vmax.f32 %v1742_v12, 0.0  ;;  %v1221_v28 = vpop.f32.mrb[52].mxu0  ;;  %v2270_v31 = vpop.f32.mrb[52].mxu1 }
 0x18a   : > { %v1872_v57 = vmin.f32 %v1808_v52, 1.0  ;;  %v1495_v16 = vadd.f32 %v2270_v31, %v1206_v19  ;;  %v1223_v39 = vpop.f32.mrb[53].mxu0  ;;  %v1486_v61 = vpop.f32.mrb[53].mxu1  ;;  %1936 = vst.msk [vmem:[%s3040_s17 + $0x90] sm:$0xff] %vm1917_vm1, %v1871_v50  ;;  %v1222_v14 = vadd.f32 %v2829_v53, %v1221_v28 }
 0x18b   : > { %v1870_v17 = vmin.f32 %v1806_v54, 1.0  ;;  %v1487_v11 = vadd.f32 %v1486_v61, %v1198_v47  ;;  %v1224_v7 = vpop.f32.mrb[54].mxu0  ;;  %v2271_v42 = vpop.f32.mrb[54].mxu1  ;;  %1934 = vst.msk [vmem:[%s3040_s17 + $0x80] sm:$0xff] %vm1917_vm1, %v1869_v20 }
 0x18c   : > { %v1747_v56 = vadd.f32 %v2909_v62, %v1495_v16  ;;  %v1498_v27 = vadd.f32 %v2271_v42, %v1209_v4  ;;  %v1226_v23 = vpop.f32.mrb[55].mxu0  ;;  %v1489_v22 = vpop.f32.mrb[55].mxu1  ;;  %1937 = vst.msk [vmem:[%s3040_s17 + $0x98] sm:$0xff] %vm1917_vm1, %v1872_v57  ;;  %v1225_v3 = vadd.f32 %v2829_v53, %v1224_v7 }
 0x18d   : > { %v1745_v45 = vadd.f32 %v2912_v1, %v1487_v11  ;;  %v1490_v55 = vadd.f32 %v1489_v22, %v1201_v25  ;;  %1935 = vst.msk [vmem:[%s3040_s17 + $0x88] sm:$0xff] %vm1917_vm1, %v1870_v17 }
 0x18e   : > { %v1811_v34 = vmax.f32 %v1747_v56, 0.0  ;;  %v1748_v15 = vadd.f32 %v2915_v2, %v1498_v27 }
 0x18f   : > { %v1809_v46 = vmax.f32 %v1745_v45, 0.0  ;;  %v1746_v26 = vadd.f32 %v2918_v5, %v1490_v55  ;;  %v1217_v5 = vadd.f32 %v2829_v53, %v1216_v29 }
 0x190   : > { %v1875_v62 = vmin.f32 %v1811_v34, 1.0  ;;  %v1812_v49 = vmax.f32 %v1748_v15, 0.0 }
 0x191   : > { %v1873_v0 = vmin.f32 %v1809_v46, 1.0  ;;  %v1810_v58 = vmax.f32 %v1746_v26, 0.0  ;;  %v1229_v1 = vpop.f32.mrb[56].mxu0  ;;  %v2274_v37 = vpop.f32.mrb[56].mxu1 }
 0x192   : > { %v1876_v38 = vmin.f32 %v1812_v49, 1.0  ;;  %v1511_v2 = vadd.f32 %v2274_v37, %v1222_v14  ;;  %v1231_v60 = vpop.f32.mrb[57].mxu0  ;;  %v1502_v24 = vpop.f32.mrb[57].mxu1  ;;  %1940 = vst.msk [vmem:[%s3040_s17 + $0xb0] sm:$0xff] %vm1917_vm1, %v1875_v62 }
 0x193   : > { %v1874_v30 = vmin.f32 %v1810_v58, 1.0  ;;  %v1503_v41 = vadd.f32 %v1502_v24, %v1214_v63  ;;  %v1232_v8 = vpop.f32.mrb[58].mxu0  ;;  %v2275_v33 = vpop.f32.mrb[58].mxu1  ;;  %1938 = vst.msk [vmem:[%s3040_s17 + $0xa0] sm:$0xff] %vm1917_vm1, %v1873_v0 }
 0x194   : > { %v1751_v43 = vadd.f32 %v2921_v6, %v1511_v2  ;;  %v1514_v10 = vadd.f32 %v2275_v33, %v1225_v3  ;;  %v1234_v35 = vpop.f32.mrb[59].mxu0  ;;  %v1505_v12 = vpop.f32.mrb[59].mxu1  ;;  %1941 = vst.msk [vmem:[%s3040_s17 + $0xb8] sm:$0xff] %vm1917_vm1, %v1876_v38  ;;  %v1230_v6 = vadd.f32 %v2829_v53, %v1229_v1 }
 0x195   : > { %v1749_v19 = vadd.f32 %v2924_v9, %v1503_v41  ;;  %v1506_v50 = vadd.f32 %v1505_v12, %v1217_v5  ;;  %1939 = vst.msk [vmem:[%s3040_s17 + $0xa8] sm:$0xff] %vm1917_vm1, %v1874_v30 }
 0x196   : > { %v1815_v29 = vmax.f32 %v1751_v43, 0.0  ;;  %v1752_v52 = vadd.f32 %v2927_v59, %v1514_v10  ;;  %v1233_v59 = vadd.f32 %v2829_v53, %v1232_v8 }
 0x197   : > { %v1813_v47 = vmax.f32 %v1749_v19, 0.0  ;;  %v1750_v20 = vadd.f32 %v2930_v51, %v1506_v50 }
 0x198   : > { %v1879_v54 = vmin.f32 %v1815_v29, 1.0  ;;  %v1816_v28 = vmax.f32 %v1752_v52, 0.0 }
 0x199   : > { %v1877_v31 = vmin.f32 %v1813_v47, 1.0  ;;  %v1814_v4 = vmax.f32 %v1750_v20, 0.0  ;;  %v1237_v57 = vpop.f32.mrb[60].mxu0  ;;  %v2278_v16 = vpop.f32.mrb[60].mxu1 }
 0x19a   : > { %v1880_v9 = vmin.f32 %v1816_v28, 1.0  ;;  %v1238_v39 = vadd.f32 %v2829_v53, %v1237_v57  ;;  %v1239_v61 = vpop.f32.mrb[61].mxu0  ;;  %v1518_v25 = vpop.f32.mrb[61].mxu1  ;;  %1944 = vst.msk [vmem:[%s3040_s17 + $0xd0] sm:$0xff] %vm1917_vm1, %v1879_v54 }
 0x19b   : > { %v1878_v51 = vmin.f32 %v1814_v4, 1.0  ;;  %v1519_v17 = vadd.f32 %v1518_v25, %v1230_v6  ;;  %v1240_v11 = vpop.f32.mrb[62].mxu0  ;;  %v2279_v7 = vpop.f32.mrb[62].mxu1  ;;  %1942 = vst.msk [vmem:[%s3040_s17 + $0xc0] sm:$0xff] %vm1917_vm1, %v1877_v31 }
 0x19c   : > { %v1527_v42 = vadd.f32 %v2278_v16, %v1238_v39  ;;  %v1241_v56 = vadd.f32 %v2829_v53, %v1240_v11  ;;  %v1242_v27 = vpop.f32.mrb[63].mxu0  ;;  %v1521_v23 = vpop.f32.mrb[63].mxu1  ;;  %1945 = vst.msk [vmem:[%s3040_s17 + $0xd8] sm:$0xff] %vm1917_vm1, %v1880_v9 }
 0x19d   : > { %v1753_v22 = vadd.f32 %v2936_v18, %v1519_v17  ;;  %v1522_v45 = vadd.f32 %v1521_v23, %v1233_v59  ;;  %1943 = vst.msk [vmem:[%s3040_s17 + $0xc8] sm:$0xff] %vm1917_vm1, %v1878_v51 }
 0x19e   : > { %v1755_v55 = vadd.f32 %v2933_v13, %v1527_v42  ;;  %v1530_v34 = vadd.f32 %v2279_v7, %v1241_v56 }
 0x19f   : > { %v1817_v15 = vmax.f32 %v1753_v22, 0.0  ;;  %v1754_v46 = vadd.f32 %v2942_v48, %v1522_v45 }
 0x1a0   : > { %v1819_v26 = vmax.f32 %v1755_v55, 0.0  ;;  %v1756_v14 = vadd.f32 %v2939_v21, %v1530_v34  ;;  %v3409_v55 = vld [vmem:[#allocation19_spill] sm:$0xff] }
 0x1a1   : > { %v1881_v62 = vmin.f32 %v1817_v15, 1.0  ;;  %v1818_v49 = vmax.f32 %v1754_v46, 0.0  ;;  %v1245_v63 = vpop.f32.mrb[64].mxu0  ;;  %v2282_v0 = vpop.f32.mrb[64].mxu1 }
 0x1a2   : > { %v1883_v18 = vmin.f32 %v1819_v26, 1.0  ;;  %v1820_v58 = vmax.f32 %v1756_v14, 0.0  ;;  %v1246_v1 = vadd.f32 %v2829_v53, %v1245_v63  ;;  %v1247_v13 = vpop.f32.mrb[65].mxu0  ;;  %v1534_v37 = vpop.f32.mrb[65].mxu1 }
 0x1a3   : > { %v1882_v3 = vmin.f32 %v1818_v49, 1.0  ;;  %v1248_v38 = vpop.f32.mrb[66].mxu0  ;;  %v2283_v2 = vpop.f32.mrb[66].mxu1  ;;  %1946 = vst.msk [vmem:[%s3040_s17 + $0xe0] sm:$0xff] %vm1917_vm1, %v1881_v62 }
 0x1a4   : > { %v1884_v48 = vmin.f32 %v1820_v58, 1.0  ;;  %v1535_v21 = vadd.f32 %v1534_v37, %v1246_v1  ;;  %v1249_v60 = vadd.f32 %v2829_v53, %v1248_v38  ;;  %v1250_v24 = vpop.f32.mrb[67].mxu0  ;;  %v1537_v5 = vpop.f32.mrb[67].mxu1  ;;  %1948 = vst.msk [vmem:[%s3040_s17 + $0xf0] sm:$0xff] %vm1917_vm1, %v1883_v18  ;;  %v3410_v38 = vld [vmem:[#allocation20_spill] sm:$0xff] }
 0x1a5   : > { %1947 = vst.msk [vmem:[%s3040_s17 + $0xe8] sm:$0xff] %vm1917_vm1, %v1882_v3 }
 0x1a6   : > { %v1757_v30 = vadd.f32 %v2945_v40, %v1535_v21  ;;  %v1538_v41 = vadd.f32 %v1537_v5, %v1249_v60  ;;  %1949 = vst.msk [vmem:[%s3040_s17 + $0xf8] sm:$0xff] %vm1917_vm1, %v1884_v48  ;;  %v3411_v21 = vld [vmem:[#allocation4_spill] sm:$0xff]  ;;  %v3412_v5 = vld [vmem:[#allocation21_spill] sm:$0xff] }
 0x1a7   : > { %v1318_v60 = vadd.f32 %v2829_v53, %v3411_v21 }
 0x1a8   : > { %v1821_v8 = vmax.f32 %v1757_v30, 0.0  ;;  %v1758_v33 = vadd.f32 %v2948_v44, %v1538_v41  ;;  %v3413_v41 = vld [vmem:[#allocation2_spill] sm:$0xff] }
 0x1a9   : > { %v1253_v43 = vpop.f32.mrb[68].mxu0  ;;  %v2286_v10 = vpop.f32.mrb[68].mxu1 }
 0x1aa   : > { %v1885_v35 = vmin.f32 %v1821_v8, 1.0  ;;  %v1822_v12 = vmax.f32 %v1758_v33, 0.0  ;;  %v1254_v19 = vadd.f32 %v2829_v53, %v1253_v43  ;;  %v1255_v50 = vpop.f32.mrb[69].mxu0  ;;  %v1550_v29 = vpop.f32.mrb[69].mxu1  ;;  %v1310_v8 = vadd.f32 %v2829_v53, %v3413_v41 }
 0x1ab   : > { %v1256_v52 = vpop.f32.mrb[70].mxu0  ;;  %v2287_v47 = vpop.f32.mrb[70].mxu1 }
 0x1ac   : > { %v1886_v20 = vmin.f32 %v1822_v12, 1.0  ;;  %v1543_v40 = vadd.f32 %v2282_v0, %v1254_v19  ;;  %v1257_v54 = vadd.f32 %v2829_v53, %v1256_v52  ;;  %v1258_v28 = vpop.f32.mrb[71].mxu0  ;;  %v1553_v6 = vpop.f32.mrb[71].mxu1  ;;  %1950 = vst.msk [vmem:[%s3040_s17 + $0x100] sm:$0xff] %vm1917_vm1, %v1885_v35  ;;  %v3414_v52 = vld [vmem:[#allocation3_spill] sm:$0xff] }
 0x1ae   : > { %v1759_v44 = vadd.f32 %v2951_v36, %v1543_v40  ;;  %v1546_v31 = vadd.f32 %v2283_v2, %v1257_v54  ;;  %1951 = vst.msk [vmem:[%s3040_s17 + $0x108] sm:$0xff] %vm1917_vm1, %v1886_v20  ;;  %v3415_v20 = vld [vmem:[#allocation5_spill] sm:$0xff] }
 0x1af   : > { %v1321_v40 = vadd.f32 %v2829_v53, %v3415_v20 }
 0x1b0   : > { %v1823_v4 = vmax.f32 %v1759_v44, 0.0  ;;  %v1760_v57 = vadd.f32 %v2954_v32, %v1546_v31  ;;  %v3408_v32 = vld [vmem:[#allocation18_spill] sm:$0xff] }
 0x1b1   : > { %v1261_v16 = vpop.f32.mrb[72].mxu0  ;;  %v3209_v9 = vpop.f32.mrb[72].mxu1 }
 0x1b2   : > { %v1887_v39 = vmin.f32 %v1823_v4, 1.0  ;;  %v1824_v61 = vmax.f32 %v1760_v57, 0.0  ;;  %v1262_v25 = vadd.f32 %v2829_v53, %v1261_v16  ;;  %v1263_v59 = vpop.f32.mrb[73].mxu0  ;;  %v1566_v51 = vpop.f32.mrb[73].mxu1  ;;  %v3416_v4 = vld [vmem:[#allocation23_spill] sm:$0xff] }
 0x1b3   : > { %v1264_v17 = vpop.f32.mrb[74].mxu0  ;;  %v3212_v11 = vpop.f32.mrb[74].mxu1 }
 0x1b4   : > { %v1888_v36 = vmin.f32 %v1824_v61, 1.0  ;;  %v1551_v7 = vadd.f32 %v1550_v29, %v1262_v25  ;;  %v1265_v42 = vadd.f32 %v2829_v53, %v1264_v17  ;;  %v1266_v56 = vpop.f32.mrb[75].mxu0  ;;  %v1569_v27 = vpop.f32.mrb[75].mxu1  ;;  %1952 = vst.msk [vmem:[%s3040_s17 + $0x110] sm:$0xff] %vm1917_vm1, %v1887_v39  ;;  %v3417_v25 = vld [vmem:[#allocation24_spill] sm:$0xff] }
 0x1b6   : > { %v1761_v23 = vadd.f32 %v3408_v32, %v1551_v7  ;;  %v1554_v22 = vadd.f32 %v1553_v6, %v1265_v42  ;;  %1953 = vst.msk [vmem:[%s3040_s17 + $0x118] sm:$0xff] %vm1917_vm1, %v1888_v36  ;;  %v3418_v7 = vld [vmem:[#allocation22_spill] sm:$0xff] }
 0x1b8   : > { %v1825_v45 = vmax.f32 %v1761_v23, 0.0  ;;  %v1762_v34 = vadd.f32 %v3409_v55, %v1554_v22  ;;  %v3419_v23 = vld [vmem:[#allocation6_spill] sm:$0xff] }
 0x1b9   : > { %v1269_v15 = vpop.f32.mrb[76].mxu0  ;;  %v3221_v46 = vpop.f32.mrb[76].mxu1 }
 0x1ba   : > { %v1889_v26 = vmin.f32 %v1825_v45, 1.0  ;;  %v1826_v14 = vmax.f32 %v1762_v34, 0.0  ;;  %v1270_v62 = vadd.f32 %v2829_v53, %v1269_v15  ;;  %v1271_v49 = vpop.f32.mrb[77].mxu0  ;;  %v3224_v63 = vpop.f32.mrb[77].mxu1  ;;  %v3420_v45 = vld [vmem:[#allocation26_spill] sm:$0xff]  ;;  %v3421_v34 = vld [vmem:[#allocation27_spill] sm:$0xff] }
 0x1bb   : > { %v1272_v0 = vpop.f32.mrb[78].mxu0  ;;  %v3226_v18 = vpop.f32.mrb[78].mxu1 }
 0x1bc   : > { %v1890_v58 = vmin.f32 %v1826_v14, 1.0  ;;  %v1559_v1 = vadd.f32 %v2286_v10, %v1270_v62  ;;  %v1273_v13 = vadd.f32 %v2829_v53, %v1272_v0  ;;  %v1274_v37 = vpop.f32.mrb[79].mxu0  ;;  %v3229_v3 = vpop.f32.mrb[79].mxu1  ;;  %1954 = vst.msk [vmem:[%s3040_s17 + $0x120] sm:$0xff] %vm1917_vm1, %v1889_v26  ;;  %v3422_v26 = vld [vmem:[#allocation8_spill] sm:$0xff]  ;;  %v3423_v0 = vld [vmem:[#allocation25_spill] sm:$0xff] }
 0x1bd   : > { %v1334_v14 = vadd.f32 %v2829_v53, %v3422_v26 }
 0x1be   : > { %v1763_v2 = vadd.f32 %v3410_v38, %v1559_v1  ;;  %v1562_v48 = vadd.f32 %v2287_v47, %v1273_v13  ;;  %1955 = vst.msk [vmem:[%s3040_s17 + $0x128] sm:$0xff] %vm1917_vm1, %v1890_v58  ;;  %v1313_v47 = vadd.f32 %v2829_v53, %v3414_v52  ;;  %v3424_v1 = vld [vmem:[#allocation7_spill] sm:$0xff]  ;;  %v3426_v52 = vld [vmem:[#allocation29_spill] sm:$0xff] }
 0x1c0   : > { %v1827_v24 = vmax.f32 %v1763_v2, 0.0  ;;  %v1764_v30 = vadd.f32 %v3412_v5, %v1562_v48 }
 0x1c1   : > { %v1277_v33 = vpop.f32.mrb[80].mxu0  ;;  %v2298_v43 = vpop.f32.mrb[80].mxu1 }
 0x1c2   : > { %v1891_v10 = vmin.f32 %v1827_v24, 1.0  ;;  %v1828_v35 = vmax.f32 %v1764_v30, 0.0  ;;  %v1278_v12 = vadd.f32 %v2829_v53, %v1277_v33  ;;  %v1607_v19 = vadd.f32 %v2298_v43, %v1318_v60  ;;  %v1279_v50 = vpop.f32.mrb[81].mxu0  ;;  %v1598_v29 = vpop.f32.mrb[81].mxu1 }
 0x1c3   : > { %v1599_v54 = vadd.f32 %v1598_v29, %v1310_v8  ;;  %v1280_v28 = vpop.f32.mrb[82].mxu0  ;;  %v2299_v6 = vpop.f32.mrb[82].mxu1  ;;  %v3425_v8 = vld [vmem:[#allocation9_spill] sm:$0xff] }
 0x1c4   : > { %v1892_v44 = vmin.f32 %v1828_v35, 1.0  ;;  %v1567_v31 = vadd.f32 %v1566_v51, %v1278_v12  ;;  %v1775_v57 = vadd.f32 %v3416_v4, %v1607_v19  ;;  %v1281_v16 = vadd.f32 %v2829_v53, %v1280_v28  ;;  %v1282_v39 = vpop.f32.mrb[83].mxu0  ;;  %v1601_v61 = vpop.f32.mrb[83].mxu1  ;;  %1956 = vst.msk [vmem:[%s3040_s17 + $0x130] sm:$0xff] %vm1917_vm1, %v1891_v10  ;;  %v3427_v28 = vld [vmem:[#allocation30_spill] sm:$0xff]  ;;  %v3428_v4 = vld [vmem:[#allocation28_spill] sm:$0xff] }
 0x1c5   : > { %v1773_v59 = vadd.f32 %v3417_v25, %v1599_v54  ;;  %v1610_v17 = vadd.f32 %v2299_v6, %v1321_v40  ;;  %v1602_v36 = vadd.f32 %v1601_v61, %v1313_v47  ;;  %v1326_v51 = vadd.f32 %v2829_v53, %v3419_v23  ;;  %v3429_v39 = vld [vmem:[#allocation10_spill] sm:$0xff] }
 0x1c6   : > { %v1765_v42 = vadd.f32 %v3418_v7, %v1567_v31  ;;  %v1839_v56 = vmax.f32 %v1775_v57, 0.0  ;;  %v1570_v32 = vadd.f32 %v1569_v27, %v1281_v16  ;;  %1957 = vst.msk [vmem:[%s3040_s17 + $0x138] sm:$0xff] %vm1917_vm1, %v1892_v44  ;;  %v1329_v27 = vadd.f32 %v2829_v53, %v3424_v1 }
 0x1c7   : > { %v1837_v22 = vmax.f32 %v1773_v59, 0.0  ;;  %v1776_v55 = vadd.f32 %v3420_v45, %v1610_v17  ;;  %v1774_v15 = vadd.f32 %v3421_v34, %v1602_v36  ;;  %v1337_v33 = vadd.f32 %v2829_v53, %v3425_v8  ;;  %v3430_v59 = vld [vmem:[#allocation32_spill] sm:$0xff]  ;;  %v3431_v36 = vld [vmem:[#allocation33_spill] sm:$0xff]  ;;  %v3434_v45 = vld [vmem:[#allocation11_spill] sm:$0xff] }
 0x1c8   : > { %v1829_v62 = vmax.f32 %v1765_v42, 0.0  ;;  %v1903_v49 = vmin.f32 %v1839_v56, 1.0  ;;  %v1766_v58 = vadd.f32 %v3423_v0, %v1570_v32  ;;  %v1342_v61 = vadd.f32 %v2829_v53, %v3429_v39  ;;  %v3432_v42 = vld [vmem:[#allocation12_spill] sm:$0xff]  ;;  %v3444_v39 = vld [vmem:[#allocation15_spill] sm:$0xff] }
 0x1c9   : > { %v1901_v13 = vmin.f32 %v1837_v22, 1.0  ;;  %v1840_v37 = vmax.f32 %v1776_v55, 0.0  ;;  %v1838_v38 = vmax.f32 %v1774_v15, 0.0  ;;  %v1285_v2 = vpop.f32.mrb[84].mxu0  ;;  %v2302_v48 = vpop.f32.mrb[84].mxu1  ;;  %v1350_v56 = vadd.f32 %v2829_v53, %v3432_v42 }
 0x1ca   : > { %v1893_v21 = vmin.f32 %v1829_v62, 1.0  ;;  %v1830_v60 = vmax.f32 %v1766_v58, 0.0  ;;  %v1286_v24 = vadd.f32 %v2829_v53, %v1285_v2  ;;  %v1623_v5 = vadd.f32 %v2302_v48, %v1334_v14  ;;  %v1287_v30 = vpop.f32.mrb[85].mxu0  ;;  %v1614_v41 = vpop.f32.mrb[85].mxu1  ;;  %1968 = vst.msk [vmem:[%s3040_s17 + $0x190] sm:$0xff] %vm1917_vm1, %v1903_v49 }
 0x1cb   : > { %v1904_v43 = vmin.f32 %v1840_v37, 1.0  ;;  %v1902_v10 = vmin.f32 %v1838_v38, 1.0  ;;  %v1615_v35 = vadd.f32 %v1614_v41, %v1326_v51  ;;  %v1288_v12 = vpop.f32.mrb[86].mxu0  ;;  %v2303_v19 = vpop.f32.mrb[86].mxu1  ;;  %1966 = vst.msk [vmem:[%s3040_s17 + $0x180] sm:$0xff] %vm1917_vm1, %v1901_v13  ;;  %v3433_v51 = vld [vmem:[#allocation31_spill] sm:$0xff] }
 0x1cc   : > { %v1894_v50 = vmin.f32 %v1830_v60, 1.0  ;;  %v1575_v29 = vadd.f32 %v3209_v9, %v1286_v24  ;;  %v1779_v47 = vadd.f32 %v3426_v52, %v1623_v5  ;;  %v1289_v20 = vadd.f32 %v2829_v53, %v1288_v12  ;;  %v1290_v40 = vpop.f32.mrb[87].mxu0  ;;  %v1617_v54 = vpop.f32.mrb[87].mxu1  ;;  %1958 = vst.msk [vmem:[%s3040_s17 + $0x140] sm:$0xff] %vm1917_vm1, %v1893_v21  ;;  %v3435_v13 = vld [vmem:[#allocation13_spill] sm:$0xff]  ;;  %v3436_v30 = vld [vmem:[#allocation35_spill] sm:$0xff] }
 0x1cd   : > { %v1777_v6 = vadd.f32 %v3427_v28, %v1615_v35  ;;  %v1626_v44 = vadd.f32 %v2303_v19, %v1337_v33  ;;  %v1618_v31 = vadd.f32 %v1617_v54, %v1329_v27  ;;  %1967 = vst.msk [vmem:[%s3040_s17 + $0x188] sm:$0xff] %vm1917_vm1, %v1902_v10  ;;  %1969 = vst.msk [vmem:[%s3040_s17 + $0x198] sm:$0xff] %vm1917_vm1, %v1904_v43  ;;  %v3437_v10 = vld [vmem:[#allocation36_spill] sm:$0xff]  ;;  %v3440_v54 = vld [vmem:[#allocation38_spill] sm:$0xff] }
 0x1ce   : > { %v1767_v57 = vadd.f32 %v3428_v4, %v1575_v29  ;;  %v1843_v16 = vmax.f32 %v1779_v47, 0.0  ;;  %v1578_v9 = vadd.f32 %v3212_v11, %v1289_v20  ;;  %1959 = vst.msk [vmem:[%s3040_s17 + $0x148] sm:$0xff] %vm1917_vm1, %v1894_v50  ;;  %v1345_v11 = vadd.f32 %v2829_v53, %v3434_v45  ;;  %v3438_v50 = vld [vmem:[#allocation34_spill] sm:$0xff]  ;;  %v3445_v45 = vld [vmem:[#allocation17_spill] sm:$0xff] }
 0x1cf   : > { %v1841_v25 = vmax.f32 %v1777_v6, 0.0  ;;  %v1780_v17 = vadd.f32 %v3430_v59, %v1626_v44  ;;  %v1778_v7 = vadd.f32 %v3431_v36, %v1618_v31  ;;  %v1353_v37 = vadd.f32 %v2829_v53, %v3435_v13  ;;  %v3439_v47 = vld [vmem:[#allocation14_spill] sm:$0xff]  ;;  %v3441_v6 = vld [vmem:[#allocation39_spill] sm:$0xff]  ;;  %v3442_v31 = vld [vmem:[#allocation16_spill] sm:$0xff] }
 0x1d0   : > { %v1831_v32 = vmax.f32 %v1767_v57, 0.0  ;;  %v1907_v23 = vmin.f32 %v1843_v16, 1.0  ;;  %v1768_v22 = vadd.f32 %v3433_v51, %v1578_v9  ;;  %v3443_v9 = vld [vmem:[#allocation37_spill] sm:$0xff] }
 0x1d1   : > { %v1905_v55 = vmin.f32 %v1841_v25, 1.0  ;;  %v1844_v34 = vmax.f32 %v1780_v17, 0.0  ;;  %v1842_v15 = vmax.f32 %v1778_v7, 0.0  ;;  %v1293_v26 = vpop.f32.mrb[88].mxu0  ;;  %v2306_v14 = vpop.f32.mrb[88].mxu1 }
 0x1d2   : > { %v1895_v62 = vmin.f32 %v1831_v32, 1.0  ;;  %v1832_v49 = vmax.f32 %v1768_v22, 0.0  ;;  %v1294_v0 = vadd.f32 %v2829_v53, %v1293_v26  ;;  %v1639_v58 = vadd.f32 %v2306_v14, %v1350_v56  ;;  %v1295_v1 = vpop.f32.mrb[89].mxu0  ;;  %v1630_v27 = vpop.f32.mrb[89].mxu1  ;;  %1972 = vst.msk [vmem:[%s3040_s17 + $0x1b0] sm:$0xff] %vm1917_vm1, %v1907_v23 }
 0x1d3   : > { %v1908_v38 = vmin.f32 %v1844_v34, 1.0  ;;  %v1906_v2 = vmin.f32 %v1842_v15, 1.0  ;;  %v1631_v48 = vadd.f32 %v1630_v27, %v1342_v61  ;;  %v1296_v21 = vpop.f32.mrb[90].mxu0  ;;  %v2307_v60 = vpop.f32.mrb[90].mxu1  ;;  %1970 = vst.msk [vmem:[%s3040_s17 + $0x1a0] sm:$0xff] %vm1917_vm1, %v1905_v55 }
 0x1d4   : > { %v1896_v24 = vmin.f32 %v1832_v49, 1.0  ;;  %v1583_v5 = vadd.f32 %v3224_v63, %v1294_v0  ;;  %v1783_v41 = vadd.f32 %v3436_v30, %v1639_v58  ;;  %v1297_v8 = vadd.f32 %v2829_v53, %v1296_v21  ;;  %v1298_v33 = vpop.f32.mrb[91].mxu0  ;;  %v1633_v43 = vpop.f32.mrb[91].mxu1  ;;  %1960 = vst.msk [vmem:[%s3040_s17 + $0x150] sm:$0xff] %vm1917_vm1, %v1895_v62  ;;  %v2500_v53 = vld [vmem:[%s3361_s2] ss:$0 sm:$0xff] }
 0x1d5   : > { %v1781_v35 = vadd.f32 %v3437_v10, %v1631_v48  ;;  %v1642_v12 = vadd.f32 %v2307_v60, %v1353_v37  ;;  %v1634_v19 = vadd.f32 %v1633_v43, %v1345_v11  ;;  %1971 = vst.msk [vmem:[%s3040_s17 + $0x1a8] sm:$0xff] %vm1917_vm1, %v1906_v2  ;;  %1973 = vst.msk [vmem:[%s3040_s17 + $0x1b8] sm:$0xff] %vm1917_vm1, %v1908_v38  ;;  %v3446_v0 = vld [vmem:[#allocation41_spill] sm:$0xff]  ;;  %v3447_v37 = vld [vmem:[#allocation42_spill] sm:$0xff] }
 0x1d6   : > { %v1769_v29 = vadd.f32 %v3438_v50, %v1583_v5  ;;  %v1847_v52 = vmax.f32 %v1783_v41, 0.0  ;;  %v1586_v63 = vadd.f32 %v3229_v3, %v1297_v8  ;;  %1961 = vst.msk [vmem:[%s3040_s17 + $0x158] sm:$0xff] %vm1917_vm1, %v1896_v24  ;;  %v1358_v20 = vadd.f32 %v2500_v53, %v3439_v47  ;;  %v3448_v21 = vld [vmem:[#allocation40_spill] sm:$0xff]  ;;  %v3450_v8 = vld [vmem:[#allocation45_spill] sm:$0xff] }
 0x1d7   : > { %v1845_v40 = vmax.f32 %v1781_v35, 0.0  ;;  %v1784_v28 = vadd.f32 %v3440_v54, %v1642_v12  ;;  %v1782_v44 = vadd.f32 %v3441_v6, %v1634_v19  ;;  %v1366_v4 = vadd.f32 %v2500_v53, %v3442_v31  ;;  %v3449_v30 = vld [vmem:[#allocation44_spill] sm:$0xff]  ;;  %v3451_v35 = vld [vmem:[#allocation43_spill] sm:$0xff] }
 0x1d8   : > { %v1833_v57 = vmax.f32 %v1769_v29, 0.0  ;;  %v1911_v16 = vmin.f32 %v1847_v52, 1.0  ;;  %v1770_v3 = vadd.f32 %v3443_v9, %v1586_v63  ;;  %v1361_v61 = vadd.f32 %v2500_v53, %v3444_v39 }
 0x1d9   : > { %v1909_v25 = vmin.f32 %v1845_v40, 1.0  ;;  %v1848_v59 = vmax.f32 %v1784_v28, 0.0  ;;  %v1846_v17 = vmax.f32 %v1782_v44, 0.0  ;;  %v1301_v36 = vpop.f32.mrb[92].mxu0  ;;  %v2310_v7 = vpop.f32.mrb[92].mxu1  ;;  %v1369_v11 = vadd.f32 %v2500_v53, %v3445_v45 }
 0x1da   : > { %v1897_v42 = vmin.f32 %v1833_v57, 1.0  ;;  %v1834_v56 = vmax.f32 %v1770_v3, 0.0  ;;  %v1302_v32 = vadd.f32 %v2500_v53, %v1301_v36  ;;  %v1655_v23 = vadd.f32 %v2310_v7, %v1366_v4  ;;  %v1303_v51 = vpop.f32.mrb[93].mxu0  ;;  %v1646_v22 = vpop.f32.mrb[93].mxu1  ;;  %1976 = vst.msk [vmem:[%s3040_s17 + $0x1d0] sm:$0xff] %vm1917_vm1, %v1911_v16 }
 0x1db   : > { %v1912_v55 = vmin.f32 %v1848_v59, 1.0  ;;  %v1910_v34 = vmin.f32 %v1846_v17, 1.0  ;;  %v1647_v15 = vadd.f32 %v1646_v22, %v1358_v20  ;;  %v1304_v26 = vpop.f32.mrb[94].mxu0  ;;  %v2311_v14 = vpop.f32.mrb[94].mxu1  ;;  %1974 = vst.msk [vmem:[%s3040_s17 + $0x1c0] sm:$0xff] %vm1917_vm1, %v1909_v25 }
 0x1dc   : > { %v1898_v62 = vmin.f32 %v1834_v56, 1.0  ;;  %v1591_v49 = vadd.f32 %v3221_v46, %v1302_v32  ;;  %v1787_v58 = vadd.f32 %v3446_v0, %v1655_v23  ;;  %v1305_v1 = vadd.f32 %v2500_v53, %v1304_v26  ;;  %v1306_v27 = vpop.f32.mrb[95].mxu0  ;;  %v1649_v13 = vpop.f32.mrb[95].mxu1  ;;  %1962 = vst.msk [vmem:[%s3040_s17 + $0x160] sm:$0xff] %vm1917_vm1, %v1897_v42 }
 0x1dd   : > { %v1785_v38 = vadd.f32 %v3447_v37, %v1647_v15  ;;  %v1658_v2 = vadd.f32 %v2311_v14, %v1369_v11  ;;  %v1650_v48 = vadd.f32 %v1649_v13, %v1361_v61  ;;  %1975 = vst.msk [vmem:[%s3040_s17 + $0x1c8] sm:$0xff] %vm1917_vm1, %v1910_v34  ;;  %1977 = vst.msk [vmem:[%s3040_s17 + $0x1d8] sm:$0xff] %vm1917_vm1, %v1912_v55 }
 0x1de   : > { %v1771_v60 = vadd.f32 %v3448_v21, %v1591_v49  ;;  %v1851_v24 = vmax.f32 %v1787_v58, 0.0  ;;  %v1594_v46 = vadd.f32 %v3226_v18, %v1305_v1  ;;  %1963 = vst.msk [vmem:[%s3040_s17 + $0x168] sm:$0xff] %vm1917_vm1, %v1898_v62 }
 0x1df   : > { %v1849_v5 = vmax.f32 %v1785_v38, 0.0  ;;  %v1788_v41 = vadd.f32 %v3449_v30, %v1658_v2  ;;  %v1786_v33 = vadd.f32 %v3450_v8, %v1650_v48 }
 0x1e0   : > { %v1835_v43 = vmax.f32 %v1771_v60, 0.0  ;;  %v1915_v10 = vmin.f32 %v1851_v24, 1.0  ;;  %v1772_v12 = vadd.f32 %v3451_v35, %v1594_v46 }
 0x1e1   : > { %v1913_v19 = vmin.f32 %v1849_v5, 1.0  ;;  %v1852_v50 = vmax.f32 %v1788_v41, 0.0  ;;  %v1850_v29 = vmax.f32 %v1786_v33, 0.0 }
 0x1e2   : > { %v1899_v18 = vmin.f32 %v1835_v43, 1.0  ;;  %v1836_v52 = vmax.f32 %v1772_v12, 0.0  ;;  %1980 = vst.msk [vmem:[%s3040_s17 + $0x1f0] sm:$0xff] %vm1917_vm1, %v1915_v10 }
 0x1e3   : > { %v1916_v63 = vmin.f32 %v1852_v50, 1.0  ;;  %v1914_v53 = vmin.f32 %v1850_v29, 1.0  ;;  %1978 = vst.msk [vmem:[%s3040_s17 + $0x1e0] sm:$0xff] %vm1917_vm1, %v1913_v19 }
 0x1e4   : > { %v1900_v47 = vmin.f32 %v1836_v52, 1.0  ;;  %1964 = vst.msk [vmem:[%s3040_s17 + $0x170] sm:$0xff] %vm1917_vm1, %v1899_v18 }
 0x1e5   : > { %1979 = vst.msk [vmem:[%s3040_s17 + $0x1e8] sm:$0xff] %vm1917_vm1, %v1914_v53  ;;  %1981 = vst.msk [vmem:[%s3040_s17 + $0x1f8] sm:$0xff] %vm1917_vm1, %v1916_v63 }
 0x1e6   : > { %1965 = vst.msk [vmem:[%s3040_s17 + $0x178] sm:$0xff] %vm1917_vm1, %v1900_v47 }
 0x1e7 PF: > { %s14_s15 = sadd.s32 1, %s2507_s15  }
 0x1e8   : > { %p11_p4 = scmp.ge.s32.totalorder %s14_s15, 6  }
 0x1ea   :  { %13 = sbr.rel (!%p11_p4) target bundleno = 1 (0x1), region = 69 }

</bundles_post_ra>
